<compile_context>
chip_gen: v7x
topology: tpu7x:2x2x1
jax: 0.10.0
libtpu: 0.0.40
codegen_flags: <defaults>
</compile_context>

<pallas_src>
import math
import functools

import jax
import jax.numpy as jnp
from jax.experimental import pallas as pl
from jax.experimental.pallas import tpu as pltpu


# ---------------------------------------------------------------------------
# LayerNorm helpers (torch-style: unbiased std, eps added to std)
# ---------------------------------------------------------------------------
def _layernorm_kernel(x, a, b, eps=1e-6):
    d = x.shape[-1]
    mean = jnp.mean(x, axis=-1, keepdims=True)
    var = jnp.sum((x - mean) ** 2, axis=-1, keepdims=True) * (1.0 / (d - 1))
    std = jnp.sqrt(var)
    # reciprocal on the EUP slot instead of a VPU divide
    return a * (x - mean) * pl.reciprocal(std + eps, approx=True) + b


def _layernorm_ref(x, a, b, eps=1e-6):
    d = x.shape[-1]
    mean = jnp.mean(x, axis=-1, keepdims=True)
    var = jnp.sum((x - mean) ** 2, axis=-1, keepdims=True) / (d - 1)
    std = jnp.sqrt(var)
    return a * (x - mean) / (std + eps) + b


# ---------------------------------------------------------------------------
# Fused encoder kernel: one grid point = (batch_tile, layer).
# The activation lives in x_vmem across the (trailing, "arbitrary") layer axis.
# ---------------------------------------------------------------------------
def fused_transformer_kernel(x_ref, wqkv_ref, wagg_ref, bagg_ref,
                             ln1a_ref, ln1b_ref, w1_ref, b1_ref,
                             w2_ref, b2_ref, ln2a_ref, ln2b_ref,
                             lnfa_ref, lnfb_ref, o_ref,
                             x_vmem, att_vmem,
                             *, n_heads, tile_b, seq, d_model):
    D = d_model
    dh = D // n_heads
    tbs = tile_b * seq

    l = pl.program_id(1)
    n_layers = pl.num_programs(1)

    # ---- initialise the resident activation at the first layer ----
    @pl.when(l == 0)
    def _():
        x_vmem[...] = x_ref[...]

    x = x_vmem[...]                                            # (tbs, D) f32
    xb = x.astype(jnp.bfloat16)

    # ---- fused QKV projection: one (tbs, D) @ (D, 3D) bf16 matmul ----
    # Q columns are pre-scaled by 1/sqrt(d_model) at pack time.
    qkv = jnp.dot(xb, wqkv_ref[0], preferred_element_type=jnp.float32)  # (tbs, 3D)
    qkv3 = qkv.reshape(tile_b, seq, 3 * D)

    # ---- multi-head attention; head outputs written lane-aligned into att_vmem
    # TODO(synk): for long sequences, tile K/V with an online-softmax
    # accumulator instead of materialising the full (b, S, S) score tensor.
    for hd in range(n_heads):                                  # static, small
        q = qkv3[:, :, hd * dh:(hd + 1) * dh].astype(jnp.bfloat16)
        k = qkv3[:, :, D + hd * dh:D + (hd + 1) * dh].astype(jnp.bfloat16)
        v = qkv3[:, :, 2 * D + hd * dh:2 * D + (hd + 1) * dh].astype(jnp.bfloat16)
        s = jnp.einsum("bqe,bke->bqk", q, k,
                       preferred_element_type=jnp.float32)      # (b, S, S) f32
        s = s - jnp.max(s, axis=-1, keepdims=True)
        p = jnp.exp(s)
        p = p * pl.reciprocal(jnp.sum(p, axis=-1, keepdims=True), approx=True)
        oh = jnp.einsum("bqk,bke->bqe", p.astype(jnp.bfloat16), v,
                        preferred_element_type=jnp.float32)     # (b, S, dh)
        att_vmem[:, hd * dh:(hd + 1) * dh] = oh.reshape(tbs, dh)

    # single full (tbs, D) @ (D, D) aggregation matmul
    att = jnp.dot(att_vmem[...].astype(jnp.bfloat16), wagg_ref[0],
                  preferred_element_type=jnp.float32) + bagg_ref[0]

    # ---- residual + LayerNorm 1 (f32) ----
    x1 = _layernorm_kernel(x + att, ln1a_ref[0], ln1b_ref[0])

    # ---- feed forward on the flattened (tbs, D) slab, bf16 matmuls ----
    hid = jnp.dot(x1.astype(jnp.bfloat16), w1_ref[0],
                  preferred_element_type=jnp.float32) + b1_ref[0]
    hid = jnp.maximum(hid, 0.0)
    ff = jnp.dot(hid.astype(jnp.bfloat16), w2_ref[0],
                 preferred_element_type=jnp.float32) + b2_ref[0]

    # ---- residual + LayerNorm 2, carry to next layer ----
    x2 = _layernorm_kernel(x1 + ff, ln2a_ref[0], ln2b_ref[0])
    x_vmem[...] = x2

    # ---- final encoder LayerNorm + mean pool over the sequence ----
    @pl.when(l == n_layers - 1)
    def _():
        xn = _layernorm_kernel(x2, lnfa_ref[...], lnfb_ref[...])
        o_ref[...] = jnp.mean(xn.reshape(tile_b, seq, D), axis=1)


def fused_encoder(x2d, packed, *, batch, seq, n_heads, d_model, tile_b):
    assert batch % tile_b == 0
    n_bt = batch // tile_b
    n_layers = packed["wqkv"].shape[0]
    dff = packed["w1"].shape[-1]
    D = d_model
    tbs = tile_b * seq

    def wspec(shape):
        # per-layer streamed weight block: (1, *shape), indexed by the layer axis
        return pl.BlockSpec((1,) + shape, lambda b, l: (l,) + (0,) * len(shape))

    in_specs = [
        pl.BlockSpec((tbs, D), lambda b, l: (b, 0)),     # x (fetched once per b)
        wspec((D, 3 * D)),                               # wqkv  (bf16)
        wspec((D, D)),                                   # wagg  (bf16)
        wspec((1, D)),                                   # bagg
        wspec((1, D)), wspec((1, D)),                    # ln1a, ln1b
        wspec((D, dff)), wspec((1, dff)),                # w1 (bf16), b1
        wspec((dff, D)), wspec((1, D)),                  # w2 (bf16), b2
        wspec((1, D)), wspec((1, D)),                    # ln2a, ln2b
        pl.BlockSpec((1, D), lambda b, l: (0, 0)),       # final LN a
        pl.BlockSpec((1, D), lambda b, l: (0, 0)),       # final LN b
    ]
    out_spec = pl.BlockSpec((tile_b, D), lambda b, l: (b, 0))

    kernel = functools.partial(
        fused_transformer_kernel, n_heads=n_heads, tile_b=tile_b,
        seq=seq, d_model=d_model)

    return pl.pallas_call(
        kernel,
        out_shape=jax.ShapeDtypeStruct((batch, D), jnp.float32),
        grid_spec=pltpu.PrefetchScalarGridSpec(
            num_scalar_prefetch=0,
            grid=(n_bt, n_layers),
            in_specs=in_specs,
            out_specs=out_spec,
            scratch_shapes=[
                pltpu.VMEM((tbs, D), jnp.float32),   # activation carry
                pltpu.VMEM((tbs, D), jnp.float32),   # lane-aligned head outputs
            ]),
        compiler_params=pltpu.CompilerParams(
            # batch tiles independent -> parallel (v7x megacore); layer axis carries state
            dimension_semantics=("parallel", "arbitrary"),
            # raise scoped VMEM above the 16/32 MiB defaults, headroom on v7x (64 MiB phys)
            vmem_limit_bytes=48 * 1024 * 1024),
    )(x2d, packed["wqkv"], packed["wagg"], packed["bagg"],
      packed["ln1a"], packed["ln1b"], packed["w1"], packed["b1"],
      packed["w2"], packed["b2"], packed["ln2a"], packed["ln2b"],
      packed["lnfa"], packed["lnfb"])


# ---------------------------------------------------------------------------
# Parameter construction (deterministic, synthetic) + one-time packing
# ---------------------------------------------------------------------------
def init_params(key, vocab_size, d_model, dff, h, encoder_count):
    dh = d_model // h
    keys = jax.random.split(key, 3 + encoder_count)

    params = {}
    params["emb"] = jax.random.normal(keys[0], (vocab_size, d_model), jnp.float32)
    params["w_last"] = jax.random.normal(keys[1], (d_model, 2), jnp.float32) * 0.05
    params["b_last"] = jnp.zeros((1, 2), jnp.float32)
    params["ln_f_a"] = jnp.ones((1, d_model), jnp.float32)
    params["ln_f_b"] = jnp.zeros((1, d_model), jnp.float32)

    layers = []
    for li in range(encoder_count):
        lk = jax.random.split(keys[3 + li], 8)
        layers.append(dict(
            wq=jax.random.normal(lk[0], (h, d_model, dh), jnp.float32) * 0.05,
            wk=jax.random.normal(lk[1], (h, d_model, dh), jnp.float32) * 0.05,
            wv=jax.random.normal(lk[2], (h, d_model, dh), jnp.float32) * 0.05,
            wagg=jax.random.normal(lk[3], (d_model, d_model), jnp.float32) * 0.05,
            bagg=jnp.zeros((1, d_model), jnp.float32),
            ln1a=jnp.ones((1, d_model), jnp.float32),
            ln1b=jnp.zeros((1, d_model), jnp.float32),
            w1=jax.random.normal(lk[4], (d_model, dff), jnp.float32) * 0.05,
            b1=jnp.zeros((1, dff), jnp.float32),
            w2=jax.random.normal(lk[5], (dff, d_model), jnp.float32) * 0.05,
            b2=jnp.zeros((1, d_model), jnp.float32),
            ln2a=jnp.ones((1, d_model), jnp.float32),
            ln2b=jnp.zeros((1, d_model), jnp.float32),
        ))
    params["layers"] = layers
    return params


def pack_params(params, *, h, d_model):
    """Stack per-layer weights for the layer-streamed kernel (called ONCE).

    - wqkv: (L, D, 3D) bf16, columns [Q heads | K heads | V heads]; Q columns
      pre-scaled by 1/sqrt(d_model) (attention scale folded in).
    - wagg: (L, D, D) bf16 (full aggregation weight, single matmul per layer).
    - w1/w2: bf16.  Biases / LayerNorm params stay f32.
    """
    dh = d_model // h
    scale = 1.0 / (d_model ** 0.5)

    def per_layer(name):
        return jnp.stack([lp[name] for lp in params["layers"]])

    wqkv = []
    for lp in params["layers"]:
        wq = lp["wq"].transpose(1, 0, 2).reshape(d_model, d_model) * scale
        wk = lp["wk"].transpose(1, 0, 2).reshape(d_model, d_model)
        wv = lp["wv"].transpose(1, 0, 2).reshape(d_model, d_model)
        wqkv.append(jnp.concatenate([wq, wk, wv], axis=1))       # (D, 3D)

    return dict(
        wqkv=jnp.stack(wqkv).astype(jnp.bfloat16),
        wagg=per_layer("wagg").astype(jnp.bfloat16),
        bagg=per_layer("bagg"),
        ln1a=per_layer("ln1a"), ln1b=per_layer("ln1b"),
        w1=per_layer("w1").astype(jnp.bfloat16), b1=per_layer("b1"),
        w2=per_layer("w2").astype(jnp.bfloat16), b2=per_layer("b2"),
        ln2a=per_layer("ln2a"), ln2b=per_layer("ln2b"),
        lnfa=params["ln_f_a"], lnfb=params["ln_f_b"],
    )


def positional_encoding_table(vocab_size, d_model):
    position = jnp.arange(vocab_size, dtype=jnp.float32)[:, None]
    div_term = jnp.exp(jnp.arange(0, d_model, 2, dtype=jnp.float32)
                       * (-math.log(10000.0) / d_model))
    pe = jnp.zeros((vocab_size, d_model), jnp.float32)
    pe = pe.at[:, 0::2].set(jnp.sin(position * div_term))
    pe = pe.at[:, 1::2].set(jnp.cos(position * div_term))
    return pe


# ---------------------------------------------------------------------------
# Full forward pass (jitted; packing hoisted out)
# ---------------------------------------------------------------------------
def transformer_forward(tokens, emb, w_last, b_last, packed, pe,
                        *, h, d_model, tile_b):
    B, S = tokens.shape
    # Embedding gather + scale + positional encoding (glue; gather stays in JAX)
    x = emb[tokens] * (d_model ** 0.5)
    x = x + pe[None, :S, :]
    pooled = fused_encoder(x.reshape(B * S, d_model), packed,
                           batch=B, seq=S, n_heads=h,
                           d_model=d_model, tile_b=tile_b)
    # Final Linear(d_model -> 2) in plain JAX (2-lane-wide kernel output would
    # only produce masked partial stores / a degenerate MXU matmul).
    return pooled @ w_last + b_last


# Pure-JAX f32 reference (same math as the PyTorch module) for a sanity check.
def transformer_reference(tokens, params, pe, *, h, d_model):
    B, S = tokens.shape
    x = params["emb"][tokens] * (d_model ** 0.5)
    x = x + pe[None, :S, :]
    hp = jax.lax.Precision.HIGHEST
    for lp in params["layers"]:
        heads = []
        for hd in range(h):
            q = jnp.einsum("bsd,de->bse", x, lp["wq"][hd], precision=hp)
            k = jnp.einsum("bsd,de->bse", x, lp["wk"][hd], precision=hp)
            v = jnp.einsum("bsd,de->bse", x, lp["wv"][hd], precision=hp)
            s = jnp.einsum("bqe,bke->bqk", q, k, precision=hp) / (d_model ** 0.5)
            p = jax.nn.softmax(s, axis=-1)
            heads.append(jnp.einsum("bqk,bke->bqe", p, v, precision=hp))
        att = jnp.concatenate(heads, axis=-1)
        att = jnp.einsum("bsd,de->bse", att, lp["wagg"], precision=hp) + lp["bagg"]
        x1 = _layernorm_ref(x + att, lp["ln1a"], lp["ln1b"])
        hid = jax.nn.relu(jnp.einsum("bsd,df->bsf", x1, lp["w1"], precision=hp) + lp["b1"])
        ff = jnp.einsum("bsf,fd->bsd", hid, lp["w2"], precision=hp) + lp["b2"]
        x = _layernorm_ref(x1 + ff, lp["ln2a"], lp["ln2b"])
    x = _layernorm_ref(x, params["ln_f_a"], params["ln_f_b"])
    x = jnp.mean(x, axis=1)
    return jnp.einsum("bd,dc->bc", x, params["w_last"], precision=hp) + params["b_last"]


if __name__ == "__main__":
    # Small shapes; B and tile_b chosen so the output block sublane dim is 8-aligned.
    vocab_size, d_model, dff, h, encoder_count = 50, 32, 64, 4, 2
    B, S, tile_b = 16, 8, 8

    key = jax.random.PRNGKey(0)
    k_tok, k_par = jax.random.split(key)
    tokens = jax.random.randint(k_tok, (B, S), 0, vocab_size, dtype=jnp.int32)
    params = init_params(k_par, vocab_size, d_model, dff, h, encoder_count)
    pe = positional_encoding_table(vocab_size, d_model)

    packed = pack_params(params, h=h, d_model=d_model)   # pack ONCE (hoisted)

    fwd = jax.jit(functools.partial(transformer_forward,
                                    h=h, d_model=d_model, tile_b=tile_b))
    out = fwd(tokens, params["emb"], params["w_last"], params["b_last"], packed, pe)
    out = jax.block_until_ready(out)
    assert out.shape == (B, 2), out.shape

    ref = transformer_reference(tokens, params, pe, h=h, d_model=d_model)
    ref = jax.block_until_ready(ref)
    # bf16 matmuls + approx reciprocals => slightly looser tolerance than f32.
    assert jnp.allclose(out, ref, atol=3e-2, rtol=3e-2), (out, ref)

    print("KERNEL_OK")
</pallas_src>

<mosaic_0001>
module attributes {stable_mosaic.version = 11 : i64} {
  func.func @fused_transformer_kernel(%arg0: i32, %arg1: i32, %arg2: memref<64x32xf32, #tpu.memory_space<vmem>>, %arg3: memref<1x32x96xbf16, #tpu.memory_space<vmem>>, %arg4: memref<1x32x32xbf16, #tpu.memory_space<vmem>>, %arg5: memref<1x1x32xf32, #tpu.memory_space<vmem>>, %arg6: memref<1x1x32xf32, #tpu.memory_space<vmem>>, %arg7: memref<1x1x32xf32, #tpu.memory_space<vmem>>, %arg8: memref<1x32x64xbf16, #tpu.memory_space<vmem>>, %arg9: memref<1x1x64xf32, #tpu.memory_space<vmem>>, %arg10: memref<1x64x32xbf16, #tpu.memory_space<vmem>>, %arg11: memref<1x1x32xf32, #tpu.memory_space<vmem>>, %arg12: memref<1x1x32xf32, #tpu.memory_space<vmem>>, %arg13: memref<1x1x32xf32, #tpu.memory_space<vmem>>, %arg14: memref<1x32xf32, #tpu.memory_space<vmem>>, %arg15: memref<1x32xf32, #tpu.memory_space<vmem>>, %arg16: memref<8x32xf32, #tpu.memory_space<vmem>>, %arg17: memref<64x32xf32, #tpu.memory_space<vmem>>, %arg18: memref<64x32xf32, #tpu.memory_space<vmem>>) attributes {dimension_semantics = [#tpu.dimension_semantics<parallel>, #tpu.dimension_semantics<arbitrary>], iteration_bounds = array<i64: 2, 2>, scalar_prefetch = 0 : i64, scratch_operands = 2 : i64, tpu.core_type = #tpu.core_type<tc>, window_params = [{transform_indices = @transform_0, window_bounds = array<i64: 64, 32>}, {transform_indices = @transform_1, window_bounds = array<i64: 1, 32, 96>}, {transform_indices = @transform_2, window_bounds = array<i64: 1, 32, 32>}, {transform_indices = @transform_3, window_bounds = array<i64: 1, 1, 32>}, {transform_indices = @transform_4, window_bounds = array<i64: 1, 1, 32>}, {transform_indices = @transform_5, window_bounds = array<i64: 1, 1, 32>}, {transform_indices = @transform_6, window_bounds = array<i64: 1, 32, 64>}, {transform_indices = @transform_7, window_bounds = array<i64: 1, 1, 64>}, {transform_indices = @transform_8, window_bounds = array<i64: 1, 64, 32>}, {transform_indices = @transform_9, window_bounds = array<i64: 1, 1, 32>}, {transform_indices = @transform_10, window_bounds = array<i64: 1, 1, 32>}, {transform_indices = @transform_11, window_bounds = array<i64: 1, 1, 32>}, {pipeline_mode = #tpu.pipeline_mode<synchronous>, transform_indices = @transform_12, window_bounds = array<i64: 1, 32>}, {pipeline_mode = #tpu.pipeline_mode<synchronous>, transform_indices = @transform_13, window_bounds = array<i64: 1, 32>}, {transform_indices = @transform_14, window_bounds = array<i64: 8, 32>}]} {
    %c0_i32 = arith.constant 0 : i32
    %0 = arith.cmpi eq, %arg1, %c0_i32 : i32
    %1 = arith.extui %0 : i1 to i32
    %c0_i32_0 = arith.constant 0 : i32
    %2 = arith.cmpi ne, %1, %c0_i32_0 : i32
    scf.if %2 {
      %c0_75 = arith.constant 0 : index
      %c0_76 = arith.constant 0 : index
      %180 = vector.load %arg2[%c0_75, %c0_76] : memref<64x32xf32, #tpu.memory_space<vmem>>, vector<64x32xf32>
      %c0_77 = arith.constant 0 : index
      %c0_78 = arith.constant 0 : index
      %181 = vector.load %arg17[%c0_77, %c0_78] : memref<64x32xf32, #tpu.memory_space<vmem>>, vector<64x32xf32>
      tpu.vector_store %arg17[%c0_77, %c0_78], %180 {strides = array<i32>} : memref<64x32xf32, #tpu.memory_space<vmem>>, vector<64x32xf32>,
    } else {
    }
    %c0 = arith.constant 0 : index
    %c0_1 = arith.constant 0 : index
    %3 = vector.load %arg17[%c0, %c0_1] : memref<64x32xf32, #tpu.memory_space<vmem>>, vector<64x32xf32>
    %4 = arith.truncf %3 : vector<64x32xf32> to vector<64x32xbf16>
    %c0_2 = arith.constant 0 : index
    %c0_3 = arith.constant 0 : index
    %c0_4 = arith.constant 0 : index
    %5 = vector.load %arg3[%c0_2, %c0_3, %c0_4] : memref<1x32x96xbf16, #tpu.memory_space<vmem>>, vector<1x32x96xbf16>
    %6 = vector.shape_cast %5 : vector<1x32x96xbf16> to vector<32x96xbf16>
    %cst = arith.constant dense<0.000000e+00> : vector<64x96xf32>
    %7 = tpu.matmul %4, %6, %cst {dimension_numbers = #tpu.dot_dimension_numbers<[1], [0], [0], [1], [0, 0, 1, 1], [], []>} : vector<64x32xbf16>, vector<32x96xbf16>, vector<64x96xf32> -> vector<64x96xf32>
    %8 = vector.shape_cast %7 : vector<64x96xf32> to vector<8x8x96xf32>
    %9 = vector.extract_strided_slice %8 {offsets = [0, 0, 0], sizes = [8, 8, 8], strides = [1, 1, 1]} : vector<8x8x96xf32> to vector<8x8x8xf32>
    %10 = arith.truncf %9 : vector<8x8x8xf32> to vector<8x8x8xbf16>
    %11 = vector.extract_strided_slice %8 {offsets = [0, 0, 32], sizes = [8, 8, 8], strides = [1, 1, 1]} : vector<8x8x96xf32> to vector<8x8x8xf32>
    %12 = arith.truncf %11 : vector<8x8x8xf32> to vector<8x8x8xbf16>
    %13 = vector.extract_strided_slice %8 {offsets = [0, 0, 64], sizes = [8, 8, 8], strides = [1, 1, 1]} : vector<8x8x96xf32> to vector<8x8x8xf32>
    %14 = arith.truncf %13 : vector<8x8x8xf32> to vector<8x8x8xbf16>
    "tpu.trace_start"() <{level = 10 : i32, message = "bqe,bke->bqk"}> : () -> ()
    %cst_5 = arith.constant dense<0.000000e+00> : vector<8x8x8xf32>
    %15 = tpu.matmul %10, %12, %cst_5 {dimension_numbers = #tpu.dot_dimension_numbers<[2], [2], [1], [1], [0, 0, 0, 1, 1, 1], [0], [0]>} : vector<8x8x8xbf16>, vector<8x8x8xbf16>, vector<8x8x8xf32> -> vector<8x8x8xf32>
    "tpu.trace_stop"() : () -> ()
    %cst_6 = arith.constant dense<0xFF800000> : vector<8x8xf32>
    %16 = vector.multi_reduction <maximumf>, %15, %cst_6 [2] : vector<8x8x8xf32> to vector<8x8xf32>
    %17 = vector.shape_cast %16 : vector<8x8xf32> to vector<8x8x1xf32>
    %18 = vector.broadcast %17 : vector<8x8x1xf32> to vector<8x8x8xf32>
    %19 = arith.subf %15, %18 : vector<8x8x8xf32>
    %20 = math.exp %19 : vector<8x8x8xf32>
    %cst_7 = arith.constant dense<0.000000e+00> : vector<8x8xf32>
    %21 = vector.multi_reduction <add>, %20, %cst_7 [2] : vector<8x8x8xf32> to vector<8x8xf32>
    %22 = vector.shape_cast %21 : vector<8x8xf32> to vector<8x8x1xf32>
    %23 = tpu.reciprocal %22 {approx = true} : vector<8x8x1xf32> -> vector<8x8x1xf32>
    %24 = vector.broadcast %23 : vector<8x8x1xf32> to vector<8x8x8xf32>
    %25 = arith.mulf %20, %24 : vector<8x8x8xf32>
    %26 = arith.truncf %25 : vector<8x8x8xf32> to vector<8x8x8xbf16>
    "tpu.trace_start"() <{level = 10 : i32, message = "bqk,bke->bqe"}> : () -> ()
    %cst_8 = arith.constant dense<0.000000e+00> : vector<8x8x8xf32>
    %27 = tpu.matmul %26, %14, %cst_8 {dimension_numbers = #tpu.dot_dimension_numbers<[2], [1], [1], [2], [0, 0, 0, 1, 1, 2], [0], [0]>} : vector<8x8x8xbf16>, vector<8x8x8xbf16>, vector<8x8x8xf32> -> vector<8x8x8xf32>
    "tpu.trace_stop"() : () -> ()
    %28 = vector.shape_cast %27 : vector<8x8x8xf32> to vector<64x8xf32>
    %c0_9 = arith.constant 0 : index
    %c0_10 = arith.constant 0 : index
    %29 = vector.load %arg18[%c0_9, %c0_10] : memref<64x32xf32, #tpu.memory_space<vmem>>, vector<64x8xf32>
    tpu.vector_store %arg18[%c0_9, %c0_10], %28 {strides = array<i32>} : memref<64x32xf32, #tpu.memory_space<vmem>>, vector<64x8xf32>,
    %30 = vector.extract_strided_slice %8 {offsets = [0, 0, 8], sizes = [8, 8, 8], strides = [1, 1, 1]} : vector<8x8x96xf32> to vector<8x8x8xf32>
    %31 = arith.truncf %30 : vector<8x8x8xf32> to vector<8x8x8xbf16>
    %32 = vector.extract_strided_slice %8 {offsets = [0, 0, 40], sizes = [8, 8, 8], strides = [1, 1, 1]} : vector<8x8x96xf32> to vector<8x8x8xf32>
    %33 = arith.truncf %32 : vector<8x8x8xf32> to vector<8x8x8xbf16>
    %34 = vector.extract_strided_slice %8 {offsets = [0, 0, 72], sizes = [8, 8, 8], strides = [1, 1, 1]} : vector<8x8x96xf32> to vector<8x8x8xf32>
    %35 = arith.truncf %34 : vector<8x8x8xf32> to vector<8x8x8xbf16>
    "tpu.trace_start"() <{level = 10 : i32, message = "bqe,bke->bqk"}> : () -> ()
    %cst_11 = arith.constant dense<0.000000e+00> : vector<8x8x8xf32>
    %36 = tpu.matmul %31, %33, %cst_11 {dimension_numbers = #tpu.dot_dimension_numbers<[2], [2], [1], [1], [0, 0, 0, 1, 1, 1], [0], [0]>} : vector<8x8x8xbf16>, vector<8x8x8xbf16>, vector<8x8x8xf32> -> vector<8x8x8xf32>
    "tpu.trace_stop"() : () -> ()
    %cst_12 = arith.constant dense<0xFF800000> : vector<8x8xf32>
    %37 = vector.multi_reduction <maximumf>, %36, %cst_12 [2] : vector<8x8x8xf32> to vector<8x8xf32>
    %38 = vector.shape_cast %37 : vector<8x8xf32> to vector<8x8x1xf32>
    %39 = vector.broadcast %38 : vector<8x8x1xf32> to vector<8x8x8xf32>
    %40 = arith.subf %36, %39 : vector<8x8x8xf32>
    %41 = math.exp %40 : vector<8x8x8xf32>
    %cst_13 = arith.constant dense<0.000000e+00> : vector<8x8xf32>
    %42 = vector.multi_reduction <add>, %41, %cst_13 [2] : vector<8x8x8xf32> to vector<8x8xf32>
    %43 = vector.shape_cast %42 : vector<8x8xf32> to vector<8x8x1xf32>
    %44 = tpu.reciprocal %43 {approx = true} : vector<8x8x1xf32> -> vector<8x8x1xf32>
    %45 = vector.broadcast %44 : vector<8x8x1xf32> to vector<8x8x8xf32>
    %46 = arith.mulf %41, %45 : vector<8x8x8xf32>
    %47 = arith.truncf %46 : vector<8x8x8xf32> to vector<8x8x8xbf16>
    "tpu.trace_start"() <{level = 10 : i32, message = "bqk,bke->bqe"}> : () -> ()
    %cst_14 = arith.constant dense<0.000000e+00> : vector<8x8x8xf32>
    %48 = tpu.matmul %47, %35, %cst_14 {dimension_numbers = #tpu.dot_dimension_numbers<[2], [1], [1], [2], [0, 0, 0, 1, 1, 2], [0], [0]>} : vector<8x8x8xbf16>, vector<8x8x8xbf16>, vector<8x8x8xf32> -> vector<8x8x8xf32>
    "tpu.trace_stop"() : () -> ()
    %49 = vector.shape_cast %48 : vector<8x8x8xf32> to vector<64x8xf32>
    %c0_15 = arith.constant 0 : index
    %c8 = arith.constant 8 : index
    %50 = vector.load %arg18[%c0_15, %c8] : memref<64x32xf32, #tpu.memory_space<vmem>>, vector<64x8xf32>
    tpu.vector_store %arg18[%c0_15, %c8], %49 {strides = array<i32>} : memref<64x32xf32, #tpu.memory_space<vmem>>, vector<64x8xf32>,
    %51 = vector.extract_strided_slice %8 {offsets = [0, 0, 16], sizes = [8, 8, 8], strides = [1, 1, 1]} : vector<8x8x96xf32> to vector<8x8x8xf32>
    %52 = arith.truncf %51 : vector<8x8x8xf32> to vector<8x8x8xbf16>
    %53 = vector.extract_strided_slice %8 {offsets = [0, 0, 48], sizes = [8, 8, 8], strides = [1, 1, 1]} : vector<8x8x96xf32> to vector<8x8x8xf32>
    %54 = arith.truncf %53 : vector<8x8x8xf32> to vector<8x8x8xbf16>
    %55 = vector.extract_strided_slice %8 {offsets = [0, 0, 80], sizes = [8, 8, 8], strides = [1, 1, 1]} : vector<8x8x96xf32> to vector<8x8x8xf32>
    %56 = arith.truncf %55 : vector<8x8x8xf32> to vector<8x8x8xbf16>
    "tpu.trace_start"() <{level = 10 : i32, message = "bqe,bke->bqk"}> : () -> ()
    %cst_16 = arith.constant dense<0.000000e+00> : vector<8x8x8xf32>
    %57 = tpu.matmul %52, %54, %cst_16 {dimension_numbers = #tpu.dot_dimension_numbers<[2], [2], [1], [1], [0, 0, 0, 1, 1, 1], [0], [0]>} : vector<8x8x8xbf16>, vector<8x8x8xbf16>, vector<8x8x8xf32> -> vector<8x8x8xf32>
    "tpu.trace_stop"() : () -> ()
    %cst_17 = arith.constant dense<0xFF800000> : vector<8x8xf32>
    %58 = vector.multi_reduction <maximumf>, %57, %cst_17 [2] : vector<8x8x8xf32> to vector<8x8xf32>
    %59 = vector.shape_cast %58 : vector<8x8xf32> to vector<8x8x1xf32>
    %60 = vector.broadcast %59 : vector<8x8x1xf32> to vector<8x8x8xf32>
    %61 = arith.subf %57, %60 : vector<8x8x8xf32>
    %62 = math.exp %61 : vector<8x8x8xf32>
    %cst_18 = arith.constant dense<0.000000e+00> : vector<8x8xf32>
    %63 = vector.multi_reduction <add>, %62, %cst_18 [2] : vector<8x8x8xf32> to vector<8x8xf32>
    %64 = vector.shape_cast %63 : vector<8x8xf32> to vector<8x8x1xf32>
    %65 = tpu.reciprocal %64 {approx = true} : vector<8x8x1xf32> -> vector<8x8x1xf32>
    %66 = vector.broadcast %65 : vector<8x8x1xf32> to vector<8x8x8xf32>
    %67 = arith.mulf %62, %66 : vector<8x8x8xf32>
    %68 = arith.truncf %67 : vector<8x8x8xf32> to vector<8x8x8xbf16>
    "tpu.trace_start"() <{level = 10 : i32, message = "bqk,bke->bqe"}> : () -> ()
    %cst_19 = arith.constant dense<0.000000e+00> : vector<8x8x8xf32>
    %69 = tpu.matmul %68, %56, %cst_19 {dimension_numbers = #tpu.dot_dimension_numbers<[2], [1], [1], [2], [0, 0, 0, 1, 1, 2], [0], [0]>} : vector<8x8x8xbf16>, vector<8x8x8xbf16>, vector<8x8x8xf32> -> vector<8x8x8xf32>
    "tpu.trace_stop"() : () -> ()
    %70 = vector.shape_cast %69 : vector<8x8x8xf32> to vector<64x8xf32>
    %c0_20 = arith.constant 0 : index
    %c16 = arith.constant 16 : index
    %71 = vector.load %arg18[%c0_20, %c16] : memref<64x32xf32, #tpu.memory_space<vmem>>, vector<64x8xf32>
    tpu.vector_store %arg18[%c0_20, %c16], %70 {strides = array<i32>} : memref<64x32xf32, #tpu.memory_space<vmem>>, vector<64x8xf32>,
    %72 = vector.extract_strided_slice %8 {offsets = [0, 0, 24], sizes = [8, 8, 8], strides = [1, 1, 1]} : vector<8x8x96xf32> to vector<8x8x8xf32>
    %73 = arith.truncf %72 : vector<8x8x8xf32> to vector<8x8x8xbf16>
    %74 = vector.extract_strided_slice %8 {offsets = [0, 0, 56], sizes = [8, 8, 8], strides = [1, 1, 1]} : vector<8x8x96xf32> to vector<8x8x8xf32>
    %75 = arith.truncf %74 : vector<8x8x8xf32> to vector<8x8x8xbf16>
    %76 = vector.extract_strided_slice %8 {offsets = [0, 0, 88], sizes = [8, 8, 8], strides = [1, 1, 1]} : vector<8x8x96xf32> to vector<8x8x8xf32>
    %77 = arith.truncf %76 : vector<8x8x8xf32> to vector<8x8x8xbf16>
    "tpu.trace_start"() <{level = 10 : i32, message = "bqe,bke->bqk"}> : () -> ()
    %cst_21 = arith.constant dense<0.000000e+00> : vector<8x8x8xf32>
    %78 = tpu.matmul %73, %75, %cst_21 {dimension_numbers = #tpu.dot_dimension_numbers<[2], [2], [1], [1], [0, 0, 0, 1, 1, 1], [0], [0]>} : vector<8x8x8xbf16>, vector<8x8x8xbf16>, vector<8x8x8xf32> -> vector<8x8x8xf32>
    "tpu.trace_stop"() : () -> ()
    %cst_22 = arith.constant dense<0xFF800000> : vector<8x8xf32>
    %79 = vector.multi_reduction <maximumf>, %78, %cst_22 [2] : vector<8x8x8xf32> to vector<8x8xf32>
    %80 = vector.shape_cast %79 : vector<8x8xf32> to vector<8x8x1xf32>
    %81 = vector.broadcast %80 : vector<8x8x1xf32> to vector<8x8x8xf32>
    %82 = arith.subf %78, %81 : vector<8x8x8xf32>
    %83 = math.exp %82 : vector<8x8x8xf32>
    %cst_23 = arith.constant dense<0.000000e+00> : vector<8x8xf32>
    %84 = vector.multi_reduction <add>, %83, %cst_23 [2] : vector<8x8x8xf32> to vector<8x8xf32>
    %85 = vector.shape_cast %84 : vector<8x8xf32> to vector<8x8x1xf32>
    %86 = tpu.reciprocal %85 {approx = true} : vector<8x8x1xf32> -> vector<8x8x1xf32>
    %87 = vector.broadcast %86 : vector<8x8x1xf32> to vector<8x8x8xf32>
    %88 = arith.mulf %83, %87 : vector<8x8x8xf32>
    %89 = arith.truncf %88 : vector<8x8x8xf32> to vector<8x8x8xbf16>
    "tpu.trace_start"() <{level = 10 : i32, message = "bqk,bke->bqe"}> : () -> ()
    %cst_24 = arith.constant dense<0.000000e+00> : vector<8x8x8xf32>
    %90 = tpu.matmul %89, %77, %cst_24 {dimension_numbers = #tpu.dot_dimension_numbers<[2], [1], [1], [2], [0, 0, 0, 1, 1, 2], [0], [0]>} : vector<8x8x8xbf16>, vector<8x8x8xbf16>, vector<8x8x8xf32> -> vector<8x8x8xf32>
    "tpu.trace_stop"() : () -> ()
    %91 = vector.shape_cast %90 : vector<8x8x8xf32> to vector<64x8xf32>
    %c0_25 = arith.constant 0 : index
    %c24 = arith.constant 24 : index
    %92 = vector.load %arg18[%c0_25, %c24] : memref<64x32xf32, #tpu.memory_space<vmem>>, vector<64x8xf32>
    tpu.vector_store %arg18[%c0_25, %c24], %91 {strides = array<i32>} : memref<64x32xf32, #tpu.memory_space<vmem>>, vector<64x8xf32>,
    %c0_26 = arith.constant 0 : index
    %c0_27 = arith.constant 0 : index
    %93 = vector.load %arg18[%c0_26, %c0_27] : memref<64x32xf32, #tpu.memory_space<vmem>>, vector<64x32xf32>
    %94 = arith.truncf %93 : vector<64x32xf32> to vector<64x32xbf16>
    %c0_28 = arith.constant 0 : index
    %c0_29 = arith.constant 0 : index
    %c0_30 = arith.constant 0 : index
    %95 = vector.load %arg4[%c0_28, %c0_29, %c0_30] : memref<1x32x32xbf16, #tpu.memory_space<vmem>>, vector<1x32x32xbf16>
    %96 = vector.shape_cast %95 : vector<1x32x32xbf16> to vector<32x32xbf16>
    %cst_31 = arith.constant dense<0.000000e+00> : vector<64x32xf32>
    %97 = tpu.matmul %94, %96, %cst_31 {dimension_numbers = #tpu.dot_dimension_numbers<[1], [0], [0], [1], [0, 0, 1, 1], [], []>} : vector<64x32xbf16>, vector<32x32xbf16>, vector<64x32xf32> -> vector<64x32xf32>
    %c0_32 = arith.constant 0 : index
    %c0_33 = arith.constant 0 : index
    %c0_34 = arith.constant 0 : index
    %98 = vector.load %arg5[%c0_32, %c0_33, %c0_34] : memref<1x1x32xf32, #tpu.memory_space<vmem>>, vector<1x1x32xf32>
    %99 = vector.shape_cast %98 : vector<1x1x32xf32> to vector<1x32xf32>
    %100 = vector.broadcast %99 : vector<1x32xf32> to vector<64x32xf32>
    %101 = arith.addf %97, %100 : vector<64x32xf32>
    %102 = arith.addf %3, %101 : vector<64x32xf32>
    %c0_35 = arith.constant 0 : index
    %c0_36 = arith.constant 0 : index
    %c0_37 = arith.constant 0 : index
    %103 = vector.load %arg6[%c0_35, %c0_36, %c0_37] : memref<1x1x32xf32, #tpu.memory_space<vmem>>, vector<1x1x32xf32>
    %104 = vector.shape_cast %103 : vector<1x1x32xf32> to vector<1x32xf32>
    %c0_38 = arith.constant 0 : index
    %c0_39 = arith.constant 0 : index
    %c0_40 = arith.constant 0 : index
    %105 = vector.load %arg7[%c0_38, %c0_39, %c0_40] : memref<1x1x32xf32, #tpu.memory_space<vmem>>, vector<1x1x32xf32>
    %106 = vector.shape_cast %105 : vector<1x1x32xf32> to vector<1x32xf32>
    %cst_41 = arith.constant dense<0.000000e+00> : vector<64xf32>
    %107 = vector.multi_reduction <add>, %102, %cst_41 [1] : vector<64x32xf32> to vector<64xf32>
    %108 = vector.shape_cast %107 : vector<64xf32> to vector<64x1xf32>
    %cst_42 = arith.constant 3.200000e+01 : f32
    %109 = vector.broadcast %cst_42 : f32 to vector<64x1xf32>
    %110 = arith.divf %108, %109 : vector<64x1xf32>
    %111 = vector.broadcast %110 : vector<64x1xf32> to vector<64x32xf32>
    %112 = arith.subf %102, %111 : vector<64x32xf32>
    %113 = arith.mulf %112, %112 : vector<64x32xf32>
    %cst_43 = arith.constant dense<0.000000e+00> : vector<64xf32>
    %114 = vector.multi_reduction <add>, %113, %cst_43 [1] : vector<64x32xf32> to vector<64xf32>
    %115 = vector.shape_cast %114 : vector<64xf32> to vector<64x1xf32>
    %cst_44 = arith.constant 0.0322580636 : f32
    %116 = vector.broadcast %cst_44 : f32 to vector<64x1xf32>
    %117 = arith.mulf %115, %116 : vector<64x1xf32>
    %118 = math.sqrt %117 : vector<64x1xf32>
    %119 = vector.broadcast %110 : vector<64x1xf32> to vector<64x32xf32>
    %120 = arith.subf %102, %119 : vector<64x32xf32>
    %121 = vector.broadcast %104 : vector<1x32xf32> to vector<64x32xf32>
    %122 = arith.mulf %121, %120 : vector<64x32xf32>
    %cst_45 = arith.constant 9.99999997E-7 : f32
    %123 = vector.broadcast %cst_45 : f32 to vector<64x1xf32>
    %124 = arith.addf %118, %123 : vector<64x1xf32>
    %125 = tpu.reciprocal %124 {approx = true} : vector<64x1xf32> -> vector<64x1xf32>
    %126 = vector.broadcast %125 : vector<64x1xf32> to vector<64x32xf32>
    %127 = arith.mulf %122, %126 : vector<64x32xf32>
    %128 = vector.broadcast %106 : vector<1x32xf32> to vector<64x32xf32>
    %129 = arith.addf %127, %128 : vector<64x32xf32>
    %130 = arith.truncf %129 : vector<64x32xf32> to vector<64x32xbf16>
    %c0_46 = arith.constant 0 : index
    %c0_47 = arith.constant 0 : index
    %c0_48 = arith.constant 0 : index
    %131 = vector.load %arg8[%c0_46, %c0_47, %c0_48] : memref<1x32x64xbf16, #tpu.memory_space<vmem>>, vector<1x32x64xbf16>
    %132 = vector.shape_cast %131 : vector<1x32x64xbf16> to vector<32x64xbf16>
    %cst_49 = arith.constant dense<0.000000e+00> : vector<64x64xf32>
    %133 = tpu.matmul %130, %132, %cst_49 {dimension_numbers = #tpu.dot_dimension_numbers<[1], [0], [0], [1], [0, 0, 1, 1], [], []>} : vector<64x32xbf16>, vector<32x64xbf16>, vector<64x64xf32> -> vector<64x64xf32>
    %c0_50 = arith.constant 0 : index
    %c0_51 = arith.constant 0 : index
    %c0_52 = arith.constant 0 : index
    %134 = vector.load %arg9[%c0_50, %c0_51, %c0_52] : memref<1x1x64xf32, #tpu.memory_space<vmem>>, vector<1x1x64xf32>
    %135 = vector.shape_cast %134 : vector<1x1x64xf32> to vector<1x64xf32>
    %136 = vector.broadcast %135 : vector<1x64xf32> to vector<64x64xf32>
    %137 = arith.addf %133, %136 : vector<64x64xf32>
    %cst_53 = arith.constant 0.000000e+00 : f32
    %138 = vector.broadcast %cst_53 : f32 to vector<64x64xf32>
    %139 = arith.maximumf %137, %138 : vector<64x64xf32>
    %140 = arith.truncf %139 : vector<64x64xf32> to vector<64x64xbf16>
    %c0_54 = arith.constant 0 : index
    %c0_55 = arith.constant 0 : index
    %c0_56 = arith.constant 0 : index
    %141 = vector.load %arg10[%c0_54, %c0_55, %c0_56] : memref<1x64x32xbf16, #tpu.memory_space<vmem>>, vector<1x64x32xbf16>
    %142 = vector.shape_cast %141 : vector<1x64x32xbf16> to vector<64x32xbf16>
    %cst_57 = arith.constant dense<0.000000e+00> : vector<64x32xf32>
    %143 = tpu.matmul %140, %142, %cst_57 {dimension_numbers = #tpu.dot_dimension_numbers<[1], [0], [0], [1], [0, 0, 1, 1], [], []>} : vector<64x64xbf16>, vector<64x32xbf16>, vector<64x32xf32> -> vector<64x32xf32>
    %c0_58 = arith.constant 0 : index
    %c0_59 = arith.constant 0 : index
    %c0_60 = arith.constant 0 : index
    %144 = vector.load %arg11[%c0_58, %c0_59, %c0_60] : memref<1x1x32xf32, #tpu.memory_space<vmem>>, vector<1x1x32xf32>
    %145 = vector.shape_cast %144 : vector<1x1x32xf32> to vector<1x32xf32>
    %146 = vector.broadcast %145 : vector<1x32xf32> to vector<64x32xf32>
    %147 = arith.addf %143, %146 : vector<64x32xf32>
    %148 = arith.addf %129, %147 : vector<64x32xf32>
    %c0_61 = arith.constant 0 : index
    %c0_62 = arith.constant 0 : index
    %c0_63 = arith.constant 0 : index
    %149 = vector.load %arg12[%c0_61, %c0_62, %c0_63] : memref<1x1x32xf32, #tpu.memory_space<vmem>>, vector<1x1x32xf32>
    %150 = vector.shape_cast %149 : vector<1x1x32xf32> to vector<1x32xf32>
    %c0_64 = arith.constant 0 : index
    %c0_65 = arith.constant 0 : index
    %c0_66 = arith.constant 0 : index
    %151 = vector.load %arg13[%c0_64, %c0_65, %c0_66] : memref<1x1x32xf32, #tpu.memory_space<vmem>>, vector<1x1x32xf32>
    %152 = vector.shape_cast %151 : vector<1x1x32xf32> to vector<1x32xf32>
    %cst_67 = arith.constant dense<0.000000e+00> : vector<64xf32>
    %153 = vector.multi_reduction <add>, %148, %cst_67 [1] : vector<64x32xf32> to vector<64xf32>
    %154 = vector.shape_cast %153 : vector<64xf32> to vector<64x1xf32>
    %cst_68 = arith.constant 3.200000e+01 : f32
    %155 = vector.broadcast %cst_68 : f32 to vector<64x1xf32>
    %156 = arith.divf %154, %155 : vector<64x1xf32>
    %157 = vector.broadcast %156 : vector<64x1xf32> to vector<64x32xf32>
    %158 = arith.subf %148, %157 : vector<64x32xf32>
    %159 = arith.mulf %158, %158 : vector<64x32xf32>
    %cst_69 = arith.constant dense<0.000000e+00> : vector<64xf32>
    %160 = vector.multi_reduction <add>, %159, %cst_69 [1] : vector<64x32xf32> to vector<64xf32>
    %161 = vector.shape_cast %160 : vector<64xf32> to vector<64x1xf32>
    %cst_70 = arith.constant 0.0322580636 : f32
    %162 = vector.broadcast %cst_70 : f32 to vector<64x1xf32>
    %163 = arith.mulf %161, %162 : vector<64x1xf32>
    %164 = math.sqrt %163 : vector<64x1xf32>
    %165 = vector.broadcast %156 : vector<64x1xf32> to vector<64x32xf32>
    %166 = arith.subf %148, %165 : vector<64x32xf32>
    %167 = vector.broadcast %150 : vector<1x32xf32> to vector<64x32xf32>
    %168 = arith.mulf %167, %166 : vector<64x32xf32>
    %cst_71 = arith.constant 9.99999997E-7 : f32
    %169 = vector.broadcast %cst_71 : f32 to vector<64x1xf32>
    %170 = arith.addf %164, %169 : vector<64x1xf32>
    %171 = tpu.reciprocal %170 {approx = true} : vector<64x1xf32> -> vector<64x1xf32>
    %172 = vector.broadcast %171 : vector<64x1xf32> to vector<64x32xf32>
    %173 = arith.mulf %168, %172 : vector<64x32xf32>
    %174 = vector.broadcast %152 : vector<1x32xf32> to vector<64x32xf32>
    %175 = arith.addf %173, %174 : vector<64x32xf32>
    %c0_72 = arith.constant 0 : index
    %c0_73 = arith.constant 0 : index
    %176 = vector.load %arg17[%c0_72, %c0_73] : memref<64x32xf32, #tpu.memory_space<vmem>>, vector<64x32xf32>
    tpu.vector_store %arg17[%c0_72, %c0_73], %175 {strides = array<i32>} : memref<64x32xf32, #tpu.memory_space<vmem>>, vector<64x32xf32>,
    %c1_i32 = arith.constant 1 : i32
    %177 = arith.cmpi eq, %arg1, %c1_i32 : i32
    %178 = arith.extui %177 : i1 to i32
    %c0_i32_74 = arith.constant 0 : i32
    %179 = arith.cmpi ne, %178, %c0_i32_74 : i32
    scf.if %179 {
      %c0_75 = arith.constant 0 : index
      %c0_76 = arith.constant 0 : index
      %180 = vector.load %arg14[%c0_75, %c0_76] : memref<1x32xf32, #tpu.memory_space<vmem>>, vector<1x32xf32>
      %c0_77 = arith.constant 0 : index
      %c0_78 = arith.constant 0 : index
      %181 = vector.load %arg15[%c0_77, %c0_78] : memref<1x32xf32, #tpu.memory_space<vmem>>, vector<1x32xf32>
      %cst_79 = arith.constant dense<0.000000e+00> : vector<64xf32>
      %182 = vector.multi_reduction <add>, %175, %cst_79 [1] : vector<64x32xf32> to vector<64xf32>
      %183 = vector.shape_cast %182 : vector<64xf32> to vector<64x1xf32>
      %cst_80 = arith.constant 3.200000e+01 : f32
      %184 = vector.broadcast %cst_80 : f32 to vector<64x1xf32>
      %185 = arith.divf %183, %184 : vector<64x1xf32>
      %186 = vector.broadcast %185 : vector<64x1xf32> to vector<64x32xf32>
      %187 = arith.subf %175, %186 : vector<64x32xf32>
      %188 = arith.mulf %187, %187 : vector<64x32xf32>
      %cst_81 = arith.constant dense<0.000000e+00> : vector<64xf32>
      %189 = vector.multi_reduction <add>, %188, %cst_81 [1] : vector<64x32xf32> to vector<64xf32>
      %190 = vector.shape_cast %189 : vector<64xf32> to vector<64x1xf32>
      %cst_82 = arith.constant 0.0322580636 : f32
      %191 = vector.broadcast %cst_82 : f32 to vector<64x1xf32>
      %192 = arith.mulf %190, %191 : vector<64x1xf32>
      %193 = math.sqrt %192 : vector<64x1xf32>
      %194 = vector.broadcast %185 : vector<64x1xf32> to vector<64x32xf32>
      %195 = arith.subf %175, %194 : vector<64x32xf32>
      %196 = vector.broadcast %180 : vector<1x32xf32> to vector<64x32xf32>
      %197 = arith.mulf %196, %195 : vector<64x32xf32>
      %cst_83 = arith.constant 9.99999997E-7 : f32
      %198 = vector.broadcast %cst_83 : f32 to vector<64x1xf32>
      %199 = arith.addf %193, %198 : vector<64x1xf32>
      %200 = tpu.reciprocal %199 {approx = true} : vector<64x1xf32> -> vector<64x1xf32>
      %201 = vector.broadcast %200 : vector<64x1xf32> to vector<64x32xf32>
      %202 = arith.mulf %197, %201 : vector<64x32xf32>
      %203 = vector.broadcast %181 : vector<1x32xf32> to vector<64x32xf32>
      %204 = arith.addf %202, %203 : vector<64x32xf32>
      %205 = vector.shape_cast %204 : vector<64x32xf32> to vector<8x8x32xf32>
      %cst_84 = arith.constant dense<0.000000e+00> : vector<8x32xf32>
      %206 = vector.multi_reduction <add>, %205, %cst_84 [1] : vector<8x8x32xf32> to vector<8x32xf32>
      %cst_85 = arith.constant 8.000000e+00 : f32
      %207 = vector.broadcast %cst_85 : f32 to vector<8x32xf32>
      %208 = arith.divf %206, %207 : vector<8x32xf32>
      %c0_86 = arith.constant 0 : index
      %c0_87 = arith.constant 0 : index
      %209 = vector.load %arg16[%c0_86, %c0_87] : memref<8x32xf32, #tpu.memory_space<vmem>>, vector<8x32xf32>
      tpu.vector_store %arg16[%c0_86, %c0_87], %208 {strides = array<i32>} : memref<8x32xf32, #tpu.memory_space<vmem>>, vector<8x32xf32>,
    } else {
    }
    return
  }
  func.func @transform_0(%arg0: i32, %arg1: i32) -> (i32, i32) {
    %c0_i32 = arith.constant 0 : i32
    %c0_i32_0 = arith.constant 0 : i32
    return %arg0, %c0_i32 : i32, i32
  }
  func.func @transform_1(%arg0: i32, %arg1: i32) -> (i32, i32, i32) {
    %c0_i32 = arith.constant 0 : i32
    %c0_i32_0 = arith.constant 0 : i32
    %c0_i32_1 = arith.constant 0 : i32
    return %arg1, %c0_i32, %c0_i32_0 : i32, i32, i32
  }
  func.func @transform_2(%arg0: i32, %arg1: i32) -> (i32, i32, i32) {
    %c0_i32 = arith.constant 0 : i32
    %c0_i32_0 = arith.constant 0 : i32
    %c0_i32_1 = arith.constant 0 : i32
    return %arg1, %c0_i32, %c0_i32_0 : i32, i32, i32
  }
  func.func @transform_3(%arg0: i32, %arg1: i32) -> (i32, i32, i32) {
    %c0_i32 = arith.constant 0 : i32
    %c0_i32_0 = arith.constant 0 : i32
    %c0_i32_1 = arith.constant 0 : i32
    return %arg1, %c0_i32, %c0_i32_0 : i32, i32, i32
  }
  func.func @transform_4(%arg0: i32, %arg1: i32) -> (i32, i32, i32) {
    %c0_i32 = arith.constant 0 : i32
    %c0_i32_0 = arith.constant 0 : i32
    %c0_i32_1 = arith.constant 0 : i32
    return %arg1, %c0_i32, %c0_i32_0 : i32, i32, i32
  }
  func.func @transform_5(%arg0: i32, %arg1: i32) -> (i32, i32, i32) {
    %c0_i32 = arith.constant 0 : i32
    %c0_i32_0 = arith.constant 0 : i32
    %c0_i32_1 = arith.constant 0 : i32
    return %arg1, %c0_i32, %c0_i32_0 : i32, i32, i32
  }
  func.func @transform_6(%arg0: i32, %arg1: i32) -> (i32, i32, i32) {
    %c0_i32 = arith.constant 0 : i32
    %c0_i32_0 = arith.constant 0 : i32
    %c0_i32_1 = arith.constant 0 : i32
    return %arg1, %c0_i32, %c0_i32_0 : i32, i32, i32
  }
  func.func @transform_7(%arg0: i32, %arg1: i32) -> (i32, i32, i32) {
    %c0_i32 = arith.constant 0 : i32
    %c0_i32_0 = arith.constant 0 : i32
    %c0_i32_1 = arith.constant 0 : i32
    return %arg1, %c0_i32, %c0_i32_0 : i32, i32, i32
  }
  func.func @transform_8(%arg0: i32, %arg1: i32) -> (i32, i32, i32) {
    %c0_i32 = arith.constant 0 : i32
    %c0_i32_0 = arith.constant 0 : i32
    %c0_i32_1 = arith.constant 0 : i32
    return %arg1, %c0_i32, %c0_i32_0 : i32, i32, i32
  }
  func.func @transform_9(%arg0: i32, %arg1: i32) -> (i32, i32, i32) {
    %c0_i32 = arith.constant 0 : i32
    %c0_i32_0 = arith.constant 0 : i32
    %c0_i32_1 = arith.constant 0 : i32
    return %arg1, %c0_i32, %c0_i32_0 : i32, i32, i32
  }
  func.func @transform_10(%arg0: i32, %arg1: i32) -> (i32, i32, i32) {
    %c0_i32 = arith.constant 0 : i32
    %c0_i32_0 = arith.constant 0 : i32
    %c0_i32_1 = arith.constant 0 : i32
    return %arg1, %c0_i32, %c0_i32_0 : i32, i32, i32
  }
  func.func @transform_11(%arg0: i32, %arg1: i32) -> (i32, i32, i32) {
    %c0_i32 = arith.constant 0 : i32
    %c0_i32_0 = arith.constant 0 : i32
    %c0_i32_1 = arith.constant 0 : i32
    return %arg1, %c0_i32, %c0_i32_0 : i32, i32, i32
  }
  func.func @transform_12(%arg0: i32, %arg1: i32) -> (i32, i32) {
    %c0_i32 = arith.constant 0 : i32
    %c0_i32_0 = arith.constant 0 : i32
    %c0_i32_1 = arith.constant 0 : i32
    return %c0_i32, %c0_i32_0 : i32, i32
  }
  func.func @transform_13(%arg0: i32, %arg1: i32) -> (i32, i32) {
    %c0_i32 = arith.constant 0 : i32
    %c0_i32_0 = arith.constant 0 : i32
    %c0_i32_1 = arith.constant 0 : i32
    return %c0_i32, %c0_i32_0 : i32, i32
  }
  func.func @transform_14(%arg0: i32, %arg1: i32) -> (i32, i32) {
    %c0_i32 = arith.constant 0 : i32
    %c0_i32_0 = arith.constant 0 : i32
    return %arg0, %c0_i32 : i32, i32
  }
}

</mosaic_0001>

<bundles_post_ra>
// kernel: transformer_forward.1
= control target key start
LH: loop header
LB: loop body
LE: loop exit
PB: predicated region body
PF: predicated region fallthrough
CT: control target
= control target key end

     0   :  { %s6793_s29 = smov 0   ;;  %s6795_s30 = smov 0   ;;  %s8110_s0 = inlined_call_operand.vmem [shape: f32[128,32], index: 0, kind: input, shape index: {}]   ;;  %s8111_s1 = inlined_call_operand.vmem [shape: bf16[2,32,96], index: 1, kind: input, shape index: {}]   ;;  %s8112_s2 = inlined_call_operand.vmem [shape: bf16[2,32,32], index: 2, kind: input, shape index: {}]   ;;  %s8113_s3 = inlined_call_operand.vmem [shape: f32[2,1,32], index: 3, kind: input, shape index: {}]   ;;  %s8114_s4 = inlined_call_operand.vmem [shape: f32[2,1,32], index: 4, kind: input, shape index: {}]   ;;  %s8115_s5 = inlined_call_operand.vmem [shape: f32[2,1,32], index: 5, kind: input, shape index: {}]   ;;  %s8116_s6 = inlined_call_operand.vmem [shape: bf16[2,32,64], index: 6, kind: input, shape index: {}]   ;;  %s8117_s7 = inlined_call_operand.vmem [shape: f32[2,1,64], index: 7, kind: input, shape index: {}]   ;;  %s8118_s8 = inlined_call_operand.vmem [shape: bf16[2,64,32], index: 8, kind: input, shape index: {}]   ;;  %s8119_s9 = inlined_call_operand.vmem [shape: f32[2,1,32], index: 9, kind: input, shape index: {}]   ;;  %s8120_s10 = inlined_call_operand.vmem [shape: f32[2,1,32], index: 10, kind: input, shape index: {}]   ;;  %s8121_s11 = inlined_call_operand.vmem [shape: f32[2,1,32], index: 11, kind: input, shape index: {}]   ;;  %s8122_s12 = inlined_call_operand.vmem [shape: f32[1,32], index: 12, kind: input, shape index: {}]   ;;  %s8123_s13 = inlined_call_operand.vmem [shape: f32[1,32], index: 13, kind: input, shape index: {}]   ;;  %s8124_s14 = inlined_call_operand.vmem [shape: f32[16,32], index: 14, kind: output, shape index: {}]  }
   0x1   :  { %8129 = sst [smem:[#allocation10_spill]] %s8110_s0  ;;  %s6797_s15 = smov 0  }
   0x2   :  { %8130 = sst [smem:[#allocation11_spill]] %s8111_s1  ;;  %s6799_s16 = smov 0  }
   0x3   :  { %8131 = sst [smem:[#allocation12_spill]] %s8112_s2  ;;  %s6801_s17 = smov 0  }
   0x4   :  { %8132 = sst [smem:[#allocation13_spill]] %s8122_s12 }
   0x5   :  { %8133 = sst [smem:[#allocation14_spill]] %s8123_s13 }
   0x6   :  { %8134 = sst [smem:[#allocation15_spill]] %s8124_s14 }
   0x7 LB: > { %8135 = sst [smem:[#allocation4_spill]] %s6684_s29  ;;  %s33_s18 = sadd.s32 1, %s6692_s15  ;;  %s6700_s17 = sphi %s6801_s17, %s24_s17   ;;  %s6696_s16 = sphi %s6799_s16, %s8158_s16   ;;  %s6692_s15 = sphi %s6797_s15, %s8157_s15   ;;  %s6688_s30 = sphi %s6795_s30, %s8156_s30   ;;  %s6684_s29 = sphi %s6793_s29, %s8155_s29  }
   0x8   : > { %8136 = sst [smem:[#allocation5_spill]] %s6692_s15  ;;  %s36_s19 = sadd.s32 1, %s6696_s16 }
   0x9   : > { %8137 = sst [smem:[#allocation6_spill]] %s6696_s16  ;;  %p34_p0 = scmp.ge.s32.totalorder %s33_s18, 2 }
   0xa   : > { %8138 = sst [smem:[#allocation7_spill]] %s6700_s17  ;;  %p5651_p1 = scmp.ge.s32.totalorder %s6700_s17, 1 }
   0xb   : > { %p521_p2 = scmp.lt.s32.totalorder %s6700_s17, 5  ;;  %s8160_s18 = smov (%p34_p0, %s33_s18), 0 }
   0xc   : > { %8139 = sst [smem:[#allocation8_spill]] %s8160_s18  ;;  %s8162_s19 = smov (!%p34_p0, %s36_s19), %s6696_s16 }
   0xd   : > { %p522_p3 = pnand %p5651_p1, %p521_p2  ;;  %p38_p4 = scmp.ge.s32.totalorder %s8162_s19, 2 }
   0xe   : > { %s5652_s20 = sshll.u32 (!%p522_p3), %s6688_s30, 3  ;;  %p613_p5 = scmp.lt.s32.totalorder (!%p522_p3), %s6684_s29, 1 }
   0xf   : > { %s8164_s19 = smov (%p38_p4, %s8162_s19), 0  ;;  %525 = sbr.rel (%p522_p3) target bundleno = 4853 (0x12f5), region = 76 }
  0x10   : > { %8140 = sst [smem:[#allocation9_spill]] %s8164_s19  ;;  %p608_p6 = scmp.lt.s32.totalorder (!%p522_p3), %s5652_s20, 15 }
  0x11   : > { %p654_p7 = scmp.lt.s32.totalorder (!%p522_p3), %s6688_s30, 1  ;;  %s8141_s1 = sld [smem:[#allocation11_spill]] (!%p522_p3) }
  0x12   : > { %s8142_s0 = sld [smem:[#allocation10_spill]] (!%p522_p3)  ;;  %s8143_s2 = sld [smem:[#allocation12_spill]] (!%p522_p3) }
  0x16   : > { %s6831_s21 = scalar_select %p613_p5, %s6684_s29, 1 }
  0x17   : > { %s8166_s20 = smov (!%p608_p6, %s5652_s20), 15  ;;  %s8168_s30 = smov (!%p654_p7, %s6688_s30), 1 }
  0x18   : > { %s5766_s22 = sshll.u32 %s6831_s21, 4  ;;  %s5653_s26 = sshll.u32 %s8166_s20, 3 }
  0x19   : > { %s6841_s19 = scalar_lea.vmem %s8141_s1, %s5766_s22  ;;  %s611_s15 = scalar_lea.vmem %s8142_s0, %s5653_s26 }
  0x1a   : > { %s6849_s12 = scalar_lea.vmem %s8143_s2, %s5766_s22  ;;  %s6862_s1 = scalar_lea.vmem %s8116_s6, %s5766_s22 }
  0x1b   : > { %s5769_s13 = sshll.u32 %s6831_s21, 5  ;;  %s650_s27 = scalar_lea.vmem %s8120_s10, %s6831_s21 }
  0x1c   : > { %s6876_s23 = scalar_lea.vmem %s8118_s8, %s5769_s13  ;;  %s653_s25 = scalar_lea.vmem %s8121_s11, %s6831_s21 }
  0x1d   : > { %s5662_s16 = sshll.u32 %s8168_s30, 3  ;;  %s8144_s0 = sld [smem:[#allocation15_spill]] }
  0x1e   : > { %s8145_s2 = sld [smem:[#allocation4_spill]] }
  0x23   : > { %s6892_s17 = scalar_lea.vmem %s8144_s0, %s5662_s16 }
  0x24   : > { %p5663_p8 = scmp.ne.s32.totalorder %s8145_s2, 0 }
  0x25   : > { %v663_v0 = vld [vmem:[%s611_s15] sm:$0xff] (!%p5663_p8)  ;;  %vm671_vm0 = vcmask (!%p5663_p8), 261120   ;;  %v664_v1 = vld [vmem:[%s611_s15 + $0x8] sm:$0xff] (!%p5663_p8)  ;;  %v665_v2 = vld [vmem:[%s611_s15 + $0x10] sm:$0xff] (!%p5663_p8) }
  0x26   : > { %662 = sbr.rel (%p5663_p8) target bundleno = 45 (0x2d), region = 80  ;;  %672 = vst.msk [vmem:[#allocation2] sm:$0xff] (!%p5663_p8), %vm671_vm0, %v663_v0  ;;  %673 = vst.msk [vmem:[#allocation2 + $0x8] sm:$0xff] (!%p5663_p8), %vm671_vm0, %v664_v1  ;;  %v666_v3 = vld [vmem:[%s611_s15 + $0x18] sm:$0xff] (!%p5663_p8)  ;;  %v667_v4 = vld [vmem:[%s611_s15 + $0x20] sm:$0xff] (!%p5663_p8) }
  0x27   : > { %674 = vst.msk [vmem:[#allocation2 + $0x10] sm:$0xff] (!%p5663_p8), %vm671_vm0, %v665_v2  ;;  %v668_v5 = vld [vmem:[%s611_s15 + $0x28] sm:$0xff] (!%p5663_p8)  ;;  %675 = vst.msk [vmem:[#allocation2 + $0x18] sm:$0xff] (!%p5663_p8), %vm671_vm0, %v666_v3  ;;  %v669_v6 = vld [vmem:[%s611_s15 + $0x30] sm:$0xff] (!%p5663_p8) }
  0x28   : > { %676 = vst.msk [vmem:[#allocation2 + $0x20] sm:$0xff] (!%p5663_p8), %vm671_vm0, %v667_v4  ;;  %677 = vst.msk [vmem:[#allocation2 + $0x28] sm:$0xff] (!%p5663_p8), %vm671_vm0, %v668_v5  ;;  %v670_v7 = vld [vmem:[%s611_s15 + $0x38] sm:$0xff] (!%p5663_p8) }
  0x29   : > { %678 = vst.msk [vmem:[#allocation2 + $0x30] sm:$0xff] (!%p5663_p8), %vm671_vm0, %v669_v6  ;;  %679 = vst.msk [vmem:[#allocation2 + $0x38] sm:$0xff] (!%p5663_p8), %vm671_vm0, %v670_v7 }
  0x2d PF: > { %v6420_v8 = vld [vmem:[%s6841_s19] sm:$0xff]   ;;  %v6421_v9 = vld [vmem:[%s6841_s19 + $0x8] sm:$0xff]   ;;  %vm708_vm1 = vcmask 261120   ;;  %v6702_v22 = vmov 0.0   ;;  %vm6703_vm2 = vmmov 0   ;;  %s6704_s2 = smov 96  }
  0x2e   : > { %5924 = vmatprep.subr.bf16.mxu0 %v6420_v8  ;;  %v680_v10 = vld [vmem:[#allocation2] sm:$0xff]  ;;  %v681_v11 = vld [vmem:[#allocation2 + $0x8] sm:$0xff]  ;;  %6360 = vmatprep.subr.bf16.mxu1 %v6420_v8  ;;  %v682_v12 = vld [vmem:[#allocation2 + $0x10] sm:$0xff]  ;;  %vm797_vm3 = vcmask 64512   ;;  %s6705_s30 = smov 64   ;;  %vm1288_vm4 = vcmask 1043456  }
  0x2f   : > { %5925 = vmatpush3.bf16.msra.mxu0 %v6420_v8  ;;  %v688_v13 = vpack.c.bf16 %v681_v11, %v680_v10  ;;  %v683_v14 = vld [vmem:[#allocation2 + $0x18] sm:$0xff]  ;;  %6362 = vmatpush3.bf16.msra.mxu1 %v6420_v8  ;;  %v684_v15 = vld [vmem:[#allocation2 + $0x20] sm:$0xff]  ;;  %v685_v16 = vld [vmem:[#allocation2 + $0x28] sm:$0xff]  ;;  %s6706_s15 = smov 88   ;;  %s6707_s19 = smov 120   ;;  %vm2588_vm5 = vcmask 130112  }
  0x30   : > { %5926 = vmatprep.subr.bf16.mxu0 %v6421_v9  ;;  %6361 = vmatprep.subr.bf16.mxu1 %v6421_v9  ;;  %v690_v17 = vpack.c.bf16 %v685_v16, %v684_v15  ;;  %v686_v18 = vld [vmem:[#allocation2 + $0x30] sm:$0xff]  ;;  %v687_v19 = vld [vmem:[#allocation2 + $0x38] sm:$0xff]  ;;  %v689_v20 = vpack.c.bf16 %v683_v14, %v682_v12  ;;  %s6708_s26 = smov 56   ;;  %s6709_s13 = smov 80   ;;  %vm3509_vm6 = vcmask 195712   ;;  %vm4430_vm7 = vcmask 261312  }
  0x31   : > { %5928 = vmatprep.mubr.msk.bf16.mxu0 %vm708_vm1, %v688_v13  ;;  %v691_v21 = vpack.c.bf16 %v687_v19, %v686_v18  ;;  %s6710_s14 = smov 112   ;;  %s6711_s29 = smov 48  }
  0x32   : > { %5932 = vmatprep.mubr.msk.bf16.mxu1 %vm708_vm1, %v690_v17  ;;  %s6712_s24 = smov 72   ;;  %s6713_s20 = smov 104  }
  0x33   : > { %5927 = vmatpush3.bf16.msra.mxu0 %v6421_v9  ;;  %6363 = vmatpush3.bf16.msra.mxu1 %v6421_v9  ;;  %s6714_s22 = smov 40   ;;  %s6715_s28 = smov 8  }
  0x34   : > { %5948 = vmatprep.subr.bf16.mxu0 %v6702_v22  ;;  %5936 = vmatprep.subr.bf16.mxu1 %v6702_v22  ;;  %s6716_s16 = smov 16   ;;  %s6717_s18 = smov 24  }
  0x36   : > { %5929 = vmatmul.mubr.msk.bf16.vlgmr.msra.gmra.mrb[0].mxu0 %vm708_vm1, %v689_v20  ;;  %5933 = vmatmul.mubr.msk.bf16.vlgmr.msra.gmra.mrb[0].mxu1 %vm708_vm1, %v691_v21 }
  0x37   : > { %5950 = vmatprep.mubr.msk.bf16.mxu0 %vm6703_vm2, %v6702_v22  ;;  %5938 = vmatprep.mubr.msk.bf16.mxu1 %vm6703_vm2, %v6702_v22 }
 0x109   : > { %v5930_v23 = vpop.f32.mrb[0].mxu0  ;;  %v5934_v24 = vpop.f32.mrb[0].mxu1 }
 0x10a   : > { %v6907_v25 = vpack.c.bf16 %v5930_v23, %v5930_v23  ;;  %v755_v26 = vpop.f32.mrb[1].mxu0  ;;  %v771_v27 = vpop.f32.mrb[1].mxu1  ;;  %v6926_v38 = vpack.c.bf16 %v5934_v24, %v5934_v24 }
 0x10b   : > { %v6909_v28 = vpack.c.bf16 %v755_v26, %v755_v26  ;;  %v5931_v29 = vpop.f32.mrb[2].mxu0  ;;  %v5935_v30 = vpop.f32.mrb[2].mxu1  ;;  %v6921_v36 = vpack.c.bf16 %v771_v27, %v771_v27 }
 0x10c   : > { %894 = vrot.lane.b32.xlu1 %v6907_v25, %s6704_s2  ;;  %v758_v31 = vpop.f32.mrb[3].mxu0  ;;  %v774_v32 = vpop.f32.mrb[3].mxu1  ;;  %v6913_v33 = vpack.c.bf16 %v5931_v29, %v5931_v29  ;;  %v6923_v37 = vpack.c.bf16 %v5935_v30, %v5935_v30 }
 0x10d   : > { %795 = vrot.lane.b32.xlu0 %v6909_v28, %s6704_s2  ;;  %v6915_v34 = vpack.c.bf16 %v758_v31, %v758_v31  ;;  %v6918_v35 = vpack.c.bf16 %v774_v32, %v774_v32 }
 0x110   : > { %943 = vrot.lane.b32.xlu1 %v6913_v33, %s6704_s2 }
 0x111   : > { %845 = vrot.lane.b32.xlu0 %v6915_v34, %s6704_s2 }
 0x114   : > { %1041 = vrot.lane.b32.xlu1 %v6918_v35, %s6704_s2 }
 0x115   : > { %992 = vrot.lane.b32.xlu0 %v6921_v36, %s6704_s2 }
 0x118   : > { %1139 = vrot.lane.b32.xlu1 %v6923_v37, %s6704_s2 }
 0x119   : > { %1090 = vrot.lane.b32.xlu0 %v6926_v38, %s6704_s2  ;;  %s8146_s2 = scalar_lea.vmem %s8113_s3, %s6831_s21 }
 0x17e   : > { %v895_v39 = vpop.permute.xlu1 %894 }
 0x17f   : > { %v900_v40 = vsel %vm797_vm3, %v895_v39, 0  ;;  %v796_v41 = vpop.permute.xlu0 %795 }
 0x180   : > { %v802_v42 = vsel %vm797_vm3, %v796_v41, 0  ;;  %5949 = vmatpush3.bf16.xpose.msra.mxu0 %v900_v40 }
 0x181   : > { %5937 = vmatpush3.bf16.xpose.msra.mxu1 %v802_v42  ;;  %5960 = vmatprep.subr.bf16.mxu0 %v6702_v22 }
 0x182   : > { %5942 = vmatprep.subr.bf16.mxu1 %v6702_v22  ;;  %v944_v48 = vpop.permute.xlu1 %943 }
 0x183   : > { %v846_v43 = vpop.permute.xlu0 %845  ;;  %v949_v50 = vsel %vm797_vm3, %v944_v48, 0 }
 0x184   : > { %v851_v45 = vsel %vm797_vm3, %v846_v43, 0 }
 0x186   : > { %v1042_v51 = vpop.permute.xlu1 %1041 }
 0x187   : > { %5951 = vmatmul.mubr.msk.bf16.vlgmr.msra.gmra.mrb[4].mxu0 %vm797_vm3, %v6907_v25  ;;  %v993_v44 = vpop.permute.xlu0 %992  ;;  %v1047_v52 = vsel %vm797_vm3, %v1042_v51, 0 }
 0x188   : > { %v998_v46 = vsel %vm797_vm3, %v993_v44, 0  ;;  %5939 = vmatmul.mubr.msk.bf16.vlgmr.msra.gmra.mrb[4].mxu1 %vm797_vm3, %v6909_v28  ;;  %5962 = vmatprep.mubr.msk.bf16.mxu0 %vm6703_vm2, %v6702_v22 }
 0x189   : > { %5943 = vmatpush3.bf16.xpose.msra.mxu1 %v851_v45  ;;  %5961 = vmatpush3.bf16.xpose.msra.mxu0 %v998_v46 }
 0x18a   : > { %5944 = vmatprep.mubr.msk.bf16.mxu1 %vm6703_vm2, %v6702_v22  ;;  %5954 = vmatprep.subr.bf16.mxu1 %v6702_v22  ;;  %v1140_v53 = vpop.permute.xlu1 %1139 }
 0x18b   : > { %v1091_v47 = vpop.permute.xlu0 %1090  ;;  %5972 = vmatprep.subr.bf16.mxu0 %v6702_v22  ;;  %v1145_v54 = vsel %vm797_vm3, %v1140_v53, 0 }
 0x18c   : > { %v1096_v49 = vsel %vm797_vm3, %v1091_v47, 0 }
 0x190   : > { %5945 = vmatmul.mubr.msk.bf16.vlgmr.msra.gmra.mrb[8].mxu1 %vm797_vm3, %v6915_v34  ;;  %5963 = vmatmul.mubr.msk.bf16.vlgmr.msra.gmra.mrb[8].mxu0 %vm797_vm3, %v6921_v36 }
 0x191   : > { %5955 = vmatpush3.bf16.xpose.msra.mxu1 %v949_v50  ;;  %5973 = vmatpush3.bf16.xpose.msra.mxu0 %v1096_v49 }
 0x192   : > { %5956 = vmatprep.mubr.msk.bf16.mxu1 %vm6703_vm2, %v6702_v22  ;;  %5974 = vmatprep.mubr.msk.bf16.mxu0 %vm6703_vm2, %v6702_v22 }
 0x193   : > { %5966 = vmatprep.subr.bf16.mxu1 %v6702_v22  ;;  %5984 = vmatprep.subr.bf16.mxu0 %v6702_v22 }
 0x198   : > { %5957 = vmatmul.mubr.msk.bf16.vlgmr.msra.gmra.mrb[12].mxu1 %vm797_vm3, %v6913_v33  ;;  %5975 = vmatmul.mubr.msk.bf16.vlgmr.msra.gmra.mrb[12].mxu0 %vm797_vm3, %v6926_v38 }
 0x199   : > { %5967 = vmatpush3.bf16.xpose.msra.mxu1 %v1047_v52  ;;  %5968 = vmatprep.mubr.msk.bf16.mxu1 %vm6703_vm2, %v6702_v22 }
 0x19a   : > { %5978 = vmatprep.subr.bf16.mxu1 %v6702_v22  ;;  %5986 = vmatprep.mubr.msk.bf16.mxu0 %vm6703_vm2, %v6702_v22 }
 0x1a0   : > { %5969 = vmatmul.mubr.msk.bf16.vlgmr.msra.gmra.mrb[16].mxu1 %vm797_vm3, %v6918_v35 }
 0x1a1   : > { %5979 = vmatpush3.bf16.xpose.msra.mxu1 %v1145_v54  ;;  %5980 = vmatprep.mubr.msk.bf16.mxu1 %vm6703_vm2, %v6702_v22 }
 0x1a2   : > { %5990 = vmatprep.subr.bf16.mxu1 %v6702_v22 }
 0x1a8   : > { %5981 = vmatmul.mubr.msk.bf16.vlgmr.msra.gmra.mrb[20].mxu1 %vm797_vm3, %v6923_v37 }
 0x1a9   : > { %5992 = vmatprep.mubr.msk.bf16.mxu1 %vm6703_vm2, %v6702_v22 }
 0x25a   : > { %v936_v55 = vpop.f32.mrb[4].mxu0 }
 0x25b   : > { %v838_v56 = vpop.f32.mrb[4].mxu1  ;;  %v5952_v57 = vpop.f32.mrb[5].mxu0  ;;  %v1193_v58 = vsel %vm797_vm3, %v936_v55, -inf }
 0x25c   : > { %v5940_v59 = vpop.f32.mrb[5].mxu1  ;;  %v939_v60 = vpop.f32.mrb[6].mxu0  ;;  %1194 = vmax.xlane.f32.xlu0 %v1193_v58  ;;  %v1187_v0 = vsel %vm797_vm3, %v838_v56, -inf }
 0x25d   : > { %v841_v61 = vpop.f32.mrb[6].mxu1  ;;  %v5953_v62 = vpop.f32.mrb[7].mxu0 }
 0x25e   : > { %v5941_v63 = vpop.f32.mrb[7].mxu1 }
 0x260   : > { %1188 = vmax.xlane.f32.xlu0 %v1187_v0 }
 0x263   : > { %v6981_v1 = vpop.f32.mrb[8].mxu1  ;;  %v1034_v2 = vpop.f32.mrb[8].mxu0 }
 0x264   : > { %v5946_v3 = vpop.f32.mrb[9].mxu1  ;;  %v5964_v4 = vpop.f32.mrb[9].mxu0  ;;  %v1199_v5 = vsel %vm797_vm3, %v1034_v2, -inf  ;;  %v1190_v10 = vsel %vm797_vm3, %v6981_v1, -inf }
 0x265   : > { %v890_v6 = vpop.f32.mrb[10].mxu1  ;;  %1200 = vmax.xlane.f32.xlu1 %v1199_v5  ;;  %v1037_v7 = vpop.f32.mrb[10].mxu0 }
 0x266   : > { %v5947_v8 = vpop.f32.mrb[11].mxu1  ;;  %v5965_v9 = vpop.f32.mrb[11].mxu0 }
 0x269   : > { %1191 = vmax.xlane.f32.xlu1 %v1190_v10 }
 0x26b   : > { %v6986_v11 = vpop.f32.mrb[12].mxu1  ;;  %v6988_v12 = vpop.f32.mrb[12].mxu0 }
 0x26c   : > { %v5958_v13 = vpop.f32.mrb[13].mxu1  ;;  %v5976_v14 = vpop.f32.mrb[13].mxu0  ;;  %v1196_v30 = vsel %vm797_vm3, %v6986_v11, -inf  ;;  %v1205_v39 = vsel %vm797_vm3, %v6988_v12, -inf }
 0x26d   : > { %v988_v15 = vpop.f32.mrb[14].mxu1  ;;  %v1135_v16 = vpop.f32.mrb[14].mxu0 }
 0x26e   : > { %v5959_v17 = vpop.f32.mrb[15].mxu1  ;;  %v5977_v18 = vpop.f32.mrb[15].mxu0 }
 0x273   : > { %v6990_v19 = vpop.f32.mrb[16].mxu1 }
 0x274   : > { %v5970_v20 = vpop.f32.mrb[17].mxu1  ;;  %v1202_v31 = vsel %vm797_vm3, %v6990_v19, -inf }
 0x275   : > { %v1086_v21 = vpop.f32.mrb[18].mxu1 }
 0x276   : > { %1332 = vrot.lane.b32.xlu0 %v6915_v34, %s6705_s30  ;;  %v5971_v23 = vpop.f32.mrb[19].mxu1 }
 0x27a   : > { %1283 = vrot.lane.b32.xlu1 %v6909_v28, %s6705_s30 }
 0x27b   : > { %v6996_v24 = vpop.f32.mrb[20].mxu1 }
 0x27c   : > { %v5982_v26 = vpop.f32.mrb[21].mxu1  ;;  %v1208_v32 = vsel %vm797_vm3, %v6996_v24, -inf }
 0x27d   : > { %v1184_v27 = vpop.f32.mrb[22].mxu1 }
 0x27e   : > { %v5983_v29 = vpop.f32.mrb[23].mxu1 }
 0x295   : > { %1197 = vmax.xlane.f32.xlu0 %v1196_v30 }
 0x299   : > { %1203 = vmax.xlane.f32.xlu0 %v1202_v31 }
 0x29d   : > { %1209 = vmax.xlane.f32.xlu0 %v1208_v32 }
 0x29e   : > { %1206 = vmax.xlane.f32.xlu1 %v1205_v39 }
 0x2af   : > { %1380 = vrot.lane.b32.xlu1 %v6907_v25, %s6705_s30 }
 0x2b3   : > { %1476 = vrot.lane.b32.xlu0 %v6921_v36, %s6705_s30  ;;  %1428 = vrot.lane.b32.xlu1 %v6913_v33, %s6705_s30 }
 0x2b7   : > { %1524 = vrot.lane.b32.xlu1 %v6918_v35, %s6705_s30 }
 0x2e9   : > { %v1195_v40 = vpop.xlane.xlu0 %1194 }
 0x2ea   : > { %v1213_v41 = vsub.f32 %v936_v55, %v1195_v40 }
 0x2ec   : > { %v1223_v42 = vmul.f32 1.442695, %v1213_v41 }
 0x2ed   : > { %v1189_v43 = vpop.xlane.xlu0 %1188 }
 0x2ee   : > { %6430 = vpow2.f32 %v1223_v42  ;;  %v1211_v44 = vsub.f32 %v838_v56, %v1189_v43 }
 0x2f0   : > { %v1219_v45 = vmul.f32 1.442695, %v1211_v44 }
 0x2f1   : > { %v1333_v46 = vpop.permute.xlu0 %1332 }
 0x2f2   : > { %6432 = vpow2.f32 %v1219_v45  ;;  %v1338_v47 = vsel %vm1288_vm4, %v1333_v46, 0  ;;  %v1201_v48 = vpop.xlane.xlu1 %1200 }
 0x2f3   : > { %v1215_v49 = vsub.f32 %v1034_v2, %v1201_v48  ;;  %5991 = vmatpush3.bf16.msra.mxu1 %v1338_v47 }
 0x2f4   : > { %6002 = vmatprep.subr.bf16.mxu1 %v6702_v22 }
 0x2f5   : > { %v1227_v50 = vmul.f32 1.442695, %v1215_v49 }
 0x2f6   : > { %v1192_v51 = vpop.xlane.xlu1 %1191 }
 0x2f7   : > { %6434 = vpow2.f32 %v1227_v50  ;;  %v1212_v52 = vsub.f32 %v6981_v1, %v1192_v51 }
 0x2f8   : > { %v7017_v53 = vpop.eup %6430 }
 0x2f9   : > { %v1221_v54 = vmul.f32 1.442695, %v1212_v52  ;;  %v1241_v55 = vsel %vm797_vm3, %v7017_v53, 0.0 }
 0x2fa   : > { %v1284_v56 = vpop.permute.xlu1 %1283  ;;  %1242 = vadd.xlane.f32.xlu1 %v1241_v55 }
 0x2fb   : > { %6436 = vpow2.f32 %v1221_v54  ;;  %v1290_v57 = vsel %vm1288_vm4, %v1284_v56, 0 }
 0x2fc   : > { %v7022_v58 = vpop.eup %6432  ;;  %5985 = vmatpush3.bf16.msra.mxu0 %v1290_v57 }
 0x2fd   : > { %v1235_v59 = vsel %vm797_vm3, %v7022_v58, 0.0  ;;  %5996 = vmatprep.subr.bf16.mxu0 %v6702_v22 }
 0x2fe   : > { %1236 = vadd.xlane.f32.xlu1 %v1235_v59 }
 0x301   : > { %v7027_v60 = vpop.eup %6434 }
 0x302   : > { %v1247_v61 = vsel %vm797_vm3, %v7027_v60, 0.0 }
 0x303   : > { %1248 = vadd.xlane.f32.xlu1 %v1247_v61 }
 0x305   : > { %v7031_v62 = vpop.eup %6436 }
 0x306   : > { %v1238_v63 = vsel %vm797_vm3, %v7031_v62, 0.0 }
 0x307   : > { %1239 = vadd.xlane.f32.xlu0 %v1238_v63 }
 0x322   : > { %v1198_v0 = vpop.xlane.xlu0 %1197 }
 0x323   : > { %v1214_v1 = vsub.f32 %v6986_v11, %v1198_v0 }
 0x325   : > { %v1225_v2 = vmul.f32 1.442695, %v1214_v1 }
 0x326   : > { %v1204_v3 = vpop.xlane.xlu0 %1203 }
 0x327   : > { %6438 = vpow2.f32 %v1225_v2  ;;  %v1216_v4 = vsub.f32 %v6990_v19, %v1204_v3 }
 0x329   : > { %v1229_v5 = vmul.f32 1.442695, %v1216_v4 }
 0x32b   : > { %6440 = vpow2.f32 %v1229_v5  ;;  %v1207_v6 = vpop.xlane.xlu1 %1206 }
 0x32c   : > { %v1217_v7 = vsub.f32 %v6988_v12, %v1207_v6  ;;  %v1210_v12 = vpop.xlane.xlu0 %1209 }
 0x32d   : > { %v1218_v16 = vsub.f32 %v6996_v24, %v1210_v12 }
 0x32e   : > { %v1231_v8 = vmul.f32 1.442695, %v1217_v7 }
 0x32f   : > { %v1233_v17 = vmul.f32 1.442695, %v1218_v16  ;;  %v1381_v20 = vpop.permute.xlu1 %1380 }
 0x330   : > { %6442 = vpow2.f32 %v1231_v8  ;;  %v1477_v27 = vpop.permute.xlu0 %1476  ;;  %v1386_v41 = vsel %vm1288_vm4, %v1381_v20, 0 }
 0x331   : > { %v7038_v9 = vpop.eup %6438  ;;  %6444 = vpow2.f32 %v1233_v17  ;;  %v1482_v48 = vsel %vm1288_vm4, %v1477_v27, 0 }
 0x332   : > { %v1244_v10 = vsel %vm797_vm3, %v7038_v9, 0.0 }
 0x333   : > { %1245 = vadd.xlane.f32.xlu0 %v1244_v10  ;;  %v1429_v21 = vpop.permute.xlu1 %1428 }
 0x334   : > { %v1434_v49 = vsel %vm1288_vm4, %v1429_v21, 0 }
 0x335   : > { %v7042_v13 = vpop.eup %6440 }
 0x336   : > { %v1250_v11 = vsel %vm797_vm3, %v7042_v13, 0.0 }
 0x337   : > { %1251 = vadd.xlane.f32.xlu0 %v1250_v11  ;;  %v1525_v23 = vpop.permute.xlu1 %1524 }
 0x338   : > { %v1530_v61 = vsel %vm1288_vm4, %v1525_v23, 0 }
 0x33a   : > { %v7046_v14 = vpop.eup %6442 }
 0x33b   : > { %v1253_v15 = vsel %vm797_vm3, %v7046_v14, 0.0  ;;  %v7067_v18 = vpop.eup %6444 }
 0x33c   : > { %1254 = vadd.xlane.f32.xlu1 %v1253_v15  ;;  %v1256_v19 = vsel %vm797_vm3, %v7067_v18, 0.0 }
 0x34d   : > { %1620 = vrot.lane.b32.xlu1 %v6923_v37, %s6705_s30  ;;  %1572 = vrot.lane.b32.xlu0 %v6926_v38, %s6705_s30 }
 0x351   : > { %1728 = vrot.lane.b32.xlu1 %v6915_v34, %s6706_s15 }
 0x355   : > { %1726 = vrot.lane.b32.xlu1 %v6915_v34, %s6707_s19 }
 0x359   : > { %1828 = vrot.lane.b32.xlu1 %v6913_v33, %s6706_s15 }
 0x35d   : > { %1826 = vrot.lane.b32.xlu1 %v6913_v33, %s6707_s19 }
 0x361   : > { %1928 = vrot.lane.b32.xlu1 %v6918_v35, %s6706_s15 }
 0x365   : > { %1926 = vrot.lane.b32.xlu1 %v6918_v35, %s6707_s19 }
 0x369   : > { %2028 = vrot.lane.b32.xlu1 %v6923_v37, %s6706_s15 }
 0x36c   : > { %1257 = vadd.xlane.f32.xlu0 %v1256_v19 }
 0x36d   : > { %2026 = vrot.lane.b32.xlu1 %v6923_v37, %s6707_s19 }
 0x371   : > { %2172 = vrot.lane.b32.xlu1 %v6909_v28, %s6708_s26 }
 0x375   : > { %2268 = vrot.lane.b32.xlu1 %v6907_v25, %s6708_s26 }
 0x379   : > { %2316 = vrot.lane.b32.xlu1 %v6913_v33, %s6708_s26 }
 0x382   : > { %1678 = vrot.lane.b32.xlu0 %v6909_v28, %s6706_s15 }
 0x386   : > { %1676 = vrot.lane.b32.xlu0 %v6909_v28, %s6707_s19 }
 0x387   : > { %v1243_v24 = vpop.xlane.xlu1 %1242 }
 0x38a   : > { %1778 = vrot.lane.b32.xlu0 %v6907_v25, %s6706_s15 }
 0x38b   : > { %v1237_v26 = vpop.xlane.xlu1 %1236 }
 0x38c   : > { %6446 = vrcp.f32 %v1237_v26 }
 0x38d   : > { %6448 = vrcp.f32 %v1243_v24 }
 0x38e   : > { %1776 = vrot.lane.b32.xlu0 %v6907_v25, %s6707_s19 }
 0x390   : > { %v1249_v30 = vpop.xlane.xlu1 %1248 }
 0x392   : > { %1878 = vrot.lane.b32.xlu0 %v6921_v36, %s6706_s15 }
 0x394   : > { %v1240_v29 = vpop.xlane.xlu0 %1239 }
 0x395   : > { %6450 = vrcp.f32 %v1240_v29 }
 0x396   : > { %v6447_v31 = vpop.eup %6446  ;;  %1876 = vrot.lane.b32.xlu0 %v6921_v36, %s6707_s19  ;;  %6452 = vrcp.f32 %v1249_v30 }
 0x397   : > { %v1267_v32 = vmul.f32 %v6447_v31, %v7022_v58  ;;  %v6449_v40 = vpop.eup %6448 }
 0x398   : > { %v1269_v42 = vmul.f32 %v6449_v40, %v7017_v53 }
 0x399   : > { %v1275_v39 = vpack.c.bf16 %v1267_v32, %v1267_v32 }
 0x39a   : > { %1978 = vrot.lane.b32.xlu0 %v6926_v38, %s6706_s15  ;;  %v1277_v45 = vpack.c.bf16 %v1269_v42, %v1269_v42  ;;  %s8147_s15 = scalar_lea.vmem %s8114_s4, %s6831_s21 }
 0x39b   : > { %5987 = vmatmul.mubr.msk.bf16.vlgmr.msra.gmra.mrb[16].mxu0 %vm797_vm3, %v1275_v39 }
 0x39c   : > { %5997 = vmatpush3.bf16.msra.mxu0 %v1386_v41  ;;  %5998 = vmatprep.mubr.msk.bf16.mxu0 %vm6703_vm2, %v6702_v22 }
 0x39d   : > { %6008 = vmatprep.subr.bf16.mxu0 %v6702_v22 }
 0x39e   : > { %1976 = vrot.lane.b32.xlu0 %v6926_v38, %s6707_s19 }
 0x39f   : > { %v6451_v43 = vpop.eup %6450 }
 0x3a0   : > { %v1268_v44 = vmul.f32 %v6451_v43, %v7031_v62  ;;  %v6453_v46 = vpop.eup %6452 }
 0x3a1   : > { %v1271_v50 = vmul.f32 %v6453_v46, %v7027_v60 }
 0x3a2   : > { %2220 = vrot.lane.b32.xlu0 %v6915_v34, %s6708_s26  ;;  %v1276_v47 = vpack.c.bf16 %v1268_v44, %v1268_v44 }
 0x3a3   : > { %5999 = vmatmul.mubr.msk.bf16.vlgmr.msra.gmra.mrb[20].mxu0 %vm797_vm3, %v1277_v45  ;;  %v1279_v51 = vpack.c.bf16 %v1271_v50, %v1271_v50 }
 0x3a4   : > { %6009 = vmatpush3.bf16.msra.mxu0 %v1482_v48  ;;  %5993 = vmatmul.mubr.msk.bf16.vlgmr.msra.gmra.mrb[24].mxu1 %vm797_vm3, %v1276_v47 }
 0x3a5   : > { %6003 = vmatpush3.bf16.msra.mxu1 %v1434_v49  ;;  %6010 = vmatprep.mubr.msk.bf16.mxu0 %vm6703_vm2, %v6702_v22 }
 0x3a6   : > { %6020 = vmatprep.subr.bf16.mxu0 %v6702_v22  ;;  %6004 = vmatprep.mubr.msk.bf16.mxu1 %vm6703_vm2, %v6702_v22 }
 0x3a7   : > { %6014 = vmatprep.subr.bf16.mxu1 %v6702_v22 }
 0x3ab   : > { %6011 = vmatmul.mubr.msk.bf16.vlgmr.msra.gmra.mrb[24].mxu0 %vm797_vm3, %v1279_v51 }
 0x3ac   : > { %6022 = vmatprep.mubr.msk.bf16.mxu0 %vm6703_vm2, %v6702_v22 }
 0x3c0   : > { %v1246_v52 = vpop.xlane.xlu0 %1245 }
 0x3c1   : > { %6454 = vrcp.f32 %v1246_v52 }
 0x3c4   : > { %v1252_v53 = vpop.xlane.xlu0 %1251 }
 0x3c5   : > { %6456 = vrcp.f32 %v1252_v53 }
 0x3c8   : > { %v1573_v54 = vpop.permute.xlu0 %1572 }
 0x3c9   : > { %v1578_v55 = vsel %vm1288_vm4, %v1573_v54, 0  ;;  %v1255_v56 = vpop.xlane.xlu1 %1254 }
 0x3ca   : > { %6458 = vrcp.f32 %v1255_v56  ;;  %6021 = vmatpush3.bf16.msra.mxu0 %v1578_v55 }
 0x3cb   : > { %v6455_v57 = vpop.eup %6454  ;;  %6032 = vmatprep.subr.bf16.mxu0 %v6702_v22 }
 0x3cc   : > { %v1270_v58 = vmul.f32 %v6455_v57, %v7038_v9 }
 0x3cd   : > { %v1621_v0 = vpop.permute.xlu1 %1620 }
 0x3ce   : > { %v1278_v59 = vpack.c.bf16 %v1270_v58, %v1270_v58  ;;  %v1626_v4 = vsel %vm1288_vm4, %v1621_v0, 0 }
 0x3cf   : > { %v6457_v60 = vpop.eup %6456 }
 0x3d0   : > { %6005 = vmatmul.mubr.msk.bf16.vlgmr.msra.gmra.mrb[28].mxu1 %vm797_vm3, %v1278_v59  ;;  %v1272_v62 = vmul.f32 %v6457_v60, %v7042_v13 }
 0x3d1   : > { %6015 = vmatpush3.bf16.msra.mxu1 %v1530_v61  ;;  %6016 = vmatprep.mubr.msk.bf16.mxu1 %vm6703_vm2, %v6702_v22  ;;  %v1729_v5 = vpop.permute.xlu1 %1728 }
 0x3d2   : > { %6026 = vmatprep.subr.bf16.mxu1 %v6702_v22  ;;  %v1280_v2 = vpack.c.bf16 %v1272_v62, %v1272_v62  ;;  %v1734_v20 = vsel %vm797_vm3, %v1729_v5, 0 }
 0x3d4   : > { %v6459_v63 = vpop.eup %6458 }
 0x3d5   : > { %v1273_v1 = vmul.f32 %v6459_v63, %v7046_v14  ;;  %v1727_v6 = vpop.permute.xlu1 %1726 }
 0x3d7   : > { %v1281_v3 = vpack.c.bf16 %v1273_v1, %v1273_v1 }
 0x3d8   : > { %6017 = vmatmul.mubr.msk.bf16.vlgmr.msra.gmra.mrb[32].mxu1 %vm797_vm3, %v1280_v2 }
 0x3d9   : > { %6027 = vmatpush3.bf16.msra.mxu1 %v1626_v4  ;;  %6023 = vmatmul.mubr.msk.bf16.vlgmr.msra.gmra.mrb[28].mxu0 %vm797_vm3, %v1281_v3  ;;  %v1829_v7 = vpop.permute.xlu1 %1828 }
 0x3da   : > { %6034 = vmatprep.mubr.msk.bf16.mxu0 %vm6703_vm2, %v6702_v22  ;;  %6028 = vmatprep.mubr.msk.bf16.mxu1 %vm6703_vm2, %v6702_v22  ;;  %v1834_v27 = vsel %vm797_vm3, %v1829_v7, 0 }
 0x3db   : > { %6038 = vmatprep.subr.bf16.mxu1 %v6702_v22 }
 0x3dd   : > { %v1827_v9 = vpop.permute.xlu1 %1826 }
 0x3e1   : > { %v1929_v14 = vpop.permute.xlu1 %1928 }
 0x3e2   : > { %v1934_v39 = vsel %vm797_vm3, %v1929_v14, 0 }
 0x3e5   : > { %v1927_v21 = vpop.permute.xlu1 %1926 }
 0x3e9   : > { %v2029_v26 = vpop.permute.xlu1 %2028 }
 0x3ea   : > { %v2034_v43 = vsel %vm797_vm3, %v2029_v26, 0 }
 0x3ed   : > { %v2027_v30 = vpop.permute.xlu1 %2026 }
 0x3f1   : > { %v2173_v40 = vpop.permute.xlu1 %2172 }
 0x3f2   : > { %v2178_v42 = vsel %vm1288_vm4, %v2173_v40, 0 }
 0x3f9   : > { %v1258_v8 = vpop.xlane.xlu0 %1257 }
 0x3fa   : > { %6460 = vrcp.f32 %v1258_v8 }
 0x3fd   : > { %v1679_v10 = vpop.permute.xlu0 %1678 }
 0x3fe   : > { %v1684_v13 = vsel %vm797_vm3, %v1679_v10, 0 }
 0x3ff   : > { %6033 = vmatpush3.bf16.xpose.msra.mxu0 %v1684_v13 }
 0x400   : > { %6044 = vmatprep.subr.bf16.mxu0 %v6702_v22 }
 0x401   : > { %v1677_v11 = vpop.permute.xlu0 %1676 }
 0x404   : > { %v6461_v15 = vpop.eup %6460 }
 0x405   : > { %v1779_v12 = vpop.permute.xlu0 %1778  ;;  %v1274_v16 = vmul.f32 %v6461_v15, %v7067_v18 }
 0x406   : > { %v1784_v17 = vsel %vm797_vm3, %v1779_v12, 0  ;;  %6035 = vmatmul.mubr.msk.bf16.vlgmr.msra.gmra.mrb[32].mxu0 %vm797_vm3, %v1677_v11 }
 0x407   : > { %6045 = vmatpush3.bf16.xpose.msra.mxu0 %v1784_v17  ;;  %v1282_v19 = vpack.c.bf16 %v1274_v16, %v1274_v16  ;;  %6046 = vmatprep.mubr.msk.bf16.mxu0 %vm6703_vm2, %v6702_v22 }
 0x408   : > { %6056 = vmatprep.subr.bf16.mxu0 %v6702_v22 }
 0x409   : > { %6029 = vmatmul.mubr.msk.bf16.vlgmr.msra.gmra.mrb[36].mxu1 %vm797_vm3, %v1282_v19  ;;  %v1777_v23 = vpop.permute.xlu0 %1776 }
 0x40a   : > { %6039 = vmatpush3.bf16.xpose.msra.mxu1 %v1734_v20  ;;  %6040 = vmatprep.mubr.msk.bf16.mxu1 %vm6703_vm2, %v6702_v22 }
 0x40b   : > { %6050 = vmatprep.subr.bf16.mxu1 %v6702_v22 }
 0x40d   : > { %v1879_v18 = vpop.permute.xlu0 %1878 }
 0x40e   : > { %v1884_v24 = vsel %vm797_vm3, %v1879_v18, 0  ;;  %6047 = vmatmul.mubr.msk.bf16.vlgmr.msra.gmra.mrb[36].mxu0 %vm797_vm3, %v1777_v23 }
 0x40f   : > { %6057 = vmatpush3.bf16.xpose.msra.mxu0 %v1884_v24  ;;  %6058 = vmatprep.mubr.msk.bf16.mxu0 %vm6703_vm2, %v6702_v22 }
 0x410   : > { %6068 = vmatprep.subr.bf16.mxu0 %v6702_v22 }
 0x411   : > { %6041 = vmatmul.mubr.msk.bf16.vlgmr.msra.gmra.mrb[40].mxu1 %vm797_vm3, %v1727_v6  ;;  %v1877_v29 = vpop.permute.xlu0 %1876 }
 0x412   : > { %6051 = vmatpush3.bf16.xpose.msra.mxu1 %v1834_v27  ;;  %6052 = vmatprep.mubr.msk.bf16.mxu1 %vm6703_vm2, %v6702_v22 }
 0x413   : > { %6062 = vmatprep.subr.bf16.mxu1 %v6702_v22 }
 0x415   : > { %v1979_v31 = vpop.permute.xlu0 %1978 }
 0x416   : > { %v1984_v32 = vsel %vm797_vm3, %v1979_v31, 0  ;;  %6059 = vmatmul.mubr.msk.bf16.vlgmr.msra.gmra.mrb[40].mxu0 %vm797_vm3, %v1877_v29 }
 0x417   : > { %6069 = vmatpush3.bf16.xpose.msra.mxu0 %v1984_v32  ;;  %6070 = vmatprep.mubr.msk.bf16.mxu0 %vm6703_vm2, %v6702_v22 }
 0x418   : > { %6080 = vmatprep.subr.bf16.mxu0 %v6702_v22 }
 0x419   : > { %6053 = vmatmul.mubr.msk.bf16.vlgmr.msra.gmra.mrb[44].mxu1 %vm797_vm3, %v1827_v9  ;;  %v1977_v41 = vpop.permute.xlu0 %1976 }
 0x41a   : > { %6063 = vmatpush3.bf16.xpose.msra.mxu1 %v1934_v39  ;;  %6064 = vmatprep.mubr.msk.bf16.mxu1 %vm6703_vm2, %v6702_v22 }
 0x41b   : > { %6074 = vmatprep.subr.bf16.mxu1 %v6702_v22 }
 0x41d   : > { %v2221_v44 = vpop.permute.xlu0 %2220 }
 0x41e   : > { %6071 = vmatmul.mubr.msk.bf16.vlgmr.msra.gmra.mrb[44].mxu0 %vm797_vm3, %v1977_v41  ;;  %v2226_v45 = vsel %vm1288_vm4, %v2221_v44, 0 }
 0x41f   : > { %6081 = vmatpush3.bf16.msra.mxu0 %v2178_v42  ;;  %6082 = vmatprep.mubr.msk.bf16.mxu0 %vm6703_vm2, %v6702_v22 }
 0x420   : > { %6092 = vmatprep.subr.bf16.mxu0 %v6702_v22 }
 0x421   : > { %6065 = vmatmul.mubr.msk.bf16.vlgmr.msra.gmra.mrb[48].mxu1 %vm797_vm3, %v1927_v21 }
 0x422   : > { %6075 = vmatpush3.bf16.xpose.msra.mxu1 %v2034_v43  ;;  %6076 = vmatprep.mubr.msk.bf16.mxu1 %vm6703_vm2, %v6702_v22 }
 0x423   : > { %6086 = vmatprep.subr.bf16.mxu1 %v6702_v22 }
 0x429   : > { %6077 = vmatmul.mubr.msk.bf16.vlgmr.msra.gmra.mrb[52].mxu1 %vm797_vm3, %v2027_v30 }
 0x42a   : > { %6087 = vmatpush3.bf16.msra.mxu1 %v2226_v45  ;;  %6088 = vmatprep.mubr.msk.bf16.mxu1 %vm6703_vm2, %v6702_v22 }
 0x42b   : > { %6098 = vmatprep.subr.bf16.mxu1 %v6702_v22 }
 0x46e   : > { %v1326_v46 = vpop.f32.mrb[16].mxu0 }
 0x46f   : > { %1668 = vst.msk [vmem:[#allocation3] sm:$0xff] %vm797_vm3, %v1326_v46  ;;  %v5988_v47 = vpop.f32.mrb[17].mxu0 }
 0x470   : > { %v1329_v48 = vpop.f32.mrb[18].mxu0 }
 0x471   : > { %v5989_v49 = vpop.f32.mrb[19].mxu0 }
 0x476   : > { %v1422_v50 = vpop.f32.mrb[20].mxu0 }
 0x477   : > { %1670 = vst.msk [vmem:[#allocation3 + $0x10] sm:$0xff] %vm797_vm3, %v1422_v50  ;;  %v1374_v51 = vpop.f32.mrb[24].mxu1  ;;  %v6000_v52 = vpop.f32.mrb[21].mxu0 }
 0x478   : > { %1669 = vst.msk [vmem:[#allocation3 + $0x8] sm:$0xff] %vm797_vm3, %v1374_v51  ;;  %v5994_v53 = vpop.f32.mrb[25].mxu1  ;;  %v1425_v54 = vpop.f32.mrb[22].mxu0 }
 0x479   : > { %v1377_v55 = vpop.f32.mrb[26].mxu1  ;;  %v6001_v56 = vpop.f32.mrb[23].mxu0 }
 0x47a   : > { %v5995_v57 = vpop.f32.mrb[27].mxu1 }
 0x47e   : > { %v1518_v58 = vpop.f32.mrb[24].mxu0 }
 0x47f   : > { %1672 = vst.msk [vmem:[#allocation3 + $0x20] sm:$0xff] %vm797_vm3, %v1518_v58  ;;  %v6012_v59 = vpop.f32.mrb[25].mxu0 }
 0x480   : > { %v1521_v60 = vpop.f32.mrb[26].mxu0 }
 0x481   : > { %v6013_v61 = vpop.f32.mrb[27].mxu0 }
 0x4a3   : > { %v1470_v62 = vpop.f32.mrb[28].mxu1 }
 0x4a4   : > { %1671 = vst.msk [vmem:[#allocation3 + $0x18] sm:$0xff] %vm797_vm3, %v1470_v62  ;;  %v6006_v63 = vpop.f32.mrb[29].mxu1 }
 0x4a5   : > { %v1473_v0 = vpop.f32.mrb[30].mxu1 }
 0x4a6   : > { %v6007_v1 = vpop.f32.mrb[31].mxu1  ;;  %v7210_v0 = vpop.permute.xlu1 %2268 }
 0x4ab   : > { %v1566_v2 = vpop.f32.mrb[32].mxu1 }
 0x4ac   : > { %1673 = vst.msk [vmem:[#allocation3 + $0x28] sm:$0xff] %vm797_vm3, %v1566_v2  ;;  %v6018_v3 = vpop.f32.mrb[33].mxu1  ;;  %v1614_v4 = vpop.f32.mrb[28].mxu0 }
 0x4ad   : > { %1674 = vst.msk [vmem:[#allocation3 + $0x30] sm:$0xff] %vm797_vm3, %v1614_v4  ;;  %v1569_v5 = vpop.f32.mrb[34].mxu1  ;;  %v6024_v6 = vpop.f32.mrb[29].mxu0 }
 0x4ae   : > { %v6019_v7 = vpop.f32.mrb[35].mxu1  ;;  %v1617_v8 = vpop.f32.mrb[30].mxu0 }
 0x4af   : > { %v6025_v9 = vpop.f32.mrb[31].mxu0  ;;  %v7212_v3 = vpop.permute.xlu1 %2316 }
 0x4d9   : > { %v1720_v10 = vpop.f32.mrb[32].mxu0 }
 0x4da   : > { %v6036_v13 = vpop.f32.mrb[33].mxu0  ;;  %v2076_v11 = vsel %vm797_vm3, %v1720_v10, -inf }
 0x4db   : > { %2077 = vmax.xlane.f32.xlu0 %v2076_v11  ;;  %v1723_v14 = vpop.f32.mrb[34].mxu0 }
 0x4dc   : > { %v1662_v15 = vpop.f32.mrb[36].mxu1  ;;  %v6037_v12 = vpop.f32.mrb[35].mxu0 }
 0x4dd   : > { %1675 = vst.msk [vmem:[#allocation3 + $0x38] sm:$0xff] %vm797_vm3, %v1662_v15  ;;  %v6030_v16 = vpop.f32.mrb[37].mxu1 }
 0x4de   : > { %v1665_v17 = vpop.f32.mrb[38].mxu1 }
 0x4df   : > { %v6031_v19 = vpop.f32.mrb[39].mxu1 }
 0x4e1   : > { %v1820_v20 = vpop.f32.mrb[36].mxu0 }
 0x4e2   : > { %v6048_v21 = vpop.f32.mrb[37].mxu0  ;;  %v2082_v23 = vsel %vm797_vm3, %v1820_v20, -inf }
 0x4e3   : > { %2083 = vmax.xlane.f32.xlu0 %v2082_v23  ;;  %v1823_v18 = vpop.f32.mrb[38].mxu0 }
 0x4e4   : > { %v1770_v24 = vpop.f32.mrb[40].mxu1  ;;  %v6049_v26 = vpop.f32.mrb[39].mxu0 }
 0x4e5   : > { %v6042_v27 = vpop.f32.mrb[41].mxu1  ;;  %v2079_v29 = vsel %vm797_vm3, %v1770_v24, -inf }
 0x4e6   : > { %2080 = vmax.xlane.f32.xlu1 %v2079_v29  ;;  %v1773_v30 = vpop.f32.mrb[42].mxu1 }
 0x4e7   : > { %v6043_v31 = vpop.f32.mrb[43].mxu1 }
 0x4e9   : > { %v1920_v32 = vpop.f32.mrb[40].mxu0 }
 0x4ea   : > { %v6060_v39 = vpop.f32.mrb[41].mxu0  ;;  %v2088_v40 = vsel %vm797_vm3, %v1920_v32, -inf }
 0x4eb   : > { %2089 = vmax.xlane.f32.xlu1 %v2088_v40  ;;  %v1923_v41 = vpop.f32.mrb[42].mxu0 }
 0x4ec   : > { %v1870_v42 = vpop.f32.mrb[44].mxu1  ;;  %v6061_v43 = vpop.f32.mrb[43].mxu0 }
 0x4ed   : > { %v6054_v44 = vpop.f32.mrb[45].mxu1  ;;  %v2085_v45 = vsel %vm797_vm3, %v1870_v42, -inf }
 0x4ee   : > { %v1873_v46 = vpop.f32.mrb[46].mxu1  ;;  %2086 = vmax.xlane.f32.xlu0 %v2085_v45 }
 0x4ef   : > { %v6055_v47 = vpop.f32.mrb[47].mxu1 }
 0x4f1   : > { %v7200_v48 = vpop.f32.mrb[44].mxu0 }
 0x4f2   : > { %v6072_v49 = vpop.f32.mrb[45].mxu0  ;;  %v2094_v50 = vsel %vm797_vm3, %v7200_v48, -inf }
 0x4f3   : > { %2095 = vmax.xlane.f32.xlu1 %v2094_v50  ;;  %v2023_v51 = vpop.f32.mrb[46].mxu0 }
 0x4f4   : > { %v1970_v52 = vpop.f32.mrb[48].mxu1  ;;  %v6073_v53 = vpop.f32.mrb[47].mxu0 }
 0x4f5   : > { %v6066_v54 = vpop.f32.mrb[49].mxu1  ;;  %v2091_v55 = vsel %vm797_vm3, %v1970_v52, -inf }
 0x4f6   : > { %v1973_v56 = vpop.f32.mrb[50].mxu1  ;;  %2092 = vmax.xlane.f32.xlu0 %v2091_v55 }
 0x4f7   : > { %v6067_v57 = vpop.f32.mrb[51].mxu1 }
 0x4fc   : > { %v2070_v58 = vpop.f32.mrb[52].mxu1 }
 0x4fd   : > { %v6078_v59 = vpop.f32.mrb[53].mxu1  ;;  %v2097_v60 = vsel %vm797_vm3, %v2070_v58, -inf }
 0x4fe   : > { %v2073_v61 = vpop.f32.mrb[54].mxu1  ;;  %2098 = vmax.xlane.f32.xlu0 %v2097_v60 }
 0x4ff   : > { %v6079_v62 = vpop.f32.mrb[55].mxu1 }
 0x504   : > { %2412 = vrot.lane.b32.xlu1 %v6918_v35, %s6708_s26 }
 0x514   : > { %2364 = vrot.lane.b32.xlu0 %v6921_v36, %s6708_s26 }
 0x568   : > { %v2078_v63 = vpop.xlane.xlu0 %2077 }
 0x569   : > { %v2100_v1 = vsub.f32 %v1720_v10, %v2078_v63 }
 0x56b   : > { %v2108_v2 = vmul.f32 1.442695, %v2100_v1 }
 0x56d   : > { %6462 = vpow2.f32 %v2108_v2 }
 0x570   : > { %v2084_v4 = vpop.xlane.xlu0 %2083 }
 0x571   : > { %v2102_v5 = vsub.f32 %v1820_v20, %v2084_v4 }
 0x573   : > { %v2112_v6 = vmul.f32 1.442695, %v2102_v5  ;;  %v2081_v7 = vpop.xlane.xlu1 %2080 }
 0x574   : > { %v2101_v8 = vsub.f32 %v1770_v24, %v2081_v7 }
 0x575   : > { %6464 = vpow2.f32 %v2112_v6  ;;  %v2322_v6 = vsel %vm1288_vm4, %v7212_v3, 0 }
 0x576   : > { %v2110_v9 = vmul.f32 1.442695, %v2101_v8 }
 0x577   : > { %v7214_v13 = vpop.eup %6462 }
 0x578   : > { %6466 = vpow2.f32 %v2110_v9  ;;  %v2090_v11 = vpop.xlane.xlu1 %2089  ;;  %v2124_v14 = vsel %vm797_vm3, %v7214_v13, 0.0 }
 0x579   : > { %v2104_v15 = vsub.f32 %v1920_v32, %v2090_v11  ;;  %2125 = vadd.xlane.f32.xlu1 %v2124_v14 }
 0x57b   : > { %v2116_v10 = vmul.f32 1.442695, %v2104_v15  ;;  %v2087_v12 = vpop.xlane.xlu0 %2086 }
 0x57c   : > { %v2103_v16 = vsub.f32 %v1870_v42, %v2087_v12 }
 0x57d   : > { %6468 = vpow2.f32 %v2116_v10 }
 0x57e   : > { %v2114_v17 = vmul.f32 1.442695, %v2103_v16 }
 0x57f   : > { %v7218_v19 = vpop.eup %6464 }
 0x580   : > { %6470 = vpow2.f32 %v2114_v17  ;;  %v2130_v20 = vsel %vm797_vm3, %v7218_v19, 0.0  ;;  %v2096_v40 = vpop.xlane.xlu1 %2095 }
 0x581   : > { %2131 = vadd.xlane.f32.xlu1 %v2130_v20  ;;  %v2106_v41 = vsub.f32 %v7200_v48, %v2096_v40 }
 0x582   : > { %v7222_v21 = vpop.eup %6466 }
 0x583   : > { %v2093_v23 = vpop.xlane.xlu0 %2092  ;;  %v2127_v18 = vsel %vm797_vm3, %v7222_v21, 0.0  ;;  %v2120_v42 = vmul.f32 1.442695, %v2106_v41 }
 0x584   : > { %v2105_v24 = vsub.f32 %v1970_v52, %v2093_v23  ;;  %2128 = vadd.xlane.f32.xlu0 %v2127_v18  ;;  %v2413_v50 = vpop.permute.xlu1 %2412 }
 0x585   : > { %v2418_v10 = vsel %vm1288_vm4, %v2413_v50, 0 }
 0x586   : > { %v2118_v26 = vmul.f32 1.442695, %v2105_v24 }
 0x587   : > { %v7226_v27 = vpop.eup %6468 }
 0x588   : > { %6472 = vpow2.f32 %v2118_v26  ;;  %v2136_v29 = vsel %vm797_vm3, %v7226_v27, 0.0 }
 0x589   : > { %2137 = vadd.xlane.f32.xlu1 %v2136_v29  ;;  %6474 = vpow2.f32 %v2120_v42 }
 0x58a   : > { %v7230_v30 = vpop.eup %6470 }
 0x58b   : > { %v2133_v31 = vsel %vm797_vm3, %v7230_v30, 0.0  ;;  %v2099_v43 = vpop.xlane.xlu0 %2098 }
 0x58c   : > { %2134 = vadd.xlane.f32.xlu0 %v2133_v31  ;;  %v2107_v44 = vsub.f32 %v2070_v58, %v2099_v43  ;;  %v2274_v58 = vsel %vm1288_vm4, %v7210_v0, 0 }
 0x58e   : > { %v2122_v45 = vmul.f32 1.442695, %v2107_v44 }
 0x58f   : > { %v2365_v52 = vpop.permute.xlu0 %2364 }
 0x590   : > { %6476 = vpow2.f32 %v2122_v45  ;;  %v2370_v0 = vsel %vm1288_vm4, %v2365_v52, 0 }
 0x592   : > { %v7234_v32 = vpop.eup %6472 }
 0x593   : > { %v2139_v39 = vsel %vm797_vm3, %v7234_v32, 0.0  ;;  %v7243_v46 = vpop.eup %6474 }
 0x594   : > { %2140 = vadd.xlane.f32.xlu0 %v2139_v39  ;;  %v2142_v47 = vsel %vm797_vm3, %v7243_v46, 0.0 }
 0x59a   : > { %2508 = vrot.lane.b32.xlu1 %v6923_v37, %s6708_s26  ;;  %v7247_v49 = vpop.eup %6476 }
 0x59b   : > { %v2145_v48 = vsel %vm797_vm3, %v7247_v49, 0.0 }
 0x5aa   : > { %2460 = vrot.lane.b32.xlu0 %v6926_v38, %s6708_s26 }
 0x5be   : > { %2143 = vadd.xlane.f32.xlu1 %v2142_v47 }
 0x5c9   : > { %2146 = vadd.xlane.f32.xlu0 %v2145_v48 }
 0x5cf   : > { %2649 = vrot.lane.b32.xlu1 %v6915_v34, %s6709_s13 }
 0x5d3   : > { %2647 = vrot.lane.b32.xlu1 %v6915_v34, %s6710_s14 }
 0x5d7   : > { %2749 = vrot.lane.b32.xlu1 %v6913_v33, %s6709_s13 }
 0x5db   : > { %2747 = vrot.lane.b32.xlu1 %v6913_v33, %s6710_s14 }
 0x5df   : > { %2849 = vrot.lane.b32.xlu1 %v6918_v35, %s6709_s13  ;;  %2599 = vrot.lane.b32.xlu0 %v6909_v28, %s6709_s13 }
 0x5e3   : > { %2847 = vrot.lane.b32.xlu1 %v6918_v35, %s6710_s14  ;;  %2597 = vrot.lane.b32.xlu0 %v6909_v28, %s6710_s14 }
 0x5e7   : > { %2949 = vrot.lane.b32.xlu1 %v6923_v37, %s6709_s13  ;;  %2699 = vrot.lane.b32.xlu0 %v6907_v25, %s6709_s13 }
 0x5eb   : > { %2947 = vrot.lane.b32.xlu1 %v6923_v37, %s6710_s14  ;;  %2697 = vrot.lane.b32.xlu0 %v6907_v25, %s6710_s14 }
 0x5ef   : > { %3093 = vrot.lane.b32.xlu1 %v6909_v28, %s6711_s29  ;;  %2799 = vrot.lane.b32.xlu0 %v6921_v36, %s6709_s13 }
 0x5f3   : > { %3189 = vrot.lane.b32.xlu1 %v6907_v25, %s6711_s29  ;;  %2797 = vrot.lane.b32.xlu0 %v6921_v36, %s6710_s14 }
 0x5f7   : > { %3237 = vrot.lane.b32.xlu1 %v6913_v33, %s6711_s29  ;;  %2899 = vrot.lane.b32.xlu0 %v6926_v38, %s6709_s13  ;;  %s8148_s13 = scalar_lea.vmem %s8115_s5, %s6831_s21 }
 0x5fb   : > { %2897 = vrot.lane.b32.xlu0 %v6926_v38, %s6710_s14 }
 0x5ff   : > { %3141 = vrot.lane.b32.xlu0 %v6915_v34, %s6711_s29 }
 0x606   : > { %v2126_v51 = vpop.xlane.xlu1 %2125 }
 0x607   : > { %6478 = vrcp.f32 %v2126_v51 }
 0x60e   : > { %v2132_v53 = vpop.xlane.xlu1 %2131 }
 0x60f   : > { %6480 = vrcp.f32 %v2132_v53 }
 0x611   : > { %v6479_v54 = vpop.eup %6478  ;;  %v2129_v55 = vpop.xlane.xlu0 %2128 }
 0x612   : > { %6482 = vrcp.f32 %v2129_v55  ;;  %v2156_v56 = vmul.f32 %v6479_v54, %v7214_v13 }
 0x614   : > { %v2164_v57 = vpack.c.bf16 %v2156_v56, %v2156_v56 }
 0x616   : > { %6083 = vmatmul.mubr.msk.bf16.vlgmr.msra.gmra.mrb[48].mxu0 %vm797_vm3, %v2164_v57  ;;  %v2138_v59 = vpop.xlane.xlu1 %2137 }
 0x617   : > { %6093 = vmatpush3.bf16.msra.mxu0 %v2274_v58  ;;  %6484 = vrcp.f32 %v2138_v59  ;;  %6094 = vmatprep.mubr.msk.bf16.mxu0 %vm6703_vm2, %v6702_v22 }
 0x618   : > { %6104 = vmatprep.subr.bf16.mxu0 %v6702_v22 }
 0x619   : > { %v6481_v60 = vpop.eup %6480  ;;  %v2135_v61 = vpop.xlane.xlu0 %2134 }
 0x61a   : > { %6486 = vrcp.f32 %v2135_v61  ;;  %v2158_v62 = vmul.f32 %v6481_v60, %v7218_v19  ;;  %v2509_v17 = vpop.permute.xlu1 %2508 }
 0x61b   : > { %v2514_v20 = vsel %vm1288_vm4, %v2509_v17, 0 }
 0x61c   : > { %v6483_v63 = vpop.eup %6482  ;;  %v2166_v1 = vpack.c.bf16 %v2158_v62, %v2158_v62 }
 0x61d   : > { %v2157_v2 = vmul.f32 %v6483_v63, %v7222_v21 }
 0x61e   : > { %6095 = vmatmul.mubr.msk.bf16.vlgmr.msra.gmra.mrb[52].mxu0 %vm797_vm3, %v2166_v1 }
 0x61f   : > { %6105 = vmatpush3.bf16.msra.mxu0 %v2370_v0  ;;  %v2165_v4 = vpack.c.bf16 %v2157_v2, %v2157_v2  ;;  %6106 = vmatprep.mubr.msk.bf16.mxu0 %vm6703_vm2, %v6702_v22 }
 0x620   : > { %6116 = vmatprep.subr.bf16.mxu0 %v6702_v22 }
 0x621   : > { %v6485_v5 = vpop.eup %6484  ;;  %6089 = vmatmul.mubr.msk.bf16.vlgmr.msra.gmra.mrb[56].mxu1 %vm797_vm3, %v2165_v4  ;;  %v2141_v7 = vpop.xlane.xlu0 %2140 }
 0x622   : > { %6099 = vmatpush3.bf16.msra.mxu1 %v2322_v6  ;;  %6488 = vrcp.f32 %v2141_v7  ;;  %v2160_v8 = vmul.f32 %v6485_v5, %v7226_v27  ;;  %6100 = vmatprep.mubr.msk.bf16.mxu1 %vm6703_vm2, %v6702_v22 }
 0x623   : > { %6110 = vmatprep.subr.bf16.mxu1 %v6702_v22 }
 0x624   : > { %v6487_v9 = vpop.eup %6486  ;;  %v2168_v13 = vpack.c.bf16 %v2160_v8, %v2160_v8 }
 0x625   : > { %v2461_v11 = vpop.permute.xlu0 %2460  ;;  %v2159_v14 = vmul.f32 %v6487_v9, %v7230_v30 }
 0x626   : > { %v2466_v15 = vsel %vm1288_vm4, %v2461_v11, 0  ;;  %6107 = vmatmul.mubr.msk.bf16.vlgmr.msra.gmra.mrb[56].mxu0 %vm797_vm3, %v2168_v13 }
 0x627   : > { %6117 = vmatpush3.bf16.msra.mxu0 %v2466_v15  ;;  %v2167_v3 = vpack.c.bf16 %v2159_v14, %v2159_v14  ;;  %6118 = vmatprep.mubr.msk.bf16.mxu0 %vm6703_vm2, %v6702_v22 }
 0x628   : > { %6128 = vmatprep.subr.bf16.mxu0 %v6702_v22 }
 0x629   : > { %6101 = vmatmul.mubr.msk.bf16.vlgmr.msra.gmra.mrb[60].mxu1 %vm797_vm3, %v2167_v3 }
 0x62a   : > { %6111 = vmatpush3.bf16.msra.mxu1 %v2418_v10  ;;  %6112 = vmatprep.mubr.msk.bf16.mxu1 %vm6703_vm2, %v6702_v22 }
 0x62b   : > { %6122 = vmatprep.subr.bf16.mxu1 %v6702_v22 }
 0x62c   : > { %v6489_v12 = vpop.eup %6488 }
 0x62d   : > { %v2161_v16 = vmul.f32 %v6489_v12, %v7234_v32 }
 0x62f   : > { %v2169_v19 = vpack.c.bf16 %v2161_v16, %v2161_v16 }
 0x631   : > { %6113 = vmatmul.mubr.msk.bf16.vlgmr.msra.gmra.mrb[64].mxu1 %vm797_vm3, %v2169_v19 }
 0x632   : > { %6123 = vmatpush3.bf16.msra.mxu1 %v2514_v20  ;;  %6124 = vmatprep.mubr.msk.bf16.mxu1 %vm6703_vm2, %v6702_v22 }
 0x633   : > { %6134 = vmatprep.subr.bf16.mxu1 %v6702_v22 }
 0x64b   : > { %v2144_v21 = vpop.xlane.xlu1 %2143 }
 0x64c   : > { %6490 = vrcp.f32 %v2144_v21 }
 0x64f   : > { %v2650_v23 = vpop.permute.xlu1 %2649 }
 0x650   : > { %v2655_v47 = vsel %vm797_vm3, %v2650_v23, 0 }
 0x653   : > { %v2648_v18 = vpop.permute.xlu1 %2647 }
 0x656   : > { %v6491_v24 = vpop.eup %6490  ;;  %v2147_v26 = vpop.xlane.xlu0 %2146 }
 0x657   : > { %6492 = vrcp.f32 %v2147_v26  ;;  %v2750_v27 = vpop.permute.xlu1 %2749  ;;  %v2162_v29 = vmul.f32 %v6491_v24, %v7243_v46 }
 0x658   : > { %v2755_v53 = vsel %vm797_vm3, %v2750_v27, 0 }
 0x659   : > { %v2170_v30 = vpack.c.bf16 %v2162_v29, %v2162_v29 }
 0x65a   : > { %v2600_v31 = vpop.permute.xlu0 %2599 }
 0x65b   : > { %v2605_v32 = vsel %vm797_vm3, %v2600_v31, 0  ;;  %v2748_v39 = vpop.permute.xlu1 %2747  ;;  %6119 = vmatmul.mubr.msk.bf16.vlgmr.msra.gmra.mrb[60].mxu0 %vm797_vm3, %v2170_v30 }
 0x65c   : > { %6129 = vmatpush3.bf16.xpose.msra.mxu0 %v2605_v32  ;;  %6130 = vmatprep.mubr.msk.bf16.mxu0 %vm6703_vm2, %v6702_v22 }
 0x65d   : > { %6140 = vmatprep.subr.bf16.mxu0 %v6702_v22 }
 0x65e   : > { %v2598_v40 = vpop.permute.xlu0 %2597 }
 0x65f   : > { %v2850_v41 = vpop.permute.xlu1 %2849 }
 0x660   : > { %v2855_v58 = vsel %vm797_vm3, %v2850_v41, 0 }
 0x661   : > { %v6493_v42 = vpop.eup %6492 }
 0x662   : > { %v2700_v43 = vpop.permute.xlu0 %2699  ;;  %v2163_v44 = vmul.f32 %v6493_v42, %v7247_v49 }
 0x663   : > { %v2705_v45 = vsel %vm797_vm3, %v2700_v43, 0  ;;  %6131 = vmatmul.mubr.msk.bf16.vlgmr.msra.gmra.mrb[64].mxu0 %vm797_vm3, %v2598_v40  ;;  %v2848_v48 = vpop.permute.xlu1 %2847 }
 0x664   : > { %6141 = vmatpush3.bf16.xpose.msra.mxu0 %v2705_v45  ;;  %v2171_v46 = vpack.c.bf16 %v2163_v44, %v2163_v44  ;;  %6142 = vmatprep.mubr.msk.bf16.mxu0 %vm6703_vm2, %v6702_v22 }
 0x665   : > { %6152 = vmatprep.subr.bf16.mxu0 %v6702_v22 }
 0x666   : > { %6125 = vmatmul.mubr.msk.bf16.vlgmr.msra.gmra.mrb[68].mxu1 %vm797_vm3, %v2171_v46  ;;  %v2698_v50 = vpop.permute.xlu0 %2697 }
 0x667   : > { %6135 = vmatpush3.bf16.xpose.msra.mxu1 %v2655_v47  ;;  %6136 = vmatprep.mubr.msk.bf16.mxu1 %vm6703_vm2, %v6702_v22  ;;  %v2950_v52 = vpop.permute.xlu1 %2949 }
 0x668   : > { %6146 = vmatprep.subr.bf16.mxu1 %v6702_v22  ;;  %v2955_v62 = vsel %vm797_vm3, %v2950_v52, 0 }
 0x66a   : > { %v2800_v49 = vpop.permute.xlu0 %2799 }
 0x66b   : > { %v2805_v51 = vsel %vm797_vm3, %v2800_v49, 0  ;;  %6143 = vmatmul.mubr.msk.bf16.vlgmr.msra.gmra.mrb[68].mxu0 %vm797_vm3, %v2698_v50  ;;  %v2948_v55 = vpop.permute.xlu1 %2947 }
 0x66c   : > { %6153 = vmatpush3.bf16.xpose.msra.mxu0 %v2805_v51  ;;  %6154 = vmatprep.mubr.msk.bf16.mxu0 %vm6703_vm2, %v6702_v22 }
 0x66d   : > { %6164 = vmatprep.subr.bf16.mxu0 %v6702_v22 }
 0x66e   : > { %6137 = vmatmul.mubr.msk.bf16.vlgmr.msra.gmra.mrb[72].mxu1 %vm797_vm3, %v2648_v18  ;;  %v2798_v54 = vpop.permute.xlu0 %2797 }
 0x66f   : > { %6147 = vmatpush3.bf16.xpose.msra.mxu1 %v2755_v53  ;;  %6148 = vmatprep.mubr.msk.bf16.mxu1 %vm6703_vm2, %v6702_v22  ;;  %v3094_v59 = vpop.permute.xlu1 %3093 }
 0x670   : > { %6158 = vmatprep.subr.bf16.mxu1 %v6702_v22  ;;  %v3099_v61 = vsel %vm1288_vm4, %v3094_v59, 0 }
 0x672   : > { %v2900_v56 = vpop.permute.xlu0 %2899 }
 0x673   : > { %v2905_v57 = vsel %vm797_vm3, %v2900_v56, 0  ;;  %6155 = vmatmul.mubr.msk.bf16.vlgmr.msra.gmra.mrb[72].mxu0 %vm797_vm3, %v2798_v54 }
 0x674   : > { %6165 = vmatpush3.bf16.xpose.msra.mxu0 %v2905_v57  ;;  %6166 = vmatprep.mubr.msk.bf16.mxu0 %vm6703_vm2, %v6702_v22 }
 0x675   : > { %6176 = vmatprep.subr.bf16.mxu0 %v6702_v22 }
 0x676   : > { %6149 = vmatmul.mubr.msk.bf16.vlgmr.msra.gmra.mrb[76].mxu1 %vm797_vm3, %v2748_v39  ;;  %v2898_v60 = vpop.permute.xlu0 %2897 }
 0x677   : > { %6159 = vmatpush3.bf16.xpose.msra.mxu1 %v2855_v58  ;;  %6160 = vmatprep.mubr.msk.bf16.mxu1 %vm6703_vm2, %v6702_v22 }
 0x678   : > { %6170 = vmatprep.subr.bf16.mxu1 %v6702_v22 }
 0x67a   : > { %v3142_v63 = vpop.permute.xlu0 %3141 }
 0x67b   : > { %6167 = vmatmul.mubr.msk.bf16.vlgmr.msra.gmra.mrb[76].mxu0 %vm797_vm3, %v2898_v60  ;;  %v3147_v1 = vsel %vm1288_vm4, %v3142_v63, 0 }
 0x67c   : > { %6177 = vmatpush3.bf16.msra.mxu0 %v3099_v61  ;;  %6178 = vmatprep.mubr.msk.bf16.mxu0 %vm6703_vm2, %v6702_v22 }
 0x67d   : > { %6188 = vmatprep.subr.bf16.mxu0 %v6702_v22 }
 0x67e   : > { %6161 = vmatmul.mubr.msk.bf16.vlgmr.msra.gmra.mrb[80].mxu1 %vm797_vm3, %v2848_v48 }
 0x67f   : > { %6171 = vmatpush3.bf16.xpose.msra.mxu1 %v2955_v62  ;;  %6172 = vmatprep.mubr.msk.bf16.mxu1 %vm6703_vm2, %v6702_v22 }
 0x680   : > { %6182 = vmatprep.subr.bf16.mxu1 %v6702_v22 }
 0x686   : > { %6173 = vmatmul.mubr.msk.bf16.vlgmr.msra.gmra.mrb[84].mxu1 %vm797_vm3, %v2948_v55 }
 0x687   : > { %6183 = vmatpush3.bf16.msra.mxu1 %v3147_v1  ;;  %6184 = vmatprep.mubr.msk.bf16.mxu1 %vm6703_vm2, %v6702_v22 }
 0x688   : > { %6194 = vmatprep.subr.bf16.mxu1 %v6702_v22 }
 0x6e9   : > { %v7365_v2 = vpop.f32.mrb[48].mxu0 }
 0x6ea   : > { %v6084_v0 = vpop.f32.mrb[49].mxu0 }
 0x6eb   : > { %v2217_v4 = vpop.f32.mrb[50].mxu0 }
 0x6ec   : > { %v6085_v5 = vpop.f32.mrb[51].mxu0 }
 0x6f1   : > { %v7367_v6 = vpop.f32.mrb[52].mxu0 }
 0x6f2   : > { %v6096_v7 = vpop.f32.mrb[53].mxu0 }
 0x6f3   : > { %v2313_v8 = vpop.f32.mrb[54].mxu0 }
 0x6f4   : > { %v7369_v9 = vpop.f32.mrb[56].mxu1  ;;  %v6097_v13 = vpop.f32.mrb[55].mxu0 }
 0x6f5   : > { %v6090_v11 = vpop.f32.mrb[57].mxu1 }
 0x6f6   : > { %v2265_v14 = vpop.f32.mrb[58].mxu1 }
 0x6f7   : > { %v6091_v15 = vpop.f32.mrb[59].mxu1 }
 0x6f9   : > { %v7371_v3 = vpop.f32.mrb[56].mxu0 }
 0x6fa   : > { %v6108_v10 = vpop.f32.mrb[57].mxu0 }
 0x6fb   : > { %v2409_v12 = vpop.f32.mrb[58].mxu0 }
 0x6fc   : > { %v7373_v16 = vpop.f32.mrb[60].mxu1  ;;  %v6109_v17 = vpop.f32.mrb[59].mxu0 }
 0x6fd   : > { %v6102_v19 = vpop.f32.mrb[61].mxu1 }
 0x6fe   : > { %v2361_v20 = vpop.f32.mrb[62].mxu1 }
 0x6ff   : > { %v6103_v21 = vpop.f32.mrb[63].mxu1 }
 0x704   : > { %v7375_v23 = vpop.f32.mrb[64].mxu1 }
 0x705   : > { %v6114_v18 = vpop.f32.mrb[65].mxu1 }
 0x706   : > { %v2457_v24 = vpop.f32.mrb[66].mxu1 }
 0x707   : > { %v6115_v26 = vpop.f32.mrb[67].mxu1 }
 0x72e   : > { %v7377_v27 = vpop.f32.mrb[60].mxu0 }
 0x72f   : > { %v6120_v29 = vpop.f32.mrb[61].mxu0 }
 0x730   : > { %v2505_v30 = vpop.f32.mrb[62].mxu0  ;;  %v7396_v29 = vpop.permute.xlu1 %3189 }
 0x731   : > { %v6121_v31 = vpop.f32.mrb[63].mxu0 }
 0x736   : > { %v2641_v32 = vpop.f32.mrb[64].mxu0 }
 0x737   : > { %v6132_v39 = vpop.f32.mrb[65].mxu0  ;;  %v2997_v40 = vsel %vm797_vm3, %v2641_v32, -inf }
 0x738   : > { %2998 = vmax.xlane.f32.xlu0 %v2997_v40  ;;  %v2644_v41 = vpop.f32.mrb[66].mxu0  ;;  %v7398_v39 = vpop.permute.xlu1 %3237 }
 0x739   : > { %v7380_v42 = vpop.f32.mrb[68].mxu1  ;;  %v6133_v43 = vpop.f32.mrb[67].mxu0 }
 0x73a   : > { %v6126_v44 = vpop.f32.mrb[69].mxu1 }
 0x73b   : > { %v2553_v45 = vpop.f32.mrb[70].mxu1 }
 0x73c   : > { %v6127_v46 = vpop.f32.mrb[71].mxu1 }
 0x73e   : > { %v2741_v47 = vpop.f32.mrb[68].mxu0 }
 0x73f   : > { %v6144_v48 = vpop.f32.mrb[69].mxu0  ;;  %v3003_v50 = vsel %vm797_vm3, %v2741_v47, -inf }
 0x740   : > { %3004 = vmax.xlane.f32.xlu0 %v3003_v50  ;;  %v2744_v49 = vpop.f32.mrb[70].mxu0 }
 0x741   : > { %v2691_v51 = vpop.f32.mrb[72].mxu1  ;;  %v6145_v52 = vpop.f32.mrb[71].mxu0 }
 0x742   : > { %v6138_v53 = vpop.f32.mrb[73].mxu1  ;;  %v3000_v54 = vsel %vm797_vm3, %v2691_v51, -inf }
 0x743   : > { %3001 = vmax.xlane.f32.xlu1 %v3000_v54  ;;  %v2694_v55 = vpop.f32.mrb[74].mxu1 }
 0x744   : > { %v6139_v56 = vpop.f32.mrb[75].mxu1 }
 0x746   : > { %v2841_v57 = vpop.f32.mrb[72].mxu0 }
 0x747   : > { %v6156_v58 = vpop.f32.mrb[73].mxu0  ;;  %v3009_v59 = vsel %vm797_vm3, %v2841_v57, -inf }
 0x748   : > { %3010 = vmax.xlane.f32.xlu1 %v3009_v59  ;;  %v2844_v60 = vpop.f32.mrb[74].mxu0 }
 0x749   : > { %v2791_v61 = vpop.f32.mrb[76].mxu1  ;;  %v6157_v62 = vpop.f32.mrb[75].mxu0 }
 0x74a   : > { %v6150_v63 = vpop.f32.mrb[77].mxu1  ;;  %v3006_v1 = vsel %vm797_vm3, %v2791_v61, -inf }
 0x74b   : > { %v2794_v0 = vpop.f32.mrb[78].mxu1  ;;  %3007 = vmax.xlane.f32.xlu0 %v3006_v1 }
 0x74c   : > { %v6151_v4 = vpop.f32.mrb[79].mxu1 }
 0x74e   : > { %v7386_v5 = vpop.f32.mrb[76].mxu0 }
 0x74f   : > { %v6168_v7 = vpop.f32.mrb[77].mxu0  ;;  %v3015_v8 = vsel %vm797_vm3, %v7386_v5, -inf }
 0x750   : > { %3016 = vmax.xlane.f32.xlu1 %v3015_v8  ;;  %v2944_v13 = vpop.f32.mrb[78].mxu0 }
 0x751   : > { %v2891_v11 = vpop.f32.mrb[80].mxu1  ;;  %v6169_v14 = vpop.f32.mrb[79].mxu0 }
 0x752   : > { %v6162_v15 = vpop.f32.mrb[81].mxu1  ;;  %v3012_v10 = vsel %vm797_vm3, %v2891_v11, -inf }
 0x753   : > { %v2894_v12 = vpop.f32.mrb[82].mxu1  ;;  %3013 = vmax.xlane.f32.xlu0 %v3012_v10 }
 0x754   : > { %v6163_v17 = vpop.f32.mrb[83].mxu1 }
 0x759   : > { %v2991_v19 = vpop.f32.mrb[84].mxu1 }
 0x75a   : > { %v6174_v20 = vpop.f32.mrb[85].mxu1  ;;  %v3018_v21 = vsel %vm797_vm3, %v2991_v19, -inf }
 0x75b   : > { %v2994_v18 = vpop.f32.mrb[86].mxu1  ;;  %3019 = vmax.xlane.f32.xlu0 %v3018_v21 }
 0x75c   : > { %v6175_v24 = vpop.f32.mrb[87].mxu1 }
 0x761   : > { %3333 = vrot.lane.b32.xlu1 %v6918_v35, %s6711_s29 }
 0x771   : > { %3285 = vrot.lane.b32.xlu0 %v6921_v36, %s6711_s29 }
 0x7c5   : > { %v2999_v26 = vpop.xlane.xlu0 %2998 }
 0x7c6   : > { %v3021_v30 = vsub.f32 %v2641_v32, %v2999_v26 }
 0x7c8   : > { %v3029_v31 = vmul.f32 1.442695, %v3021_v30 }
 0x7ca   : > { %6494 = vpow2.f32 %v3029_v31  ;;  %v3195_v31 = vsel %vm1288_vm4, %v7396_v29, 0 }
 0x7cd   : > { %v3005_v40 = vpop.xlane.xlu0 %3004 }
 0x7ce   : > { %v3023_v41 = vsub.f32 %v2741_v47, %v3005_v40 }
 0x7d0   : > { %v3033_v43 = vmul.f32 1.442695, %v3023_v41  ;;  %v3002_v44 = vpop.xlane.xlu1 %3001 }
 0x7d1   : > { %v3022_v45 = vsub.f32 %v2691_v51, %v3002_v44 }
 0x7d2   : > { %6496 = vpow2.f32 %v3033_v43 }
 0x7d3   : > { %v3031_v46 = vmul.f32 1.442695, %v3022_v45 }
 0x7d4   : > { %v7400_v48 = vpop.eup %6494 }
 0x7d5   : > { %6498 = vpow2.f32 %v3031_v46  ;;  %v3011_v50 = vpop.xlane.xlu1 %3010  ;;  %v3045_v49 = vsel %vm797_vm3, %v7400_v48, 0.0 }
 0x7d6   : > { %v3025_v52 = vsub.f32 %v2841_v57, %v3011_v50  ;;  %3046 = vadd.xlane.f32.xlu1 %v3045_v49 }
 0x7d8   : > { %v3037_v32 = vmul.f32 1.442695, %v3025_v52  ;;  %v3008_v53 = vpop.xlane.xlu0 %3007  ;;  %v3243_v52 = vsel %vm1288_vm4, %v7398_v39, 0 }
 0x7d9   : > { %v3024_v54 = vsub.f32 %v2791_v61, %v3008_v53 }
 0x7da   : > { %6500 = vpow2.f32 %v3037_v32 }
 0x7db   : > { %v3035_v55 = vmul.f32 1.442695, %v3024_v54 }
 0x7dc   : > { %v7404_v47 = vpop.eup %6496 }
 0x7dd   : > { %6502 = vpow2.f32 %v3035_v55  ;;  %v3051_v51 = vsel %vm797_vm3, %v7404_v47, 0.0  ;;  %v3017_v7 = vpop.xlane.xlu1 %3016 }
 0x7de   : > { %3052 = vadd.xlane.f32.xlu1 %v3051_v51  ;;  %v3027_v8 = vsub.f32 %v7386_v5, %v3017_v7 }
 0x7df   : > { %v7408_v56 = vpop.eup %6498 }
 0x7e0   : > { %v3014_v58 = vpop.xlane.xlu0 %3013  ;;  %v3048_v59 = vsel %vm797_vm3, %v7408_v56, 0.0  ;;  %v3041_v13 = vmul.f32 1.442695, %v3027_v8 }
 0x7e1   : > { %v3026_v57 = vsub.f32 %v2891_v11, %v3014_v58  ;;  %3049 = vadd.xlane.f32.xlu0 %v3048_v59 }
 0x7e3   : > { %v3039_v60 = vmul.f32 1.442695, %v3026_v57 }
 0x7e4   : > { %v7412_v62 = vpop.eup %6500 }
 0x7e5   : > { %6504 = vpow2.f32 %v3039_v60  ;;  %v3057_v61 = vsel %vm797_vm3, %v7412_v62, 0.0 }
 0x7e6   : > { %3058 = vadd.xlane.f32.xlu1 %v3057_v61  ;;  %6506 = vpow2.f32 %v3041_v13 }
 0x7e7   : > { %v7416_v63 = vpop.eup %6502 }
 0x7e8   : > { %v3054_v1 = vsel %vm797_vm3, %v7416_v63, 0.0  ;;  %v3020_v11 = vpop.xlane.xlu0 %3019 }
 0x7e9   : > { %3055 = vadd.xlane.f32.xlu0 %v3054_v1  ;;  %v3028_v14 = vsub.f32 %v2991_v19, %v3020_v11  ;;  %v3334_v19 = vpop.permute.xlu1 %3333 }
 0x7ea   : > { %v3339_v58 = vsel %vm1288_vm4, %v3334_v19, 0 }
 0x7eb   : > { %v3043_v15 = vmul.f32 1.442695, %v3028_v14 }
 0x7ec   : > { %v3286_v21 = vpop.permute.xlu0 %3285 }
 0x7ed   : > { %6508 = vpow2.f32 %v3043_v15  ;;  %v3291_v29 = vsel %vm1288_vm4, %v3286_v21, 0 }
 0x7ef   : > { %v7420_v0 = vpop.eup %6504 }
 0x7f0   : > { %v3060_v4 = vsel %vm797_vm3, %v7420_v0, 0.0  ;;  %v7429_v10 = vpop.eup %6506 }
 0x7f1   : > { %3061 = vadd.xlane.f32.xlu0 %v3060_v4  ;;  %v3063_v12 = vsel %vm797_vm3, %v7429_v10, 0.0 }
 0x7f7   : > { %3429 = vrot.lane.b32.xlu1 %v6923_v37, %s6711_s29  ;;  %v7433_v17 = vpop.eup %6508 }
 0x7f8   : > { %v3066_v5 = vsel %vm797_vm3, %v7433_v17, 0.0 }
 0x807   : > { %3381 = vrot.lane.b32.xlu0 %v6926_v38, %s6711_s29 }
 0x81b   : > { %3064 = vadd.xlane.f32.xlu1 %v3063_v12 }
 0x826   : > { %3067 = vadd.xlane.f32.xlu0 %v3066_v5 }
 0x82c   : > { %3570 = vrot.lane.b32.xlu1 %v6915_v34, %s6712_s24 }
 0x830   : > { %3568 = vrot.lane.b32.xlu1 %v6915_v34, %s6713_s20 }
 0x834   : > { %3670 = vrot.lane.b32.xlu1 %v6913_v33, %s6712_s24 }
 0x838   : > { %3668 = vrot.lane.b32.xlu1 %v6913_v33, %s6713_s20 }
 0x83c   : > { %3770 = vrot.lane.b32.xlu1 %v6918_v35, %s6712_s24  ;;  %3520 = vrot.lane.b32.xlu0 %v6909_v28, %s6712_s24 }
 0x840   : > { %3768 = vrot.lane.b32.xlu1 %v6918_v35, %s6713_s20  ;;  %3518 = vrot.lane.b32.xlu0 %v6909_v28, %s6713_s20 }
 0x844   : > { %3870 = vrot.lane.b32.xlu1 %v6923_v37, %s6712_s24  ;;  %3620 = vrot.lane.b32.xlu0 %v6907_v25, %s6712_s24 }
 0x848   : > { %3868 = vrot.lane.b32.xlu1 %v6923_v37, %s6713_s20  ;;  %3618 = vrot.lane.b32.xlu0 %v6907_v25, %s6713_s20 }
 0x84c   : > { %4014 = vrot.lane.b32.xlu1 %v6909_v28, %s6714_s22  ;;  %3720 = vrot.lane.b32.xlu0 %v6921_v36, %s6712_s24 }
 0x850   : > { %3718 = vrot.lane.b32.xlu0 %v6921_v36, %s6713_s20 }
 0x854   : > { %3820 = vrot.lane.b32.xlu0 %v6926_v38, %s6712_s24  ;;  %s8149_s24 = scalar_lea.vmem %s8117_s7, %s6831_s21 }
 0x858   : > { %3818 = vrot.lane.b32.xlu0 %v6926_v38, %s6713_s20 }
 0x863   : > { %v3047_v20 = vpop.xlane.xlu1 %3046 }
 0x864   : > { %6510 = vrcp.f32 %v3047_v20 }
 0x86b   : > { %v3053_v18 = vpop.xlane.xlu1 %3052 }
 0x86c   : > { %6512 = vrcp.f32 %v3053_v18 }
 0x86e   : > { %v6511_v24 = vpop.eup %6510  ;;  %v3050_v26 = vpop.xlane.xlu0 %3049 }
 0x86f   : > { %6514 = vrcp.f32 %v3050_v26  ;;  %v3077_v30 = vmul.f32 %v6511_v24, %v7400_v48 }
 0x871   : > { %v3085_v28 = vpack.c.bf16 %v3077_v30, %v3077_v30 }
 0x873   : > { %6179 = vmatmul.mubr.msk.bf16.vlgmr.msra.gmra.mrb[80].mxu0 %vm797_vm3, %v3085_v28  ;;  %v3059_v40 = vpop.xlane.xlu1 %3058 }
 0x874   : > { %6189 = vmatpush3.bf16.msra.mxu0 %v3195_v31  ;;  %6516 = vrcp.f32 %v3059_v40  ;;  %6190 = vmatprep.mubr.msk.bf16.mxu0 %vm6703_vm2, %v6702_v22 }
 0x875   : > { %6200 = vmatprep.subr.bf16.mxu0 %v6702_v22 }
 0x876   : > { %v6513_v41 = vpop.eup %6512  ;;  %v3056_v43 = vpop.xlane.xlu0 %3055 }
 0x877   : > { %6518 = vrcp.f32 %v3056_v43  ;;  %v3079_v44 = vmul.f32 %v6513_v41, %v7404_v47  ;;  %v3430_v60 = vpop.permute.xlu1 %3429 }
 0x878   : > { %v3435_v61 = vsel %vm1288_vm4, %v3430_v60, 0 }
 0x879   : > { %v6515_v45 = vpop.eup %6514  ;;  %v3087_v46 = vpack.c.bf16 %v3079_v44, %v3079_v44 }
 0x87a   : > { %v3078_v48 = vmul.f32 %v6515_v45, %v7408_v56 }
 0x87b   : > { %6191 = vmatmul.mubr.msk.bf16.vlgmr.msra.gmra.mrb[84].mxu0 %vm797_vm3, %v3087_v46 }
 0x87c   : > { %6201 = vmatpush3.bf16.msra.mxu0 %v3291_v29  ;;  %v3086_v50 = vpack.c.bf16 %v3078_v48, %v3078_v48  ;;  %6202 = vmatprep.mubr.msk.bf16.mxu0 %vm6703_vm2, %v6702_v22 }
 0x87d   : > { %6212 = vmatprep.subr.bf16.mxu0 %v6702_v22 }
 0x87e   : > { %v6517_v49 = vpop.eup %6516  ;;  %6185 = vmatmul.mubr.msk.bf16.vlgmr.msra.gmra.mrb[88].mxu1 %vm797_vm3, %v3086_v50  ;;  %v3062_v32 = vpop.xlane.xlu0 %3061 }
 0x87f   : > { %6195 = vmatpush3.bf16.msra.mxu1 %v3243_v52  ;;  %6520 = vrcp.f32 %v3062_v32  ;;  %v3081_v53 = vmul.f32 %v6517_v49, %v7412_v62  ;;  %6196 = vmatprep.mubr.msk.bf16.mxu1 %vm6703_vm2, %v6702_v22 }
 0x880   : > { %6206 = vmatprep.subr.bf16.mxu1 %v6702_v22 }
 0x881   : > { %v6519_v54 = vpop.eup %6518  ;;  %v3089_v55 = vpack.c.bf16 %v3081_v53, %v3081_v53 }
 0x882   : > { %v3382_v47 = vpop.permute.xlu0 %3381  ;;  %v3080_v51 = vmul.f32 %v6519_v54, %v7416_v63 }
 0x883   : > { %v3387_v56 = vsel %vm1288_vm4, %v3382_v47, 0  ;;  %6203 = vmatmul.mubr.msk.bf16.vlgmr.msra.gmra.mrb[88].mxu0 %vm797_vm3, %v3089_v55 }
 0x884   : > { %6213 = vmatpush3.bf16.msra.mxu0 %v3387_v56  ;;  %v3088_v39 = vpack.c.bf16 %v3080_v51, %v3080_v51  ;;  %6214 = vmatprep.mubr.msk.bf16.mxu0 %vm6703_vm2, %v6702_v22 }
 0x885   : > { %6224 = vmatprep.subr.bf16.mxu0 %v6702_v22 }
 0x886   : > { %6197 = vmatmul.mubr.msk.bf16.vlgmr.msra.gmra.mrb[92].mxu1 %vm797_vm3, %v3088_v39 }
 0x887   : > { %6207 = vmatpush3.bf16.msra.mxu1 %v3339_v58  ;;  %6208 = vmatprep.mubr.msk.bf16.mxu1 %vm6703_vm2, %v6702_v22 }
 0x888   : > { %6218 = vmatprep.subr.bf16.mxu1 %v6702_v22 }
 0x889   : > { %v6521_v59 = vpop.eup %6520 }
 0x88a   : > { %v3082_v57 = vmul.f32 %v6521_v59, %v7420_v0 }
 0x88c   : > { %v3090_v62 = vpack.c.bf16 %v3082_v57, %v3082_v57 }
 0x88e   : > { %6209 = vmatmul.mubr.msk.bf16.vlgmr.msra.gmra.mrb[96].mxu1 %vm797_vm3, %v3090_v62 }
 0x88f   : > { %6219 = vmatpush3.bf16.msra.mxu1 %v3435_v61  ;;  %6220 = vmatprep.mubr.msk.bf16.mxu1 %vm6703_vm2, %v6702_v22 }
 0x890   : > { %6230 = vmatprep.subr.bf16.mxu1 %v6702_v22 }
 0x8a8   : > { %v3065_v63 = vpop.xlane.xlu1 %3064 }
 0x8a9   : > { %6522 = vrcp.f32 %v3065_v63 }
 0x8ac   : > { %v3571_v1 = vpop.permute.xlu1 %3570 }
 0x8ad   : > { %v3576_v26 = vsel %vm797_vm3, %v3571_v1, 0 }
 0x8b0   : > { %v3569_v4 = vpop.permute.xlu1 %3568 }
 0x8b3   : > { %v6523_v7 = vpop.eup %6522  ;;  %v3068_v8 = vpop.xlane.xlu0 %3067 }
 0x8b4   : > { %v3083_v0 = vmul.f32 %v6523_v7, %v7429_v10  ;;  %6524 = vrcp.f32 %v3068_v8  ;;  %v3671_v13 = vpop.permute.xlu1 %3670 }
 0x8b5   : > { %v3676_v41 = vsel %vm797_vm3, %v3671_v13, 0 }
 0x8b6   : > { %v3091_v11 = vpack.c.bf16 %v3083_v0, %v3083_v0 }
 0x8b7   : > { %v3521_v14 = vpop.permute.xlu0 %3520 }
 0x8b8   : > { %v3526_v15 = vsel %vm797_vm3, %v3521_v14, 0  ;;  %v3669_v12 = vpop.permute.xlu1 %3668  ;;  %6215 = vmatmul.mubr.msk.bf16.vlgmr.msra.gmra.mrb[92].mxu0 %vm797_vm3, %v3091_v11 }
 0x8b9   : > { %6225 = vmatpush3.bf16.xpose.msra.mxu0 %v3526_v15  ;;  %6226 = vmatprep.mubr.msk.bf16.mxu0 %vm6703_vm2, %v6702_v22 }
 0x8ba   : > { %6236 = vmatprep.subr.bf16.mxu0 %v6702_v22 }
 0x8bb   : > { %v3519_v5 = vpop.permute.xlu0 %3518 }
 0x8bc   : > { %v3771_v19 = vpop.permute.xlu1 %3770 }
 0x8bd   : > { %v3776_v48 = vsel %vm797_vm3, %v3771_v19, 0 }
 0x8be   : > { %v6525_v20 = vpop.eup %6524 }
 0x8bf   : > { %v3621_v21 = vpop.permute.xlu0 %3620  ;;  %v3084_v10 = vmul.f32 %v6525_v20, %v7433_v17 }
 0x8c0   : > { %v3626_v18 = vsel %vm797_vm3, %v3621_v21, 0  ;;  %6227 = vmatmul.mubr.msk.bf16.vlgmr.msra.gmra.mrb[96].mxu0 %vm797_vm3, %v3519_v5  ;;  %v3769_v30 = vpop.permute.xlu1 %3768 }
 0x8c1   : > { %6237 = vmatpush3.bf16.xpose.msra.mxu0 %v3626_v18  ;;  %v3092_v24 = vpack.c.bf16 %v3084_v10, %v3084_v10  ;;  %6238 = vmatprep.mubr.msk.bf16.mxu0 %vm6703_vm2, %v6702_v22 }
 0x8c2   : > { %6248 = vmatprep.subr.bf16.mxu0 %v6702_v22 }
 0x8c3   : > { %6221 = vmatmul.mubr.msk.bf16.vlgmr.msra.gmra.mrb[100].mxu1 %vm797_vm3, %v3092_v24  ;;  %v3619_v28 = vpop.permute.xlu0 %3618 }
 0x8c4   : > { %6231 = vmatpush3.bf16.xpose.msra.mxu1 %v3576_v26  ;;  %6232 = vmatprep.mubr.msk.bf16.mxu1 %vm6703_vm2, %v6702_v22  ;;  %v3871_v40 = vpop.permute.xlu1 %3870 }
 0x8c5   : > { %6242 = vmatprep.subr.bf16.mxu1 %v6702_v22  ;;  %v3876_v52 = vsel %vm797_vm3, %v3871_v40, 0 }
 0x8c7   : > { %v3721_v17 = vpop.permute.xlu0 %3720 }
 0x8c8   : > { %v3726_v31 = vsel %vm797_vm3, %v3721_v17, 0  ;;  %6239 = vmatmul.mubr.msk.bf16.vlgmr.msra.gmra.mrb[100].mxu0 %vm797_vm3, %v3619_v28  ;;  %v3869_v44 = vpop.permute.xlu1 %3868 }
 0x8c9   : > { %6249 = vmatpush3.bf16.xpose.msra.mxu0 %v3726_v31  ;;  %6250 = vmatprep.mubr.msk.bf16.mxu0 %vm6703_vm2, %v6702_v22 }
 0x8ca   : > { %6260 = vmatprep.subr.bf16.mxu0 %v6702_v22 }
 0x8cb   : > { %6233 = vmatmul.mubr.msk.bf16.vlgmr.msra.gmra.mrb[104].mxu1 %vm797_vm3, %v3569_v4  ;;  %v3719_v43 = vpop.permute.xlu0 %3718 }
 0x8cc   : > { %6243 = vmatpush3.bf16.xpose.msra.mxu1 %v3676_v41  ;;  %6244 = vmatprep.mubr.msk.bf16.mxu1 %vm6703_vm2, %v6702_v22  ;;  %v4015_v29 = vpop.permute.xlu1 %4014 }
 0x8cd   : > { %6254 = vmatprep.subr.bf16.mxu1 %v6702_v22  ;;  %v4020_v49 = vsel %vm1288_vm4, %v4015_v29, 0 }
 0x8cf   : > { %v3821_v45 = vpop.permute.xlu0 %3820 }
 0x8d0   : > { %v3826_v46 = vsel %vm797_vm3, %v3821_v45, 0  ;;  %6251 = vmatmul.mubr.msk.bf16.vlgmr.msra.gmra.mrb[104].mxu0 %vm797_vm3, %v3719_v43 }
 0x8d1   : > { %6261 = vmatpush3.bf16.xpose.msra.mxu0 %v3826_v46  ;;  %6262 = vmatprep.mubr.msk.bf16.mxu0 %vm6703_vm2, %v6702_v22 }
 0x8d2   : > { %6272 = vmatprep.subr.bf16.mxu0 %v6702_v22 }
 0x8d3   : > { %6245 = vmatmul.mubr.msk.bf16.vlgmr.msra.gmra.mrb[108].mxu1 %vm797_vm3, %v3669_v12  ;;  %v3819_v50 = vpop.permute.xlu0 %3818 }
 0x8d4   : > { %6255 = vmatpush3.bf16.xpose.msra.mxu1 %v3776_v48  ;;  %6256 = vmatprep.mubr.msk.bf16.mxu1 %vm6703_vm2, %v6702_v22 }
 0x8d5   : > { %6266 = vmatprep.subr.bf16.mxu1 %v6702_v22 }
 0x8d8   : > { %6263 = vmatmul.mubr.msk.bf16.vlgmr.msra.gmra.mrb[108].mxu0 %vm797_vm3, %v3819_v50 }
 0x8d9   : > { %6273 = vmatpush3.bf16.msra.mxu0 %v4020_v49  ;;  %6274 = vmatprep.mubr.msk.bf16.mxu0 %vm6703_vm2, %v6702_v22 }
 0x8da   : > { %6284 = vmatprep.subr.bf16.mxu0 %v6702_v22 }
 0x8db   : > { %6257 = vmatmul.mubr.msk.bf16.vlgmr.msra.gmra.mrb[112].mxu1 %vm797_vm3, %v3769_v30 }
 0x8dc   : > { %6267 = vmatpush3.bf16.xpose.msra.mxu1 %v3876_v52  ;;  %6268 = vmatprep.mubr.msk.bf16.mxu1 %vm6703_vm2, %v6702_v22 }
 0x8dd   : > { %6278 = vmatprep.subr.bf16.mxu1 %v6702_v22 }
 0x8e3   : > { %6269 = vmatmul.mubr.msk.bf16.vlgmr.msra.gmra.mrb[116].mxu1 %vm797_vm3, %v3869_v44 }
 0x8e4   : > { %6280 = vmatprep.mubr.msk.bf16.mxu1 %vm6703_vm2, %v6702_v22 }
 0x946   : > { %v7543_v32 = vpop.f32.mrb[80].mxu0 }
 0x947   : > { %v6180_v53 = vpop.f32.mrb[81].mxu0 }
 0x948   : > { %v3138_v54 = vpop.f32.mrb[82].mxu0 }
 0x949   : > { %v6181_v55 = vpop.f32.mrb[83].mxu0 }
 0x94e   : > { %v7545_v47 = vpop.f32.mrb[84].mxu0 }
 0x94f   : > { %v6192_v51 = vpop.f32.mrb[85].mxu0 }
 0x950   : > { %v3234_v56 = vpop.f32.mrb[86].mxu0 }
 0x951   : > { %v7547_v39 = vpop.f32.mrb[88].mxu1  ;;  %v6193_v58 = vpop.f32.mrb[87].mxu0 }
 0x952   : > { %v6186_v59 = vpop.f32.mrb[89].mxu1 }
 0x953   : > { %v3186_v57 = vpop.f32.mrb[90].mxu1 }
 0x954   : > { %v6187_v60 = vpop.f32.mrb[91].mxu1 }
 0x956   : > { %v7549_v62 = vpop.f32.mrb[88].mxu0 }
 0x957   : > { %v6204_v61 = vpop.f32.mrb[89].mxu0 }
 0x958   : > { %v3330_v63 = vpop.f32.mrb[90].mxu0 }
 0x959   : > { %v7551_v1 = vpop.f32.mrb[92].mxu1  ;;  %v6205_v4 = vpop.f32.mrb[91].mxu0 }
 0x95a   : > { %v6198_v7 = vpop.f32.mrb[93].mxu1 }
 0x95b   : > { %v3282_v8 = vpop.f32.mrb[94].mxu1 }
 0x95c   : > { %v6199_v0 = vpop.f32.mrb[95].mxu1 }
 0x961   : > { %v7553_v13 = vpop.f32.mrb[96].mxu1 }
 0x962   : > { %v6210_v11 = vpop.f32.mrb[97].mxu1 }
 0x963   : > { %v3378_v14 = vpop.f32.mrb[98].mxu1 }
 0x964   : > { %v6211_v15 = vpop.f32.mrb[99].mxu1 }
 0x98b   : > { %v7555_v12 = vpop.f32.mrb[92].mxu0 }
 0x98c   : > { %v6216_v5 = vpop.f32.mrb[93].mxu0 }
 0x98d   : > { %v3426_v19 = vpop.f32.mrb[94].mxu0 }
 0x98e   : > { %v6217_v20 = vpop.f32.mrb[95].mxu0 }
 0x993   : > { %v3562_v21 = vpop.f32.mrb[96].mxu0 }
 0x994   : > { %v6228_v10 = vpop.f32.mrb[97].mxu0  ;;  %v3918_v18 = vsel %vm797_vm3, %v3562_v21, -inf }
 0x995   : > { %3919 = vmax.xlane.f32.xlu0 %v3918_v18  ;;  %v3565_v24 = vpop.f32.mrb[98].mxu0 }
 0x996   : > { %v7558_v26 = vpop.f32.mrb[100].mxu1  ;;  %v6229_v30 = vpop.f32.mrb[99].mxu0 }
 0x997   : > { %v6222_v28 = vpop.f32.mrb[101].mxu1 }
 0x998   : > { %v3474_v17 = vpop.f32.mrb[102].mxu1 }
 0x999   : > { %v6223_v31 = vpop.f32.mrb[103].mxu1 }
 0x99b   : > { %v3662_v40 = vpop.f32.mrb[100].mxu0 }
 0x99c   : > { %v6240_v41 = vpop.f32.mrb[101].mxu0  ;;  %v3924_v43 = vsel %vm797_vm3, %v3662_v40, -inf }
 0x99d   : > { %3925 = vmax.xlane.f32.xlu0 %v3924_v43  ;;  %v3665_v44 = vpop.f32.mrb[102].mxu0 }
 0x99e   : > { %v3612_v45 = vpop.f32.mrb[104].mxu1  ;;  %v6241_v46 = vpop.f32.mrb[103].mxu0 }
 0x99f   : > { %v6234_v48 = vpop.f32.mrb[105].mxu1  ;;  %v3921_v29 = vsel %vm797_vm3, %v3612_v45, -inf }
 0x9a0   : > { %3922 = vmax.xlane.f32.xlu1 %v3921_v29  ;;  %v3615_v50 = vpop.f32.mrb[106].mxu1 }
 0x9a1   : > { %v6235_v49 = vpop.f32.mrb[107].mxu1 }
 0x9a3   : > { %v7562_v52 = vpop.f32.mrb[104].mxu0 }
 0x9a4   : > { %v6252_v53 = vpop.f32.mrb[105].mxu0  ;;  %v3930_v54 = vsel %vm797_vm3, %v7562_v52, -inf }
 0x9a5   : > { %3931 = vmax.xlane.f32.xlu1 %v3930_v54  ;;  %v3765_v55 = vpop.f32.mrb[106].mxu0 }
 0x9a6   : > { %v3712_v51 = vpop.f32.mrb[108].mxu1  ;;  %v6253_v56 = vpop.f32.mrb[107].mxu0 }
 0x9a7   : > { %v6246_v58 = vpop.f32.mrb[109].mxu1  ;;  %v3927_v59 = vsel %vm797_vm3, %v3712_v51, -inf }
 0x9a8   : > { %v3715_v57 = vpop.f32.mrb[110].mxu1  ;;  %3928 = vmax.xlane.f32.xlu0 %v3927_v59 }
 0x9a9   : > { %v6247_v60 = vpop.f32.mrb[111].mxu1 }
 0x9ab   : > { %v7567_v61 = vpop.f32.mrb[108].mxu0 }
 0x9ac   : > { %v6264_v63 = vpop.f32.mrb[109].mxu0  ;;  %v3936_v4 = vsel %vm797_vm3, %v7567_v61, -inf }
 0x9ad   : > { %3937 = vmax.xlane.f32.xlu1 %v3936_v4  ;;  %v3865_v7 = vpop.f32.mrb[110].mxu0 }
 0x9ae   : > { %v3812_v8 = vpop.f32.mrb[112].mxu1  ;;  %v6265_v0 = vpop.f32.mrb[111].mxu0 }
 0x9af   : > { %v6258_v11 = vpop.f32.mrb[113].mxu1  ;;  %v3933_v14 = vsel %vm797_vm3, %v3812_v8, -inf }
 0x9b0   : > { %v3815_v15 = vpop.f32.mrb[114].mxu1  ;;  %3934 = vmax.xlane.f32.xlu0 %v3933_v14 }
 0x9b1   : > { %v6259_v5 = vpop.f32.mrb[115].mxu1 }
 0x9b6   : > { %v3912_v19 = vpop.f32.mrb[116].mxu1 }
 0x9b7   : > { %v6270_v20 = vpop.f32.mrb[117].mxu1  ;;  %v3939_v10 = vsel %vm797_vm3, %v3912_v19, -inf }
 0x9b8   : > { %v3915_v18 = vpop.f32.mrb[118].mxu1  ;;  %3940 = vmax.xlane.f32.xlu0 %v3939_v10 }
 0x9b9   : > { %v6271_v24 = vpop.f32.mrb[119].mxu1 }
 0x9be   : > { %4110 = vrot.lane.b32.xlu1 %v6907_v25, %s6714_s22 }
 0x9c2   : > { %4158 = vrot.lane.b32.xlu1 %v6913_v33, %s6714_s22 }
 0x9ce   : > { %4062 = vrot.lane.b32.xlu0 %v6915_v34, %s6714_s22 }
 0xa22   : > { %v3920_v30 = vpop.xlane.xlu0 %3919 }
 0xa23   : > { %v3942_v28 = vsub.f32 %v3562_v21, %v3920_v30 }
 0xa25   : > { %v3950_v17 = vmul.f32 1.442695, %v3942_v28 }
 0xa27   : > { %6526 = vpow2.f32 %v3950_v17 }
 0xa2a   : > { %v3926_v31 = vpop.xlane.xlu0 %3925 }
 0xa2b   : > { %v3944_v41 = vsub.f32 %v3662_v40, %v3926_v31 }
 0xa2d   : > { %v3954_v43 = vmul.f32 1.442695, %v3944_v41  ;;  %v3923_v44 = vpop.xlane.xlu1 %3922 }
 0xa2e   : > { %v3943_v46 = vsub.f32 %v3612_v45, %v3923_v44 }
 0xa2f   : > { %6528 = vpow2.f32 %v3954_v43 }
 0xa30   : > { %v3952_v48 = vmul.f32 1.442695, %v3943_v46 }
 0xa31   : > { %v7579_v29 = vpop.eup %6526 }
 0xa32   : > { %6530 = vpow2.f32 %v3952_v48  ;;  %v3966_v25 = vsel %vm797_vm3, %v7579_v29, 0.0  ;;  %v3932_v59 = vpop.xlane.xlu1 %3931 }
 0xa33   : > { %3967 = vadd.xlane.f32.xlu1 %v3966_v25  ;;  %v3946_v57 = vsub.f32 %v7562_v52, %v3932_v59 }
 0xa35   : > { %v3929_v33 = vpop.xlane.xlu0 %3928  ;;  %v3958_v63 = vmul.f32 1.442695, %v3946_v57 }
 0xa36   : > { %v3945_v34 = vsub.f32 %v3712_v51, %v3929_v33 }
 0xa38   : > { %v3956_v50 = vmul.f32 1.442695, %v3945_v34 }
 0xa39   : > { %v7583_v21 = vpop.eup %6528 }
 0xa3a   : > { %6532 = vpow2.f32 %v3956_v50  ;;  %v3972_v40 = vsel %vm797_vm3, %v7583_v21, 0.0  ;;  %v3938_v60 = vpop.xlane.xlu1 %3937 }
 0xa3b   : > { %3973 = vadd.xlane.f32.xlu1 %v3972_v40  ;;  %v3948_v4 = vsub.f32 %v7567_v61, %v3938_v60  ;;  %6534 = vpow2.f32 %v3958_v63 }
 0xa3c   : > { %v7587_v45 = vpop.eup %6530 }
 0xa3d   : > { %v3969_v49 = vsel %vm797_vm3, %v7587_v45, 0.0  ;;  %v3935_v53 = vpop.xlane.xlu0 %3934  ;;  %v3962_v7 = vmul.f32 1.442695, %v3948_v4 }
 0xa3e   : > { %3970 = vadd.xlane.f32.xlu0 %v3969_v49  ;;  %v3947_v0 = vsub.f32 %v3812_v8, %v3935_v53 }
 0xa3f   : > { %6536 = vpow2.f32 %v3962_v7 }
 0xa40   : > { %v3960_v11 = vmul.f32 1.442695, %v3947_v0 }
 0xa42   : > { %6538 = vpow2.f32 %v3960_v11 }
 0xa44   : > { %v7591_v54 = vpop.eup %6532 }
 0xa45   : > { %v3941_v55 = vpop.xlane.xlu0 %3940  ;;  %v3975_v51 = vsel %vm797_vm3, %v7591_v54, 0.0  ;;  %v7603_v15 = vpop.eup %6534 }
 0xa46   : > { %3976 = vadd.xlane.f32.xlu0 %v3975_v51  ;;  %v3949_v14 = vsub.f32 %v3912_v19, %v3941_v55  ;;  %v3978_v52 = vsel %vm797_vm3, %v7603_v15, 0.0 }
 0xa49   : > { %v4063_v56 = vpop.permute.xlu0 %4062  ;;  %v7607_v5 = vpop.eup %6536 }
 0xa4a   : > { %v4068_v58 = vsel %vm1288_vm4, %v4063_v56, 0 }
 0xa4b   : > { %6279 = vmatpush3.bf16.msra.mxu1 %v4068_v58 }
 0xa4c   : > { %4254 = vrot.lane.b32.xlu1 %v6918_v35, %s6714_s22  ;;  %6290 = vmatprep.subr.bf16.mxu1 %v6702_v22  ;;  %v3964_v35 = vmul.f32 1.442695, %v3949_v14  ;;  %v7611_v61 = vpop.eup %6538 }
 0xa4d   : > { %v3981_v8 = vsel %vm797_vm3, %v7611_v61, 0.0 }
 0xa4e   : > { %6540 = vpow2.f32 %v3964_v35 }
 0xa58   : > { %v7615_v19 = vpop.eup %6540 }
 0xa59   : > { %v3987_v20 = vsel %vm797_vm3, %v7615_v19, 0.0 }
 0xa5c   : > { %4206 = vrot.lane.b32.xlu0 %v6921_v36, %s6714_s22  ;;  %v3984_v36 = vsel %vm797_vm3, %v7607_v5, 0.0 }
 0xa70   : > { %3979 = vadd.xlane.f32.xlu1 %v3978_v52 }
 0xa74   : > { %3985 = vadd.xlane.f32.xlu1 %v3984_v36 }
 0xa7b   : > { %3982 = vadd.xlane.f32.xlu0 %v3981_v8 }
 0xa7f   : > { %3988 = vadd.xlane.f32.xlu0 %v3987_v20 }
 0xa85   : > { %4350 = vrot.lane.b32.xlu1 %v6923_v37, %s6714_s22  ;;  %v4111_v37 = vpop.permute.xlu1 %4110 }
 0xa89   : > { %2566 = vrot.lane.b32.xlu1 %v7369_v9, %s6715_s28 }
 0xa8d   : > { %2570 = vrot.lane.b32.xlu1 %v7373_v16, %s6715_s28 }
 0xa91   : > { %3487 = vrot.lane.b32.xlu1 %v7547_v39, %s6716_s16 }
 0xa95   : > { %3491 = vrot.lane.b32.xlu1 %v7551_v1, %s6716_s16  ;;  %4302 = vrot.lane.b32.xlu0 %v6926_v38, %s6714_s22  ;;  %v4159_v38 = vpop.permute.xlu1 %4158  ;;  %s8150_s22 = scalar_lea.vmem %s8119_s9, %s6831_s21  ;;  %s8151_s21 = sld [smem:[#allocation4_spill]] }
 0xa96   : > { %v4164_v10 = vsel %vm1288_vm4, %v4159_v38, 0 }
 0xa99   : > { %2574 = vrot.lane.b32.xlu1 %v7375_v23, %s6715_s28  ;;  %2564 = vrot.lane.b32.xlu0 %v7365_v2, %s6715_s28 }
 0xa9b   : > { %p5761_p9 = scmp.ne.s32.totalorder %s8151_s21, 1 }
 0xa9c   : > { %s8152_s0 = sld [smem:[#allocation13_spill]] (!%p5761_p9)  ;;  %s8153_s30 = sld [smem:[#allocation14_spill]] (!%p5761_p9) }
 0xa9d   : > { %2578 = vrot.lane.b32.xlu1 %v7380_v42, %s6715_s28  ;;  %2568 = vrot.lane.b32.xlu0 %v7367_v6, %s6715_s28 }
 0xaa1   : > { %3495 = vrot.lane.b32.xlu1 %v7553_v13, %s6716_s16  ;;  %3485 = vrot.lane.b32.xlu0 %v7543_v32, %s6716_s16 }
 0xaa5   : > { %3499 = vrot.lane.b32.xlu1 %v7558_v26, %s6716_s16  ;;  %3489 = vrot.lane.b32.xlu0 %v7545_v47, %s6716_s16 }
 0xaa9   : > { %2572 = vrot.lane.b32.xlu0 %v7371_v3, %s6715_s28  ;;  %v4116_v3 = vsel %vm1288_vm4, %v4111_v37, 0  ;;  %v6422_v37 = vld [vmem:[%s6849_s12] sm:$0xff]  }
 0xaad   : > { %2576 = vrot.lane.b32.xlu0 %v7377_v27, %s6715_s28 }
 0xab1   : > { %3493 = vrot.lane.b32.xlu0 %v7549_v62, %s6716_s16 }
 0xab5   : > { %3497 = vrot.lane.b32.xlu0 %v7555_v12, %s6716_s16 }
 0xac0   : > { %v3968_v2 = vpop.xlane.xlu1 %3967 }
 0xac1   : > { %6542 = vrcp.f32 %v3968_v2 }
 0xac8   : > { %v3974_v6 = vpop.xlane.xlu1 %3973 }
 0xac9   : > { %6544 = vrcp.f32 %v3974_v6  ;;  %v6423_v6 = vld [vmem:[%s6849_s12 + $0x8] sm:$0xff]  }
 0xacb   : > { %v6543_v9 = vpop.eup %6542  ;;  %v3971_v16 = vpop.xlane.xlu0 %3970 }
 0xacc   : > { %v3998_v23 = vmul.f32 %v6543_v9, %v7579_v29  ;;  %6546 = vrcp.f32 %v3971_v16  ;;  %v4255_v30 = vpop.permute.xlu1 %4254 }
 0xacd   : > { %v4260_v17 = vsel %vm1288_vm4, %v4255_v30, 0 }
 0xace   : > { %v4006_v42 = vpack.c.bf16 %v3998_v23, %v3998_v23 }
 0xad0   : > { %6275 = vmatmul.mubr.msk.bf16.vlgmr.msra.gmra.mrb[112].mxu0 %vm797_vm3, %v4006_v42 }
 0xad1   : > { %6285 = vmatpush3.bf16.msra.mxu0 %v4116_v3  ;;  %6286 = vmatprep.mubr.msk.bf16.mxu0 %vm6703_vm2, %v6702_v22 }
 0xad2   : > { %6296 = vmatprep.subr.bf16.mxu0 %v6702_v22 }
 0xad3   : > { %v6545_v27 = vpop.eup %6544  ;;  %v3977_v32 = vpop.xlane.xlu0 %3976 }
 0xad4   : > { %v4000_v47 = vmul.f32 %v6545_v27, %v7583_v21  ;;  %6548 = vrcp.f32 %v3977_v32 }
 0xad6   : > { %v6547_v39 = vpop.eup %6546  ;;  %v4008_v62 = vpack.c.bf16 %v4000_v47, %v4000_v47 }
 0xad7   : > { %v3999_v1 = vmul.f32 %v6547_v39, %v7587_v45  ;;  %v4207_v13 = vpop.permute.xlu0 %4206 }
 0xad8   : > { %v4212_v12 = vsel %vm1288_vm4, %v4207_v13, 0  ;;  %6287 = vmatmul.mubr.msk.bf16.vlgmr.msra.gmra.mrb[116].mxu0 %vm797_vm3, %v4008_v62 }
 0xad9   : > { %6297 = vmatpush3.bf16.msra.mxu0 %v4212_v12  ;;  %v4007_v26 = vpack.c.bf16 %v3999_v1, %v3999_v1  ;;  %6298 = vmatprep.mubr.msk.bf16.mxu0 %vm6703_vm2, %v6702_v22 }
 0xada   : > { %6308 = vmatprep.subr.bf16.mxu0 %v6702_v22 }
 0xadb   : > { %6281 = vmatmul.mubr.msk.bf16.vlgmr.msra.gmra.mrb[120].mxu1 %vm797_vm3, %v4007_v26 }
 0xadc   : > { %6291 = vmatpush3.bf16.msra.mxu1 %v4164_v10  ;;  %6292 = vmatprep.mubr.msk.bf16.mxu1 %vm6703_vm2, %v6702_v22 }
 0xadd   : > { %6302 = vmatprep.subr.bf16.mxu1 %v6702_v22 }
 0xade   : > { %v6549_v18 = vpop.eup %6548 }
 0xadf   : > { %v4001_v24 = vmul.f32 %v6549_v18, %v7591_v54 }
 0xae1   : > { %v4009_v28 = vpack.c.bf16 %v4001_v24, %v4001_v24 }
 0xae3   : > { %6293 = vmatmul.mubr.msk.bf16.vlgmr.msra.gmra.mrb[124].mxu1 %vm797_vm3, %v4009_v28 }
 0xae4   : > { %6303 = vmatpush3.bf16.msra.mxu1 %v4260_v17  ;;  %6304 = vmatprep.mubr.msk.bf16.mxu1 %vm6703_vm2, %v6702_v22 }
 0xae5   : > { %6314 = vmatprep.subr.bf16.mxu1 %v6702_v22 }
 0xafd   : > { %v3980_v31 = vpop.xlane.xlu1 %3979 }
 0xafe   : > { %6550 = vrcp.f32 %v3980_v31 }
 0xb01   : > { %v3986_v41 = vpop.xlane.xlu1 %3985 }
 0xb02   : > { %6552 = vrcp.f32 %v3986_v41 }
 0xb05   : > { %v4351_v43 = vpop.permute.xlu1 %4350 }
 0xb06   : > { %v4356_v57 = vsel %vm1288_vm4, %v4351_v43, 0 }
 0xb08   : > { %v6551_v44 = vpop.eup %6550  ;;  %v3983_v46 = vpop.xlane.xlu0 %3982 }
 0xb09   : > { %v4002_v48 = vmul.f32 %v6551_v44, %v7603_v15  ;;  %6554 = vrcp.f32 %v3983_v46  ;;  %v2567_v29 = vpop.permute.xlu1 %2566 }
 0xb0a   : > { %2590 = vst.msk [vmem:[#allocation3 + $0x8] sm:$0xff] %vm2588_vm5, %v2567_v29 }
 0xb0b   : > { %v4010_v25 = vpack.c.bf16 %v4002_v48, %v4002_v48 }
 0xb0c   : > { %v6553_v33 = vpop.eup %6552  ;;  %v3989_v34 = vpop.xlane.xlu0 %3988 }
 0xb0d   : > { %6556 = vrcp.f32 %v3989_v34  ;;  %v2571_v50 = vpop.permute.xlu1 %2570  ;;  %6299 = vmatmul.mubr.msk.bf16.vlgmr.msra.gmra.mrb[120].mxu0 %vm797_vm3, %v4010_v25  ;;  %v4004_v21 = vmul.f32 %v6553_v33, %v7607_v5 }
 0xb0e   : > { %2592 = vst.msk [vmem:[#allocation3 + $0x18] sm:$0xff] %vm2588_vm5, %v2571_v50  ;;  %6310 = vmatprep.mubr.msk.bf16.mxu0 %vm6703_vm2, %v6702_v22 }
 0xb0f   : > { %v4012_v54 = vpack.c.bf16 %v4004_v21, %v4004_v21 }
 0xb10   : > { %v4303_v40 = vpop.permute.xlu0 %4302 }
 0xb11   : > { %v4308_v45 = vsel %vm1288_vm4, %v4303_v40, 0  ;;  %v3488_v49 = vpop.permute.xlu1 %3487 }
 0xb12   : > { %3511 = vst.msk [vmem:[#allocation3 + $0x8] sm:$0xff] %vm3509_vm6, %v3488_v49  ;;  %6309 = vmatpush3.bf16.msra.mxu0 %v4308_v45 }
 0xb13   : > { %v6555_v53 = vpop.eup %6554  ;;  %6320 = vmatprep.subr.bf16.mxu0 %v6422_v37 }
 0xb14   : > { %v4003_v55 = vmul.f32 %v6555_v53, %v7611_v61  ;;  %v2565_v51 = vpop.permute.xlu0 %2564 }
 0xb15   : > { %2589 = vst.msk [vmem:[#allocation3] sm:$0xff] %vm2588_vm5, %v2565_v51  ;;  %v3492_v56 = vpop.permute.xlu1 %3491  ;;  %6311 = vmatmul.mubr.msk.bf16.vlgmr.msra.gmra.mrb[124].mxu0 %vm797_vm3, %v4012_v54 }
 0xb16   : > { %3513 = vst.msk [vmem:[#allocation3 + $0x18] sm:$0xff] %vm3509_vm6, %v3492_v56  ;;  %v4011_v58 = vpack.c.bf16 %v4003_v55, %v4003_v55  ;;  %6321 = vmatpush3.bf16.msra.mxu0 %v6422_v37 }
 0xb17   : > { %v6557_v59 = vpop.eup %6556  ;;  %6322 = vmatprep.subr.bf16.mxu0 %v6423_v6 }
 0xb18   : > { %6305 = vmatmul.mubr.msk.bf16.vlgmr.msra.gmra.mrb[128].mxu1 %vm797_vm3, %v4011_v58  ;;  %v2569_v60 = vpop.permute.xlu0 %2568  ;;  %v4005_v4 = vmul.f32 %v6557_v59, %v7615_v19 }
 0xb19   : > { %6315 = vmatpush3.bf16.msra.mxu1 %v4356_v57  ;;  %2591 = vst.msk [vmem:[#allocation3 + $0x10] sm:$0xff] %vm2588_vm5, %v2569_v60  ;;  %v2575_v63 = vpop.permute.xlu1 %2574  ;;  %6316 = vmatprep.mubr.msk.bf16.mxu1 %vm6703_vm2, %v6702_v22 }
 0xb1a   : > { %2594 = vst.msk [vmem:[#allocation3 + $0x28] sm:$0xff] %vm2588_vm5, %v2575_v63  ;;  %v4013_v11 = vpack.c.bf16 %v4005_v4, %v4005_v4  ;;  %6323 = vmatpush3.bf16.msra.mxu0 %v6423_v6  ;;  %v6625_v6 = vld [vmem:[#allocation2 + $0x18] sm:$0xff] }
 0xb1c   : > { %v3486_v7 = vpop.permute.xlu0 %3485 }
 0xb1d   : > { %3510 = vst.msk [vmem:[#allocation3] sm:$0xff] %vm3509_vm6, %v3486_v7  ;;  %v2579_v0 = vpop.permute.xlu1 %2578  ;;  %v5734_v7 = vld [vmem:[%s8146_s2] ss:$0 sm:$0xff] }
 0xb1e   : > { %2596 = vst.msk [vmem:[#allocation3 + $0x38] sm:$0xff] %vm2588_vm5, %v2579_v0 }
 0xb20   : > { %6317 = vmatmul.mubr.msk.bf16.vlgmr.msra.gmra.mrb[132].mxu1 %vm797_vm3, %v4013_v11  ;;  %v3490_v14 = vpop.permute.xlu0 %3489 }
 0xb21   : > { %3512 = vst.msk [vmem:[#allocation3 + $0x10] sm:$0xff] %vm3509_vm6, %v3490_v14  ;;  %v3496_v15 = vpop.permute.xlu1 %3495 }
 0xb22   : > { %3515 = vst.msk [vmem:[#allocation3 + $0x28] sm:$0xff] %vm3509_vm6, %v3496_v15 }
 0xb24   : > { %v2573_v22 = vpop.permute.xlu0 %2572 }
 0xb25   : > { %2593 = vst.msk [vmem:[#allocation3 + $0x20] sm:$0xff] %vm2588_vm5, %v2573_v22  ;;  %v3500_v35 = vpop.permute.xlu1 %3499 }
 0xb26   : > { %3517 = vst.msk [vmem:[#allocation3 + $0x38] sm:$0xff] %vm3509_vm6, %v3500_v35 }
 0xb28   : > { %v2577_v52 = vpop.permute.xlu0 %2576 }
 0xb29   : > { %2595 = vst.msk [vmem:[#allocation3 + $0x30] sm:$0xff] %vm2588_vm5, %v2577_v52  ;;  %v6622_v52 = vld [vmem:[#allocation2] sm:$0xff] }
 0xb2c   : > { %v3494_v5 = vpop.permute.xlu0 %3493 }
 0xb2d   : > { %3514 = vst.msk [vmem:[#allocation3 + $0x20] sm:$0xff] %vm3509_vm6, %v3494_v5 }
 0xb30   : > { %v3498_v36 = vpop.permute.xlu0 %3497 }
 0xb31   : > { %3516 = vst.msk [vmem:[#allocation3 + $0x30] sm:$0xff] %vm3509_vm6, %v3498_v36 }
 0xba3   : > { %v4056_v61 = vpop.f32.mrb[112].mxu0 }
 0xba4   : > { %v6276_v8 = vpop.f32.mrb[113].mxu0  ;;  %4406 = vrot.lane.b32.xlu0 %v4056_v61, %s6717_s18  ;;  %v6623_v61 = vld [vmem:[#allocation2 + $0x10] sm:$0xff] }
 0xba5   : > { %v4059_v19 = vpop.f32.mrb[114].mxu0 }
 0xba6   : > { %v6277_v20 = vpop.f32.mrb[115].mxu0 }
 0xba7   : > { %v6624_v20 = vld [vmem:[#allocation2 + $0x8] sm:$0xff] }
 0xbab   : > { %v4152_v38 = vpop.f32.mrb[116].mxu0 }
 0xbac   : > { %v6288_v2 = vpop.f32.mrb[117].mxu0  ;;  %4410 = vrot.lane.b32.xlu0 %v4152_v38, %s6717_s18 }
 0xbad   : > { %v4155_v9 = vpop.f32.mrb[118].mxu0 }
 0xbae   : > { %v4104_v16 = vpop.f32.mrb[120].mxu1  ;;  %v6289_v23 = vpop.f32.mrb[119].mxu0 }
 0xbaf   : > { %4408 = vrot.lane.b32.xlu1 %v4104_v16, %s6717_s18  ;;  %v6282_v42 = vpop.f32.mrb[121].mxu1 }
 0xbb0   : > { %v4107_v3 = vpop.f32.mrb[122].mxu1 }
 0xbb1   : > { %v6283_v27 = vpop.f32.mrb[123].mxu1 }
 0xbb6   : > { %v4200_v32 = vpop.f32.mrb[124].mxu1 }
 0xbb7   : > { %4412 = vrot.lane.b32.xlu1 %v4200_v32, %s6717_s18  ;;  %v6294_v47 = vpop.f32.mrb[125].mxu1 }
 0xbb8   : > { %v4203_v39 = vpop.f32.mrb[126].mxu1 }
 0xbb9   : > { %v6295_v62 = vpop.f32.mrb[127].mxu1 }
 0xbe0   : > { %v4248_v1 = vpop.f32.mrb[120].mxu0 }
 0xbe1   : > { %4414 = vrot.lane.b32.xlu0 %v4248_v1, %s6717_s18  ;;  %v6300_v13 = vpop.f32.mrb[121].mxu0  ;;  %v6626_v1 = vld [vmem:[#allocation2 + $0x20] sm:$0xff] }
 0xbe2   : > { %v4251_v12 = vpop.f32.mrb[122].mxu0 }
 0xbe3   : > { %v6301_v26 = vpop.f32.mrb[123].mxu0 }
 0xbe4   : > { %v6627_v26 = vld [vmem:[#allocation2 + $0x30] sm:$0xff] }
 0xbe8   : > { %v4344_v10 = vpop.f32.mrb[124].mxu0 }
 0xbe9   : > { %4418 = vrot.lane.b32.xlu0 %v4344_v10, %s6717_s18  ;;  %v6312_v18 = vpop.f32.mrb[125].mxu0 }
 0xbea   : > { %v4347_v24 = vpop.f32.mrb[126].mxu0  ;;  %v6628_v18 = vld [vmem:[#allocation2 + $0x28] sm:$0xff] }
 0xbeb   : > { %v4296_v30 = vpop.f32.mrb[128].mxu1  ;;  %v6313_v28 = vpop.f32.mrb[127].mxu0 }
 0xbec   : > { %4416 = vrot.lane.b32.xlu1 %v4296_v30, %s6717_s18  ;;  %v6306_v17 = vpop.f32.mrb[129].mxu1  ;;  %v6629_v28 = vld [vmem:[#allocation2 + $0x38] sm:$0xff] }
 0xbed   : > { %v4299_v31 = vpop.f32.mrb[130].mxu1 }
 0xbee   : > { %v6307_v41 = vpop.f32.mrb[131].mxu1 }
 0xbf3   : > { %v4392_v43 = vpop.f32.mrb[132].mxu1 }
 0xbf4   : > { %4420 = vrot.lane.b32.xlu1 %v4392_v43, %s6717_s18  ;;  %v6318_v44 = vpop.f32.mrb[133].mxu1 }
 0xbf5   : > { %v4395_v46 = vpop.f32.mrb[134].mxu1 }
 0xbf6   : > { %v6319_v48 = vpop.f32.mrb[135].mxu1 }
 0xc16   : > { %v4407_v29 = vpop.permute.xlu0 %4406 }
 0xc17   : > { %4431 = vst.msk [vmem:[#allocation3] sm:$0xff] %vm4430_vm7, %v4407_v29 }
 0xc1e   : > { %v4411_v25 = vpop.permute.xlu0 %4410  ;;  %v4439_v50 = vld [vmem:[#allocation3] sm:$0xff] }
 0xc1f   : > { %4433 = vst.msk [vmem:[#allocation3 + $0x10] sm:$0xff] %vm4430_vm7, %v4411_v25 }
 0xc21   : > { %v4409_v33 = vpop.permute.xlu1 %4408 }
 0xc22   : > { %4432 = vst.msk [vmem:[#allocation3 + $0x8] sm:$0xff] %vm4430_vm7, %v4409_v33 }
 0xc26   : > { %v4441_v45 = vld [vmem:[#allocation3 + $0x10] sm:$0xff] }
 0xc29   : > { %v4413_v34 = vpop.permute.xlu1 %4412  ;;  %v4440_v21 = vld [vmem:[#allocation3 + $0x8] sm:$0xff] }
 0xc2a   : > { %4434 = vst.msk [vmem:[#allocation3 + $0x18] sm:$0xff] %vm4430_vm7, %v4413_v34  ;;  %v4447_v40 = vpack.c.bf16 %v4440_v21, %v4439_v50 }
 0xc2c   : > { %6324 = vmatprep.mubr.msk.bf16.mxu0 %vm708_vm1, %v4447_v40 }
 0xc31   : > { %v4442_v49 = vld [vmem:[#allocation3 + $0x18] sm:$0xff] }
 0xc32   : > { %v4448_v53 = vpack.c.bf16 %v4442_v49, %v4441_v45 }
 0xc34   : > { %6325 = vmatmul.mubr.msk.bf16.vlgmr.msra.gmra.mrb[128].mxu0 %vm708_vm1, %v4448_v53 }
 0xc53   : > { %v4415_v54 = vpop.permute.xlu0 %4414 }
 0xc54   : > { %4435 = vst.msk [vmem:[#allocation3 + $0x20] sm:$0xff] %vm4430_vm7, %v4415_v54 }
 0xc5b   : > { %v4419_v55 = vpop.permute.xlu0 %4418  ;;  %v4443_v58 = vld [vmem:[#allocation3 + $0x20] sm:$0xff] }
 0xc5c   : > { %4437 = vst.msk [vmem:[#allocation3 + $0x30] sm:$0xff] %vm4430_vm7, %v4419_v55 }
 0xc5e   : > { %v4417_v51 = vpop.permute.xlu1 %4416 }
 0xc5f   : > { %4436 = vst.msk [vmem:[#allocation3 + $0x28] sm:$0xff] %vm4430_vm7, %v4417_v51 }
 0xc63   : > { %v4445_v60 = vld [vmem:[#allocation3 + $0x30] sm:$0xff] }
 0xc66   : > { %v4421_v56 = vpop.permute.xlu1 %4420  ;;  %v4444_v59 = vld [vmem:[#allocation3 + $0x28] sm:$0xff] }
 0xc67   : > { %4438 = vst.msk [vmem:[#allocation3 + $0x38] sm:$0xff] %vm4430_vm7, %v4421_v56  ;;  %v4449_v57 = vpack.c.bf16 %v4444_v59, %v4443_v58 }
 0xc69   : > { %6328 = vmatprep.mubr.msk.bf16.mxu0 %vm708_vm1, %v4449_v57 }
 0xc6e   : > { %v4446_v63 = vld [vmem:[#allocation3 + $0x38] sm:$0xff] }
 0xc6f   : > { %v4450_v4 = vpack.c.bf16 %v4446_v63, %v4445_v60  ;;  %v6424_v60 = vld [vmem:[%s6862_s1] sm:$0xff]  }
 0xc70   : > { %6332 = vmatprep.subr.bf16.mxu1 %v6424_v60 }
 0xc71   : > { %6329 = vmatmul.mubr.msk.bf16.gmra.mrb[132].mxu0 %vm708_vm1, %v4450_v4  ;;  %6333 = vmatpush3.bf16.msra.mxu1 %v6424_v60  ;;  %v6425_v4 = vld [vmem:[%s6862_s1 + $0x8] sm:$0xff]  }
 0xc72   : > { %6334 = vmatprep.subr.bf16.mxu1 %v6425_v4 }
 0xc75   : > { %6335 = vmatpush3.bf16.msra.mxu1 %v6425_v4  ;;  %v7788_v4 = vld [vmem:[%s8148_s13] ss:$0 sm:$0xff] }
 0xd07   : > { %v6326_v0 = vpop.f32.mrb[128].mxu0 }
 0xd08   : > { %v4520_v11 = vpop.f32.mrb[129].mxu0  ;;  %v4529_v14 = vadd.f32 %v6326_v0, %v5734_v7 }
 0xd09   : > { %v4521_v15 = vadd.f32 %v5734_v7, %v4520_v11  ;;  %v6327_v22 = vpop.f32.mrb[130].mxu0 }
 0xd0a   : > { %v4523_v35 = vpop.f32.mrb[131].mxu0  ;;  %v4553_v8 = vadd.f32 %v6623_v61, %v4529_v14  ;;  %v4532_v19 = vadd.f32 %v6327_v22, %v5734_v7 }
 0xd0b   : > { %v4551_v5 = vadd.f32 %v6622_v52, %v4521_v15  ;;  %v4524_v36 = vadd.f32 %v5734_v7, %v4523_v35 }
 0xd0c   : > { %v4554_v9 = vadd.f32 %v6625_v6, %v4532_v19  ;;  %v4567_v16 = vsel %vm708_vm1, %v4553_v8, 0.0 }
 0xd0d   : > { %v4552_v37 = vadd.f32 %v6624_v20, %v4524_v36  ;;  %v4561_v38 = vsel %vm708_vm1, %v4551_v5, 0.0 }
 0xd0e   : > { %4562 = vadd.xlane.f32.xlu0 %v4561_v38  ;;  %v4570_v23 = vsel %vm708_vm1, %v4554_v9, 0.0 }
 0xd0f   : > { %v4564_v2 = vsel %vm708_vm1, %v4552_v37, 0.0 }
 0xd10   : > { %4565 = vadd.xlane.f32.xlu1 %v4564_v2 }
 0xd12   : > { %4568 = vadd.xlane.f32.xlu0 %v4567_v16  ;;  %v6426_v16 = vld [vmem:[%s6876_s23] sm:$0xff]  }
 0xd13   : > { %6344 = vmatprep.subr.bf16.mxu0 %v6426_v16 }
 0xd14   : > { %6345 = vmatpush3.bf16.msra.mxu0 %v6426_v16 }
 0xd16   : > { %4571 = vadd.xlane.f32.xlu0 %v4570_v23  ;;  %v6427_v23 = vld [vmem:[%s6876_s23 + $0x8] sm:$0xff]  }
 0xd17   : > { %6346 = vmatprep.subr.bf16.mxu0 %v6427_v23 }
 0xd18   : > { %6347 = vmatpush3.bf16.msra.mxu0 %v6427_v23 }
 0xd44   : > { %v6330_v42 = vpop.f32.mrb[132].mxu0 }
 0xd45   : > { %v4545_v3 = vadd.f32 %v6330_v42, %v5734_v7  ;;  %v4536_v27 = vpop.f32.mrb[133].mxu0 }
 0xd46   : > { %v4537_v32 = vadd.f32 %v5734_v7, %v4536_v27  ;;  %v6331_v47 = vpop.f32.mrb[134].mxu0 }
 0xd47   : > { %v4548_v39 = vadd.f32 %v6331_v47, %v5734_v7  ;;  %v4539_v62 = vpop.f32.mrb[135].mxu0  ;;  %v4557_v10 = vadd.f32 %v6627_v26, %v4545_v3 }
 0xd48   : > { %v4555_v13 = vadd.f32 %v6626_v1, %v4537_v32  ;;  %v4540_v12 = vadd.f32 %v5734_v7, %v4539_v62 }
 0xd49   : > { %v4558_v17 = vadd.f32 %v6629_v28, %v4548_v39  ;;  %v4579_v41 = vsel %vm708_vm1, %v4557_v10, 0.0 }
 0xd4a   : > { %v4556_v24 = vadd.f32 %v6628_v18, %v4540_v12  ;;  %v4573_v30 = vsel %vm708_vm1, %v4555_v13, 0.0 }
 0xd4b   : > { %4574 = vadd.xlane.f32.xlu1 %v4573_v30  ;;  %v4582_v43 = vsel %vm708_vm1, %v4558_v17, 0.0 }
 0xd4c   : > { %v4576_v31 = vsel %vm708_vm1, %v4556_v24, 0.0 }
 0xd4d   : > { %4577 = vadd.xlane.f32.xlu0 %v4576_v31 }
 0xd4f   : > { %4580 = vadd.xlane.f32.xlu1 %v4579_v41 }
 0xd51   : > { %4583 = vadd.xlane.f32.xlu0 %v4582_v43 }
 0xd9b   : > { %v4563_v44 = vpop.xlane.xlu0 %4562 }
 0xd9c   : > { %v4586_v46 = vmul.f32 0.03125, %v4563_v44 }
 0xd9d   : > { %v4566_v48 = vpop.xlane.xlu1 %4565 }
 0xd9e   : > { %v7728_v29 = vsub.f32 %v4551_v5, %v4586_v46  ;;  %v4587_v25 = vmul.f32 0.03125, %v4566_v48 }
 0xd9f   : > { %v4569_v33 = vpop.xlane.xlu0 %4568 }
 0xda0   : > { %v7730_v34 = vsub.f32 %v4552_v37, %v4587_v25  ;;  %v4588_v50 = vmul.f32 0.03125, %v4569_v33  ;;  %v4602_v21 = vmul.f32 %v7728_v29, %v7728_v29 }
 0xda2   : > { %v7734_v40 = vsub.f32 %v4553_v8, %v4588_v50  ;;  %v4610_v45 = vsel %vm708_vm1, %v4602_v21, 0.0  ;;  %v4603_v49 = vmul.f32 %v7730_v34, %v7730_v34 }
 0xda3   : > { %4611 = vadd.xlane.f32.xlu1 %v4610_v45  ;;  %v4572_v53 = vpop.xlane.xlu0 %4571 }
 0xda4   : > { %v4589_v54 = vmul.f32 0.03125, %v4572_v53  ;;  %v4613_v55 = vsel %vm708_vm1, %v4603_v49, 0.0  ;;  %v4604_v51 = vmul.f32 %v7734_v40, %v7734_v40 }
 0xda5   : > { %4614 = vadd.xlane.f32.xlu0 %v4613_v55 }
 0xda6   : > { %v7742_v56 = vsub.f32 %v4554_v9, %v4589_v54  ;;  %v4616_v58 = vsel %vm708_vm1, %v4604_v51, 0.0  ;;  %v7777_v51 = vld [vmem:[%s8147_s15] ss:$0 sm:$0xff] }
 0xda7   : > { %4617 = vadd.xlane.f32.xlu1 %v4616_v58 }
 0xda8   : > { %v4605_v59 = vmul.f32 %v7742_v56, %v7742_v56 }
 0xdaa   : > { %v4619_v57 = vsel %vm708_vm1, %v4605_v59, 0.0  ;;  %v4704_v59 = vmul.f32 %v7777_v51, %v7728_v29 }
 0xdab   : > { %4620 = vadd.xlane.f32.xlu0 %v4619_v57  ;;  %v4705_v57 = vmul.f32 %v7777_v51, %v7730_v34  ;;  %v4707_v34 = vmul.f32 %v7777_v51, %v7742_v56 }
 0xdd8   : > { %v4575_v63 = vpop.xlane.xlu1 %4574 }
 0xdd9   : > { %v4590_v7 = vmul.f32 0.03125, %v4575_v63 }
 0xdda   : > { %v4578_v0 = vpop.xlane.xlu0 %4577 }
 0xddb   : > { %v7750_v11 = vsub.f32 %v4555_v13, %v4590_v7  ;;  %v4591_v14 = vmul.f32 0.03125, %v4578_v0 }
 0xddc   : > { %v4581_v15 = vpop.xlane.xlu1 %4580 }
 0xddd   : > { %v7752_v22 = vsub.f32 %v4556_v24, %v4591_v14  ;;  %v4592_v35 = vmul.f32 0.03125, %v4581_v15  ;;  %v4606_v52 = vmul.f32 %v7750_v11, %v7750_v11  ;;  %v4706_v14 = vmul.f32 %v7777_v51, %v7734_v40 }
 0xdde   : > { %v4584_v5 = vpop.xlane.xlu0 %4583 }
 0xddf   : > { %v7756_v36 = vsub.f32 %v4557_v10, %v4592_v35  ;;  %v4593_v61 = vmul.f32 0.03125, %v4584_v5  ;;  %v4622_v8 = vsel %vm708_vm1, %v4606_v52, 0.0  ;;  %v4607_v19 = vmul.f32 %v7752_v22, %v7752_v22 }
 0xde0   : > { %4623 = vadd.xlane.f32.xlu1 %v4622_v8 }
 0xde1   : > { %v7761_v20 = vsub.f32 %v4558_v17, %v4593_v61  ;;  %v4608_v37 = vmul.f32 %v7756_v36, %v7756_v36  ;;  %v4625_v38 = vsel %vm708_vm1, %v4607_v19, 0.0 }
 0xde2   : > { %4626 = vadd.xlane.f32.xlu0 %v4625_v38 }
 0xde3   : > { %v4628_v2 = vsel %vm708_vm1, %v4608_v37, 0.0  ;;  %v4609_v6 = vmul.f32 %v7761_v20, %v7761_v20 }
 0xde4   : > { %4629 = vadd.xlane.f32.xlu1 %v4628_v2 }
 0xde5   : > { %v4631_v9 = vsel %vm708_vm1, %v4609_v6, 0.0 }
 0xde6   : > { %4632 = vadd.xlane.f32.xlu0 %v4631_v9 }
 0xe30   : > { %v4612_v42 = vpop.xlane.xlu1 %4611 }
 0xe31   : > { %v4634_v3 = vmul.f32 0.032258064, %v4612_v42 }
 0xe32   : > { %v4615_v27 = vpop.xlane.xlu0 %4614 }
 0xe33   : > { %6558 = vrsqrt.f32 %v4634_v3  ;;  %v4635_v32 = vmul.f32 0.032258064, %v4615_v27  ;;  %vm4644_vm8 = vcmp.eq.f32.partialorder %v4634_v3, inf  ;;  %v4647_v26 = vand.u32 2147483648, %v4634_v3 }
 0xe34   : > { %v4618_v47 = vpop.xlane.xlu1 %4617  ;;  %vm4646_vm9 = vcmp.eq.f32.partialorder %v4634_v3, 0.0 }
 0xe35   : > { %v4636_v39 = vmul.f32 0.032258064, %v4618_v47  ;;  %6560 = vrsqrt.f32 %v4635_v32  ;;  %vm4651_vm10 = vcmp.eq.f32.partialorder %v4635_v32, inf  ;;  %v4654_v31 = vand.u32 2147483648, %v4635_v32 }
 0xe36   : > { %vm4653_vm11 = vcmp.eq.f32.partialorder %v4635_v32, 0.0 }
 0xe37   : > { %6562 = vrsqrt.f32 %v4636_v39  ;;  %vm4658_vm12 = vcmp.eq.f32.partialorder %v4636_v39, inf  ;;  %v4661_v44 = vand.u32 2147483648, %v4636_v39  ;;  %vm4660_vm13 = vcmp.eq.f32.partialorder %v4636_v39, 0.0 }
 0xe38   : > { %v4621_v62 = vpop.xlane.xlu0 %4620 }
 0xe39   : > { %v4637_v1 = vmul.f32 0.032258064, %v4621_v62 }
 0xe3b   : > { %6564 = vrsqrt.f32 %v4637_v1  ;;  %vm4665_vm14 = vcmp.eq.f32.partialorder %v4637_v1, inf  ;;  %v4668_v49 = vand.u32 2147483648, %v4637_v1  ;;  %vm4667_vm15 = vcmp.eq.f32.partialorder %v4637_v1, 0.0 }
 0xe3d   : > { %v6559_v13 = vpop.eup %6558 }
 0xe3e   : > { %v4643_v12 = vmul.f32 %v6559_v13, %v4634_v3 }
 0xe3f   : > { %v6561_v10 = vpop.eup %6560 }
 0xe40   : > { %v4645_v18 = vsel %vm4644_vm8, %v4634_v3, %v4643_v12  ;;  %v4650_v28 = vmul.f32 %v6561_v10, %v4635_v32 }
 0xe41   : > { %v6563_v24 = vpop.eup %6562  ;;  %v4648_v30 = vsel %vm4646_vm9, %v4647_v26, %v4645_v18  ;;  %vm4905_vm9 = vcmask 523264  }
 0xe42   : > { %v4712_v17 = vadd.f32 1e-06, %v4648_v30  ;;  %v4657_v41 = vmul.f32 %v6563_v24, %v4636_v39  ;;  %v4652_v43 = vsel %vm4651_vm10, %v4635_v32, %v4650_v28 }
 0xe43   : > { %v4655_v46 = vsel %vm4653_vm11, %v4654_v31, %v4652_v43 }
 0xe44   : > { %6566 = vrcp.f32 %v4712_v17  ;;  %v4659_v48 = vsel %vm4658_vm12, %v4636_v39, %v4657_v41  ;;  %v4713_v33 = vadd.f32 1e-06, %v4655_v46 }
 0xe45   : > { %v6565_v25 = vpop.eup %6564  ;;  %v4662_v50 = vsel %vm4660_vm13, %v4661_v44, %v4659_v48 }
 0xe46   : > { %v4714_v21 = vadd.f32 1e-06, %v4662_v50  ;;  %v4664_v45 = vmul.f32 %v6565_v25, %v4637_v1  ;;  %6568 = vrcp.f32 %v4713_v33  ;;  %v4708_v50 = vmul.f32 %v7777_v51, %v7750_v11 }
 0xe48   : > { %6570 = vrcp.f32 %v4714_v21  ;;  %v4666_v53 = vsel %vm4665_vm14, %v4637_v1, %v4664_v45  ;;  %v4709_v21 = vmul.f32 %v7777_v51, %v7752_v22 }
 0xe49   : > { %v4669_v54 = vsel %vm4667_vm15, %v4668_v49, %v4666_v53 }
 0xe4a   : > { %v4715_v55 = vadd.f32 1e-06, %v4669_v54  ;;  %v4710_v54 = vmul.f32 %v7777_v51, %v7756_v36 }
 0xe4c   : > { %6572 = vrcp.f32 %v4715_v55 }
 0xe4e   : > { %v6567_v58 = vpop.eup %6566 }
 0xe4f   : > { %v4728_v60 = vmul.f32 %v6567_v58, %v4704_v59  ;;  %v4711_v58 = vmul.f32 %v7777_v51, %v7761_v20 }
 0xe50   : > { %v6569_v63 = vpop.eup %6568 }
 0xe51   : > { %v4729_v0 = vmul.f32 %v6569_v63, %v4705_v57  ;;  %v7793_v15 = vadd.f32 %v7788_v4, %v4728_v60 }
 0xe52   : > { %v6571_v7 = vpop.eup %6570 }
 0xe53   : > { %v7796_v29 = vadd.f32 %v7788_v4, %v4729_v0  ;;  %v4730_v35 = vmul.f32 %v6571_v7, %v4706_v14  ;;  %v6428_v7 = vld [vmem:[%s6876_s23 + $0x10] sm:$0xff]   ;;  %v6429_v0 = vld [vmem:[%s6876_s23 + $0x18] sm:$0xff]   ;;  %v5743_v14 = vld [vmem:[%s8149_s24] ss:$0 sm:$0xff] }
 0xe54   : > { %6348 = vmatprep.subr.bf16.mxu0 %v6428_v7 }
 0xe55   : > { %v4750_v5 = vpack.c.bf16 %v7796_v29, %v7793_v15  ;;  %v7804_v8 = vadd.f32 %v7788_v4, %v4730_v35  ;;  %6349 = vmatpush3.bf16.msra.mxu0 %v6428_v7 }
 0xe56   : > { %v6573_v52 = vpop.eup %6572  ;;  %6350 = vmatprep.subr.bf16.mxu0 %v6429_v0 }
 0xe57   : > { %v4731_v61 = vmul.f32 %v6573_v52, %v4707_v34  ;;  %6336 = vmatprep.mubr.msk.bf16.mxu1 %vm708_vm1, %v4750_v5 }
 0xe59   : > { %v7807_v40 = vadd.f32 %v7788_v4, %v4731_v61  ;;  %6351 = vmatpush3.bf16.msra.mxu0 %v6429_v0 }
 0xe5b   : > { %v4751_v19 = vpack.c.bf16 %v7807_v40, %v7804_v8 }
 0xe5d   : > { %6337 = vmatmul.mubr.msk.bf16.vlgmr.msra.gmra.mrb[136].mxu1 %vm708_vm1, %v4751_v19 }
 0xe6d   : > { %v4624_v56 = vpop.xlane.xlu1 %4623 }
 0xe6e   : > { %v4638_v37 = vmul.f32 0.032258064, %v4624_v56 }
 0xe6f   : > { %v4627_v38 = vpop.xlane.xlu0 %4626 }
 0xe70   : > { %6574 = vrsqrt.f32 %v4638_v37  ;;  %v4639_v2 = vmul.f32 0.032258064, %v4627_v38  ;;  %vm4672_vm0 = vcmp.eq.f32.partialorder %v4638_v37, inf  ;;  %v4675_v27 = vand.u32 2147483648, %v4638_v37 }
 0xe71   : > { %v4630_v6 = vpop.xlane.xlu1 %4629  ;;  %vm4674_vm2 = vcmp.eq.f32.partialorder %v4638_v37, 0.0 }
 0xe72   : > { %v4640_v9 = vmul.f32 0.032258064, %v4630_v6  ;;  %6576 = vrsqrt.f32 %v4639_v2  ;;  %vm4679_vm3 = vcmp.eq.f32.partialorder %v4639_v2, inf  ;;  %v4682_v12 = vand.u32 2147483648, %v4639_v2 }
 0xe73   : > { %v4633_v16 = vpop.xlane.xlu0 %4632  ;;  %vm4681_vm4 = vcmp.eq.f32.partialorder %v4639_v2, 0.0 }
 0xe74   : > { %6578 = vrsqrt.f32 %v4640_v9  ;;  %v4641_v23 = vmul.f32 0.032258064, %v4633_v16  ;;  %vm4686_vm5 = vcmp.eq.f32.partialorder %v4640_v9, inf  ;;  %v4689_v18 = vand.u32 2147483648, %v4640_v9 }
 0xe75   : > { %vm4688_vm6 = vcmp.eq.f32.partialorder %v4640_v9, 0.0 }
 0xe76   : > { %6580 = vrsqrt.f32 %v4641_v23  ;;  %vm4693_vm7 = vcmp.eq.f32.partialorder %v4641_v23, inf  ;;  %v4696_v44 = vand.u32 2147483648, %v4641_v23  ;;  %vm4695_vm8 = vcmp.eq.f32.partialorder %v4641_v23, 0.0 }
 0xe7a   : > { %v6575_v42 = vpop.eup %6574 }
 0xe7b   : > { %v4671_v3 = vmul.f32 %v6575_v42, %v4638_v37 }
 0xe7c   : > { %v6577_v32 = vpop.eup %6576 }
 0xe7d   : > { %v4673_v47 = vsel %vm4672_vm0, %v4638_v37, %v4671_v3  ;;  %v4678_v1 = vmul.f32 %v6577_v32, %v4639_v2 }
 0xe7e   : > { %v6579_v39 = vpop.eup %6578  ;;  %v4676_v62 = vsel %vm4674_vm2, %v4675_v27, %v4673_v47 }
 0xe7f   : > { %v4716_v13 = vadd.f32 1e-06, %v4676_v62  ;;  %v4685_v26 = vmul.f32 %v6579_v39, %v4640_v9  ;;  %v4680_v10 = vsel %vm4679_vm3, %v4639_v2, %v4678_v1 }
 0xe80   : > { %v6581_v24 = vpop.eup %6580  ;;  %v4683_v30 = vsel %vm4681_vm4, %v4682_v12, %v4680_v10 }
 0xe81   : > { %6582 = vrcp.f32 %v4716_v13  ;;  %v4687_v28 = vsel %vm4686_vm5, %v4640_v9, %v4685_v26  ;;  %v4717_v17 = vadd.f32 1e-06, %v4683_v30  ;;  %v4692_v41 = vmul.f32 %v6581_v24, %v4641_v23  ;;  %v5750_v24 = vld [vmem:[%s8150_s22] ss:$0 sm:$0xff] }
 0xe82   : > { %v4690_v31 = vsel %vm4688_vm6, %v4689_v18, %v4687_v28 }
 0xe83   : > { %v4718_v43 = vadd.f32 1e-06, %v4690_v31  ;;  %6584 = vrcp.f32 %v4717_v17  ;;  %v4694_v46 = vsel %vm4693_vm7, %v4641_v23, %v4692_v41 }
 0xe84   : > { %v4697_v48 = vsel %vm4695_vm8, %v4696_v44, %v4694_v46 }
 0xe85   : > { %6586 = vrcp.f32 %v4718_v43  ;;  %v4719_v25 = vadd.f32 1e-06, %v4697_v48 }
 0xe87   : > { %6588 = vrcp.f32 %v4719_v25 }
 0xe8b   : > { %v6583_v33 = vpop.eup %6582 }
 0xe8c   : > { %v4732_v45 = vmul.f32 %v6583_v33, %v4708_v50 }
 0xe8d   : > { %v6585_v49 = vpop.eup %6584 }
 0xe8e   : > { %v4733_v55 = vmul.f32 %v6585_v49, %v4709_v21  ;;  %v7821_v59 = vadd.f32 %v7788_v4, %v4732_v45 }
 0xe8f   : > { %v6587_v53 = vpop.eup %6586 }
 0xe90   : > { %v7824_v11 = vadd.f32 %v7788_v4, %v4733_v55  ;;  %v4734_v22 = vmul.f32 %v6587_v53, %v4710_v54 }
 0xe91   : > { %v6589_v57 = vpop.eup %6588 }
 0xe92   : > { %v4752_v60 = vpack.c.bf16 %v7824_v11, %v7821_v59  ;;  %v4735_v63 = vmul.f32 %v6589_v57, %v4711_v58  ;;  %v7830_v36 = vadd.f32 %v7788_v4, %v4734_v22 }
 0xe94   : > { %6340 = vmatprep.mubr.msk.bf16.mxu1 %vm708_vm1, %v4752_v60  ;;  %v7833_v20 = vadd.f32 %v7788_v4, %v4735_v63 }
 0xe96   : > { %v4753_v51 = vpack.c.bf16 %v7833_v20, %v7830_v36 }
 0xe98   : > { %6341 = vmatmul.mubr.msk.bf16.gmra.mrb[140].mxu1 %vm708_vm1, %v4753_v51 }
 0xf30   : > { %v6338_v34 = vpop.f32.mrb[136].mxu1 }
 0xf31   : > { %v4832_v35 = vadd.f32 %v6338_v34, %v5743_v14  ;;  %v4823_v4 = vpop.f32.mrb[137].mxu1 }
 0xf32   : > { %v4824_v52 = vadd.f32 %v5743_v14, %v4823_v4  ;;  %v6339_v5 = vpop.f32.mrb[138].mxu1 }
 0xf33   : > { %v4835_v61 = vadd.f32 %v6339_v5, %v5743_v14  ;;  %v4826_v19 = vpop.f32.mrb[139].mxu1  ;;  %v4856_v37 = vmax.f32 %v4832_v35, 0.0 }
 0xf34   : > { %v4827_v56 = vadd.f32 %v5743_v14, %v4826_v19  ;;  %v4854_v2 = vmax.f32 %v4824_v52, 0.0 }
 0xf35   : > { %v4857_v38 = vmax.f32 %v4835_v61, 0.0 }
 0xf36   : > { %v4855_v6 = vmax.f32 %v4827_v56, 0.0 }
 0xf37   : > { %v4863_v9 = vpack.c.bf16 %v4857_v38, %v4856_v37 }
 0xf38   : > { %v4862_v16 = vpack.c.bf16 %v4855_v6, %v4854_v2 }
 0xf3a   : > { %6352 = vmatprep.mubr.msk.bf16.mxu0 %vm4905_vm9, %v4862_v16 }
 0xf3b   : > { %6353 = vmatmul.mubr.msk.bf16.vlgmr.msra.gmra.mrb[136].mxu0 %vm4905_vm9, %v4863_v9 }
 0xf6b   : > { %v6342_v23 = vpop.f32.mrb[140].mxu1 }
 0xf6c   : > { %v4848_v42 = vadd.f32 %v6342_v23, %v5743_v14  ;;  %v4839_v3 = vpop.f32.mrb[141].mxu1 }
 0xf6d   : > { %v4840_v27 = vadd.f32 %v5743_v14, %v4839_v3  ;;  %v6343_v32 = vpop.f32.mrb[142].mxu1 }
 0xf6e   : > { %v4851_v47 = vadd.f32 %v6343_v32, %v5743_v14  ;;  %v4842_v39 = vpop.f32.mrb[143].mxu1  ;;  %v4860_v1 = vmax.f32 %v4848_v42, 0.0 }
 0xf6f   : > { %v4843_v62 = vadd.f32 %v5743_v14, %v4842_v39  ;;  %v4858_v12 = vmax.f32 %v4840_v27, 0.0 }
 0xf70   : > { %v4861_v13 = vmax.f32 %v4851_v47, 0.0 }
 0xf71   : > { %v4859_v26 = vmax.f32 %v4843_v62, 0.0 }
 0xf72   : > { %v4865_v10 = vpack.c.bf16 %v4861_v13, %v4860_v1 }
 0xf73   : > { %v4864_v18 = vpack.c.bf16 %v4859_v26, %v4858_v12 }
 0xf75   : > { %6356 = vmatprep.mubr.msk.bf16.mxu0 %vm4905_vm9, %v4864_v18 }
 0xf76   : > { %6357 = vmatmul.mubr.msk.bf16.gmra.mrb[140].mxu0 %vm4905_vm9, %v4865_v10 }
0x100e   : > { %v6354_v30 = vpop.f32.mrb[136].mxu0 }
0x100f   : > { %v4961_v28 = vadd.f32 %v6354_v30, %v5750_v24  ;;  %v4952_v17 = vpop.f32.mrb[137].mxu0 }
0x1010   : > { %v4953_v31 = vadd.f32 %v5750_v24, %v4952_v17  ;;  %v6355_v41 = vpop.f32.mrb[138].mxu0 }
0x1011   : > { %v4985_v43 = vadd.f32 %v4961_v28, %v7804_v8  ;;  %v4964_v44 = vadd.f32 %v6355_v41, %v5750_v24  ;;  %v4955_v46 = vpop.f32.mrb[139].mxu0 }
0x1012   : > { %v4956_v48 = vadd.f32 %v5750_v24, %v4955_v46  ;;  %v4983_v25 = vadd.f32 %v4953_v31, %v7793_v15 }
0x1013   : > { %v4986_v33 = vadd.f32 %v4964_v44, %v7807_v40  ;;  %v4999_v50 = vsel %vm708_vm1, %v4985_v43, 0.0 }
0x1014   : > { %5000 = vadd.xlane.f32.xlu1 %v4999_v50  ;;  %v4984_v21 = vadd.f32 %v4956_v48, %v7796_v29  ;;  %v4993_v49 = vsel %vm708_vm1, %v4983_v25, 0.0 }
0x1015   : > { %v5002_v45 = vsel %vm708_vm1, %v4986_v33, 0.0 }
0x1016   : > { %5003 = vadd.xlane.f32.xlu0 %v5002_v45  ;;  %v4996_v8 = vsel %vm708_vm1, %v4984_v21, 0.0 }
0x1018   : > { %4994 = vadd.xlane.f32.xlu1 %v4993_v49 }
0x101a   : > { %4997 = vadd.xlane.f32.xlu0 %v4996_v8 }
0x1049   : > { %v6358_v53 = vpop.f32.mrb[140].mxu0 }
0x104a   : > { %v4977_v54 = vadd.f32 %v6358_v53, %v5750_v24  ;;  %v4968_v55 = vpop.f32.mrb[141].mxu0 }
0x104b   : > { %v4969_v15 = vadd.f32 %v5750_v24, %v4968_v55  ;;  %v6359_v58 = vpop.f32.mrb[142].mxu0 }
0x104c   : > { %v4980_v40 = vadd.f32 %v6359_v58, %v5750_v24  ;;  %v4971_v22 = vpop.f32.mrb[143].mxu0  ;;  %v4989_v29 = vadd.f32 %v4977_v54, %v7830_v36 }
0x104d   : > { %v4987_v57 = vadd.f32 %v4969_v15, %v7821_v59  ;;  %v4972_v60 = vadd.f32 %v5750_v24, %v4971_v22 }
0x104e   : > { %v4990_v7 = vadd.f32 %v4980_v40, %v7833_v20  ;;  %v5011_v14 = vsel %vm708_vm1, %v4989_v29, 0.0 }
0x104f   : > { %v4988_v63 = vadd.f32 %v4972_v60, %v7824_v11  ;;  %v5005_v51 = vsel %vm708_vm1, %v4987_v57, 0.0 }
0x1050   : > { %5006 = vadd.xlane.f32.xlu1 %v5005_v51  ;;  %v5014_v34 = vsel %vm708_vm1, %v4990_v7, 0.0 }
0x1051   : > { %v5008_v0 = vsel %vm708_vm1, %v4988_v63, 0.0 }
0x1052   : > { %5009 = vadd.xlane.f32.xlu0 %v5008_v0 }
0x1054   : > { %5012 = vadd.xlane.f32.xlu1 %v5011_v14 }
0x1056   : > { %5015 = vadd.xlane.f32.xlu0 %v5014_v34 }
0x10a1   : > { %v5001_v59 = vpop.xlane.xlu1 %5000 }
0x10a2   : > { %v5019_v35 = vmul.f32 0.03125, %v5001_v59 }
0x10a3   : > { %v5004_v4 = vpop.xlane.xlu0 %5003 }
0x10a4   : > { %v7870_v36 = vsub.f32 %v4985_v43, %v5019_v35  ;;  %v5020_v11 = vmul.f32 0.03125, %v5004_v4 }
0x10a5   : > { %v4995_v52 = vpop.xlane.xlu1 %4994 }
0x10a6   : > { %v7872_v5 = vsub.f32 %v4986_v33, %v5020_v11  ;;  %v5017_v61 = vmul.f32 0.03125, %v4995_v52  ;;  %v5035_v20 = vmul.f32 %v7870_v36, %v7870_v36 }
0x10a7   : > { %v4998_v19 = vpop.xlane.xlu0 %4997 }
0x10a8   : > { %v7876_v56 = vsub.f32 %v4983_v25, %v5017_v61  ;;  %v5018_v37 = vmul.f32 0.03125, %v4998_v19  ;;  %v5047_v38 = vsel %vm708_vm1, %v5035_v20, 0.0  ;;  %v5036_v2 = vmul.f32 %v7872_v5, %v7872_v5 }
0x10a9   : > { %5048 = vadd.xlane.f32.xlu1 %v5047_v38 }
0x10aa   : > { %v7881_v6 = vsub.f32 %v4984_v21, %v5018_v37  ;;  %v5033_v9 = vmul.f32 %v7876_v56, %v7876_v56  ;;  %v5050_v16 = vsel %vm708_vm1, %v5036_v2, 0.0  ;;  %v7915_v37 = vld [vmem:[%s650_s27] ss:$0 sm:$0xff] }
0x10ab   : > { %5051 = vadd.xlane.f32.xlu0 %v5050_v16  ;;  %v5137_v38 = vmul.f32 %v7915_v37, %v7870_v36 }
0x10ac   : > { %v5041_v23 = vsel %vm708_vm1, %v5033_v9, 0.0  ;;  %v5034_v42 = vmul.f32 %v7881_v6, %v7881_v6  ;;  %v7924_v9 = vld [vmem:[%s653_s25] ss:$0 sm:$0xff] }
0x10ad   : > { %5042 = vadd.xlane.f32.xlu1 %v5041_v23  ;;  %v5138_v23 = vmul.f32 %v7915_v37, %v7872_v5 }
0x10ae   : > { %v5044_v3 = vsel %vm708_vm1, %v5034_v42, 0.0 }
0x10af   : > { %5045 = vadd.xlane.f32.xlu0 %v5044_v3  ;;  %v5135_v3 = vmul.f32 %v7915_v37, %v7876_v56 }
0x10dd   : > { %v5007_v27 = vpop.xlane.xlu1 %5006 }
0x10de   : > { %v5021_v32 = vmul.f32 0.03125, %v5007_v27 }
0x10df   : > { %v5010_v47 = vpop.xlane.xlu0 %5009 }
0x10e0   : > { %v7890_v39 = vsub.f32 %v4987_v57, %v5021_v32  ;;  %v5022_v62 = vmul.f32 0.03125, %v5010_v47 }
0x10e1   : > { %v5013_v1 = vpop.xlane.xlu1 %5012 }
0x10e2   : > { %v7892_v13 = vsub.f32 %v4988_v63, %v5022_v62  ;;  %v5023_v12 = vmul.f32 0.03125, %v5013_v1  ;;  %v5037_v26 = vmul.f32 %v7890_v39, %v7890_v39  ;;  %v5136_v62 = vmul.f32 %v7915_v37, %v7881_v6 }
0x10e3   : > { %v5016_v10 = vpop.xlane.xlu0 %5015 }
0x10e4   : > { %v7896_v18 = vsub.f32 %v4989_v29, %v5023_v12  ;;  %v5024_v24 = vmul.f32 0.03125, %v5016_v10  ;;  %v5053_v30 = vsel %vm708_vm1, %v5037_v26, 0.0  ;;  %v5038_v28 = vmul.f32 %v7892_v13, %v7892_v13 }
0x10e5   : > { %5054 = vadd.xlane.f32.xlu1 %v5053_v30 }
0x10e6   : > { %v7901_v17 = vsub.f32 %v4990_v7, %v5024_v24  ;;  %v5039_v31 = vmul.f32 %v7896_v18, %v7896_v18  ;;  %v5056_v41 = vsel %vm708_vm1, %v5038_v28, 0.0 }
0x10e7   : > { %5057 = vadd.xlane.f32.xlu0 %v5056_v41 }
0x10e8   : > { %v5059_v43 = vsel %vm708_vm1, %v5039_v31, 0.0  ;;  %v5040_v44 = vmul.f32 %v7901_v17, %v7901_v17 }
0x10e9   : > { %5060 = vadd.xlane.f32.xlu1 %v5059_v43 }
0x10ea   : > { %v5062_v46 = vsel %vm708_vm1, %v5040_v44, 0.0 }
0x10eb   : > { %5063 = vadd.xlane.f32.xlu0 %v5062_v46 }
0x1136   : > { %v5049_v48 = vpop.xlane.xlu1 %5048 }
0x1137   : > { %v5067_v25 = vmul.f32 0.032258064, %v5049_v48 }
0x1138   : > { %v5052_v33 = vpop.xlane.xlu0 %5051 }
0x1139   : > { %6590 = vrsqrt.f32 %v5067_v25  ;;  %v5068_v50 = vmul.f32 0.032258064, %v5052_v33  ;;  %vm5089_vm10 = vcmp.eq.f32.partialorder %v5067_v25, inf  ;;  %v5092_v55 = vand.u32 2147483648, %v5067_v25 }
0x113a   : > { %v5043_v21 = vpop.xlane.xlu1 %5042  ;;  %vm5091_vm11 = vcmp.eq.f32.partialorder %v5067_v25, 0.0 }
0x113b   : > { %v5065_v45 = vmul.f32 0.032258064, %v5043_v21  ;;  %6592 = vrsqrt.f32 %v5068_v50  ;;  %vm5096_vm12 = vcmp.eq.f32.partialorder %v5068_v50, inf  ;;  %v5099_v29 = vand.u32 2147483648, %v5068_v50 }
0x113c   : > { %v5046_v49 = vpop.xlane.xlu0 %5045  ;;  %vm5098_vm13 = vcmp.eq.f32.partialorder %v5068_v50, 0.0 }
0x113d   : > { %6594 = vrsqrt.f32 %v5065_v45  ;;  %v5066_v8 = vmul.f32 0.032258064, %v5046_v49  ;;  %vm5075_vm14 = vcmp.eq.f32.partialorder %v5065_v45, inf  ;;  %v5078_v7 = vand.u32 2147483648, %v5065_v45 }
0x113e   : > { %vm5077_vm15 = vcmp.eq.f32.partialorder %v5065_v45, 0.0 }
0x113f   : > { %6596 = vrsqrt.f32 %v5066_v8  ;;  %vm5082_vm0 = vcmp.eq.f32.partialorder %v5066_v8, inf  ;;  %v5085_v52 = vand.u32 2147483648, %v5066_v8  ;;  %vm5084_vm2 = vcmp.eq.f32.partialorder %v5066_v8, 0.0 }
0x1143   : > { %v6591_v53 = vpop.eup %6590 }
0x1144   : > { %v5088_v54 = vmul.f32 %v6591_v53, %v5067_v25 }
0x1145   : > { %v6593_v15 = vpop.eup %6592 }
0x1146   : > { %v5090_v58 = vsel %vm5089_vm10, %v5067_v25, %v5088_v54  ;;  %v5095_v57 = vmul.f32 %v6593_v15, %v5068_v50 }
0x1147   : > { %v6595_v40 = vpop.eup %6594  ;;  %v5093_v22 = vsel %vm5091_vm11, %v5092_v55, %v5090_v58 }
0x1148   : > { %v5145_v60 = vadd.f32 1e-06, %v5093_v22  ;;  %v5074_v63 = vmul.f32 %v6595_v40, %v5065_v45  ;;  %v5097_v51 = vsel %vm5096_vm12, %v5068_v50, %v5095_v57 }
0x1149   : > { %v6597_v0 = vpop.eup %6596  ;;  %v5100_v14 = vsel %vm5098_vm13, %v5099_v29, %v5097_v51 }
0x114a   : > { %6598 = vrcp.f32 %v5145_v60  ;;  %v5076_v34 = vsel %vm5075_vm14, %v5065_v45, %v5074_v63  ;;  %v5146_v59 = vadd.f32 1e-06, %v5100_v14  ;;  %v5081_v4 = vmul.f32 %v6597_v0, %v5066_v8 }
0x114b   : > { %v5079_v35 = vsel %vm5077_vm15, %v5078_v7, %v5076_v34  ;;  %v5139_v14 = vmul.f32 %v7915_v37, %v7890_v39 }
0x114c   : > { %v5143_v11 = vadd.f32 1e-06, %v5079_v35  ;;  %6600 = vrcp.f32 %v5146_v59  ;;  %v5083_v61 = vsel %vm5082_vm0, %v5066_v8, %v5081_v4  ;;  %v5140_v35 = vmul.f32 %v7915_v37, %v7892_v13 }
0x114d   : > { %v5086_v20 = vsel %vm5084_vm2, %v5085_v52, %v5083_v61 }
0x114e   : > { %6602 = vrcp.f32 %v5143_v11  ;;  %v5144_v19 = vadd.f32 1e-06, %v5086_v20  ;;  %v5141_v11 = vmul.f32 %v7915_v37, %v7896_v18 }
0x1150   : > { %6604 = vrcp.f32 %v5144_v19 }
0x1154   : > { %v6599_v2 = vpop.eup %6598 }
0x1155   : > { %v5161_v16 = vmul.f32 %v6599_v2, %v5137_v38  ;;  %v5142_v38 = vmul.f32 %v7915_v37, %v7901_v17 }
0x1156   : > { %v6601_v42 = vpop.eup %6600 }
0x1157   : > { %v7931_v27 = vadd.f32 %v7924_v9, %v5161_v16  ;;  %v5162_v36 = vmul.f32 %v6601_v42, %v5138_v23 }
0x1158   : > { %v6603_v32 = vpop.eup %6602 }
0x1159   : > { %5183 = vst.msk [vmem:[#allocation2 + $0x10] sm:$0xff] %vm708_vm1, %v7931_v27  ;;  %v5159_v47 = vmul.f32 %v6603_v32, %v5135_v3  ;;  %v7938_v1 = vadd.f32 %v7924_v9, %v5162_v36  ;;  %v5201_v37 = vsel (!%p5761_p9), %vm708_vm1, %v7931_v27, 0.0 }
0x115a   : > { %v6605_v5 = vpop.eup %6604  ;;  %5202 = vadd.xlane.f32.xlu1 (!%p5761_p9), %v5201_v37 }
0x115b   : > { %v7941_v12 = vadd.f32 %v7924_v9, %v5159_v47  ;;  %5184 = vst.msk [vmem:[#allocation2 + $0x18] sm:$0xff] %vm708_vm1, %v7938_v1  ;;  %v5160_v56 = vmul.f32 %v6605_v5, %v5136_v62  ;;  %v5204_v42 = vsel (!%p5761_p9), %vm708_vm1, %v7938_v1, 0.0 }
0x115d   : > { %5181 = vst.msk [vmem:[#allocation2] sm:$0xff] %vm708_vm1, %v7941_v12  ;;  %v7948_v26 = vadd.f32 %v7924_v9, %v5160_v56  ;;  %v5195_v17 = vsel (!%p5761_p9), %vm708_vm1, %v7941_v12, 0.0 }
0x115e   : > { %5196 = vadd.xlane.f32.xlu0 (!%p5761_p9), %v5195_v17  ;;  %5205 = vadd.xlane.f32.xlu1 (!%p5761_p9), %v5204_v42 }
0x115f   : > { %5182 = vst.msk [vmem:[#allocation2 + $0x8] sm:$0xff] %vm708_vm1, %v7948_v26  ;;  %v5198_v23 = vsel (!%p5761_p9), %vm708_vm1, %v7948_v26, 0.0 }
0x1162   : > { %5199 = vadd.xlane.f32.xlu0 (!%p5761_p9), %v5198_v23 }
0x1172   : > { %v5055_v6 = vpop.xlane.xlu1 %5054 }
0x1173   : > { %v5069_v10 = vmul.f32 0.032258064, %v5055_v6 }
0x1174   : > { %v5058_v24 = vpop.xlane.xlu0 %5057 }
0x1175   : > { %6606 = vrsqrt.f32 %v5069_v10  ;;  %v5070_v30 = vmul.f32 0.032258064, %v5058_v24  ;;  %vm5103_vm3 = vcmp.eq.f32.partialorder %v5069_v10, inf  ;;  %v5106_v48 = vand.u32 2147483648, %v5069_v10 }
0x1176   : > { %v5061_v28 = vpop.xlane.xlu1 %5060  ;;  %vm5105_vm4 = vcmp.eq.f32.partialorder %v5069_v10, 0.0 }
0x1177   : > { %v5071_v31 = vmul.f32 0.032258064, %v5061_v28  ;;  %6608 = vrsqrt.f32 %v5070_v30  ;;  %vm5110_vm5 = vcmp.eq.f32.partialorder %v5070_v30, inf  ;;  %v5113_v8 = vand.u32 2147483648, %v5070_v30 }
0x1178   : > { %v5064_v41 = vpop.xlane.xlu0 %5063  ;;  %vm5112_vm6 = vcmp.eq.f32.partialorder %v5070_v30, 0.0 }
0x1179   : > { %6610 = vrsqrt.f32 %v5071_v31  ;;  %v5072_v43 = vmul.f32 0.032258064, %v5064_v41  ;;  %vm5117_vm7 = vcmp.eq.f32.partialorder %v5071_v31, inf  ;;  %v5120_v55 = vand.u32 2147483648, %v5071_v31 }
0x117a   : > { %vm5119_vm8 = vcmp.eq.f32.partialorder %v5071_v31, 0.0 }
0x117b   : > { %6612 = vrsqrt.f32 %v5072_v43  ;;  %vm5124_vm9 = vcmp.eq.f32.partialorder %v5072_v43, inf  ;;  %v5127_v63 = vand.u32 2147483648, %v5072_v43  ;;  %vm5126_vm10 = vcmp.eq.f32.partialorder %v5072_v43, 0.0 }
0x117f   : > { %v6607_v44 = vpop.eup %6606 }
0x1180   : > { %v5102_v46 = vmul.f32 %v6607_v44, %v5069_v10 }
0x1181   : > { %v6609_v25 = vpop.eup %6608 }
0x1182   : > { %v5104_v33 = vsel %vm5103_vm3, %v5069_v10, %v5102_v46  ;;  %v5109_v45 = vmul.f32 %v6609_v25, %v5070_v30 }
0x1183   : > { %v6611_v50 = vpop.eup %6610  ;;  %v5107_v21 = vsel %vm5105_vm4, %v5106_v48, %v5104_v33 }
0x1184   : > { %v5147_v49 = vadd.f32 1e-06, %v5107_v21  ;;  %v5116_v53 = vmul.f32 %v6611_v50, %v5071_v31  ;;  %v5111_v54 = vsel %vm5110_vm5, %v5070_v30, %v5109_v45 }
0x1185   : > { %v6613_v15 = vpop.eup %6612  ;;  %v5114_v58 = vsel %vm5112_vm6, %v5113_v8, %v5111_v54 }
0x1186   : > { %6614 = vrcp.f32 %v5147_v49  ;;  %v5118_v40 = vsel %vm5117_vm7, %v5071_v31, %v5116_v53  ;;  %v5148_v22 = vadd.f32 1e-06, %v5114_v58  ;;  %v5123_v60 = vmul.f32 %v6613_v15, %v5072_v43 }
0x1187   : > { %v5121_v57 = vsel %vm5119_vm8, %v5120_v55, %v5118_v40 }
0x1188   : > { %v5149_v29 = vadd.f32 1e-06, %v5121_v57  ;;  %6616 = vrcp.f32 %v5148_v22  ;;  %v5125_v51 = vsel %vm5124_vm9, %v5072_v43, %v5123_v60 }
0x1189   : > { %v5128_v7 = vsel %vm5126_vm10, %v5127_v63, %v5125_v51 }
0x118a   : > { %6618 = vrcp.f32 %v5149_v29  ;;  %v5150_v0 = vadd.f32 1e-06, %v5128_v7 }
0x118c   : > { %6620 = vrcp.f32 %v5150_v0 }
0x1190   : > { %v6615_v34 = vpop.eup %6614 }
0x1191   : > { %v5163_v59 = vmul.f32 %v6615_v34, %v5139_v14 }
0x1192   : > { %v6617_v4 = vpop.eup %6616 }
0x1193   : > { %v5177_v52 = vadd.f32 %v7924_v9, %v5163_v59  ;;  %v5164_v20 = vmul.f32 %v6617_v4, %v5140_v35 }
0x1194   : > { %v6619_v61 = vpop.eup %6618 }
0x1195   : > { %5185 = vst.msk [vmem:[#allocation2 + $0x20] sm:$0xff] %vm708_vm1, %v5177_v52  ;;  %v5165_v19 = vmul.f32 %v6619_v61, %v5141_v11  ;;  %v5178_v39 = vadd.f32 %v7924_v9, %v5164_v20  ;;  %5192 = sbr.rel (%p5761_p9) target bundleno = 4853 (0x12f5), region = 84 }
0x1196   : > { %v6621_v2 = vpop.eup %6620 }
0x1197   : > { %v5179_v16 = vadd.f32 %v7924_v9, %v5165_v19  ;;  %5186 = vst.msk [vmem:[#allocation2 + $0x28] sm:$0xff] %vm708_vm1, %v5178_v39  ;;  %v5166_v13 = vmul.f32 %v6621_v2, %v5142_v38  ;;  %v5210_v3 = vsel (!%p5761_p9), %vm708_vm1, %v5178_v39, 0.0 }
0x1198   : > { %5211 = vadd.xlane.f32.xlu1 (!%p5761_p9), %v5210_v3 }
0x1199   : > { %5187 = vst.msk [vmem:[#allocation2 + $0x30] sm:$0xff] %vm708_vm1, %v5179_v16  ;;  %v5180_v18 = vadd.f32 %v7924_v9, %v5166_v13  ;;  %v5207_v9 = vsel (!%p5761_p9), %vm708_vm1, %v5177_v52, 0.0  ;;  %v5213_v32 = vsel (!%p5761_p9), %vm708_vm1, %v5179_v16, 0.0 }
0x119a   : > { %5208 = vadd.xlane.f32.xlu0 (!%p5761_p9), %v5207_v9 }
0x119b   : > { %5188 = vst.msk [vmem:[#allocation2 + $0x38] sm:$0xff] %vm708_vm1, %v5180_v18  ;;  %v5216_v36 = vsel (!%p5761_p9), %vm708_vm1, %v5180_v18, 0.0 }
0x119c   : > { %5217 = vadd.xlane.f32.xlu1 %v5216_v36  ;;  %v8036_v36 = vld [vmem:[%s8152_s0] ss:$0 sm:$0xff] }
0x119e   : > { %5214 = vadd.xlane.f32.xlu0 %v5213_v32 }
0x11e7   : > { %v5203_v62 = vpop.xlane.xlu1 %5202 }
0x11e8   : > { %v5221_v56 = vmul.f32 0.03125, %v5203_v62 }
0x11ea   : > { %v7985_v10 = vsub.f32 %v7931_v27, %v5221_v56 }
0x11eb   : > { %v5197_v47 = vpop.xlane.xlu0 %5196  ;;  %v5206_v30 = vpop.xlane.xlu1 %5205 }
0x11ec   : > { %v5219_v5 = vmul.f32 0.03125, %v5197_v47  ;;  %v5222_v31 = vmul.f32 0.03125, %v5206_v30  ;;  %v5237_v43 = vmul.f32 %v7985_v10, %v7985_v10 }
0x11ee   : > { %v7982_v6 = vsub.f32 %v7941_v12, %v5219_v5  ;;  %v7995_v46 = vsub.f32 %v7938_v1, %v5222_v31  ;;  %v5249_v50 = vsel %vm708_vm1, %v5237_v43, 0.0 }
0x11ef   : > { %v5200_v24 = vpop.xlane.xlu0 %5199 }
0x11f0   : > { %v5220_v28 = vmul.f32 0.03125, %v5200_v24  ;;  %v5235_v41 = vmul.f32 %v7982_v6, %v7982_v6  ;;  %v5238_v45 = vmul.f32 %v7995_v46, %v7995_v46  ;;  %v5337_v31 = vmul.f32 %v8036_v36, %v7982_v6 }
0x11f2   : > { %v7992_v44 = vsub.f32 %v7948_v26, %v5220_v28  ;;  %v5243_v12 = vsel %vm708_vm1, %v5235_v41, 0.0  ;;  %v5252_v15 = vsel %vm708_vm1, %v5238_v45, 0.0 }
0x11f3   : > { %5244 = vadd.xlane.f32.xlu0 %v5243_v12 }
0x11f4   : > { %v5236_v21 = vmul.f32 %v7992_v44, %v7992_v44 }
0x11f6   : > { %v5246_v1 = vsel %vm708_vm1, %v5236_v21, 0.0 }
0x11f7   : > { %5250 = vadd.xlane.f32.xlu0 %v5249_v50  ;;  %5247 = vadd.xlane.f32.xlu1 %v5246_v1 }
0x11fb   : > { %5253 = vadd.xlane.f32.xlu1 %v5252_v15 }
0x1225   : > { %v5212_v48 = vpop.xlane.xlu1 %5211 }
0x1226   : > { %v5224_v33 = vmul.f32 0.03125, %v5212_v48 }
0x1227   : > { %v5209_v27 = vpop.xlane.xlu0 %5208 }
0x1228   : > { %v5223_v25 = vmul.f32 0.03125, %v5209_v27  ;;  %v8005_v49 = vsub.f32 %v5178_v39, %v5224_v33 }
0x1229   : > { %v5218_v53 = vpop.xlane.xlu1 %5217 }
0x122a   : > { %v8003_v26 = vsub.f32 %v5177_v52, %v5223_v25  ;;  %v5226_v55 = vmul.f32 0.03125, %v5218_v53  ;;  %v5240_v40 = vmul.f32 %v8005_v49, %v8005_v49 }
0x122b   : > { %v5215_v8 = vpop.xlane.xlu0 %5214 }
0x122c   : > { %v5225_v54 = vmul.f32 0.03125, %v5215_v8  ;;  %v5239_v58 = vmul.f32 %v8003_v26, %v8003_v26  ;;  %v8015_v57 = vsub.f32 %v5180_v18, %v5226_v55  ;;  %v5258_v63 = vsel %vm708_vm1, %v5240_v40, 0.0 }
0x122d   : > { %5259 = vadd.xlane.f32.xlu1 %v5258_v63 }
0x122e   : > { %v8013_v22 = vsub.f32 %v5179_v16, %v5225_v54  ;;  %v5255_v60 = vsel %vm708_vm1, %v5239_v58, 0.0  ;;  %v5242_v51 = vmul.f32 %v8015_v57, %v8015_v57 }
0x122f   : > { %5256 = vadd.xlane.f32.xlu0 %v5255_v60 }
0x1230   : > { %v5241_v29 = vmul.f32 %v8013_v22, %v8013_v22  ;;  %v5264_v0 = vsel %vm708_vm1, %v5242_v51, 0.0 }
0x1231   : > { %5265 = vadd.xlane.f32.xlu1 %v5264_v0 }
0x1232   : > { %v5261_v7 = vsel %vm708_vm1, %v5241_v29, 0.0 }
0x1233   : > { %5262 = vadd.xlane.f32.xlu0 %v5261_v7 }
0x1280   : > { %v5245_v14 = vpop.xlane.xlu0 %5244 }
0x1281   : > { %v5267_v34 = vmul.f32 0.032258064, %v5245_v14 }
0x1283   : > { %6630 = vrsqrt.f32 %v5267_v34  ;;  %vm5277_vm11 = vcmp.eq.f32.partialorder %v5267_v34, inf  ;;  %v5280_v17 = vand.u32 2147483648, %v5267_v34  ;;  %vm5279_vm12 = vcmp.eq.f32.partialorder %v5267_v34, 0.0 }
0x1284   : > { %v5248_v59 = vpop.xlane.xlu1 %5247  ;;  %v5251_v35 = vpop.xlane.xlu0 %5250 }
0x1285   : > { %v5268_v4 = vmul.f32 0.032258064, %v5248_v59  ;;  %v5269_v11 = vmul.f32 0.032258064, %v5251_v35  ;;  %v8054_v59 = vld [vmem:[%s8153_s30] ss:$0 sm:$0xff] }
0x1287   : > { %6632 = vrsqrt.f32 %v5268_v4  ;;  %vm5284_vm13 = vcmp.eq.f32.partialorder %v5268_v4, inf  ;;  %vm5286_vm14 = vcmp.eq.f32.partialorder %v5268_v4, 0.0  ;;  %v5287_v5 = vand.u32 2147483648, %v5268_v4 }
0x1288   : > { %6634 = vrsqrt.f32 %v5269_v11  ;;  %v5254_v52 = vpop.xlane.xlu1 %5253  ;;  %vm5291_vm15 = vcmp.eq.f32.partialorder %v5269_v11, inf  ;;  %v5294_v30 = vand.u32 2147483648, %v5269_v11  ;;  %vm5293_vm0 = vcmp.eq.f32.partialorder %v5269_v11, 0.0 }
0x1289   : > { %v5270_v20 = vmul.f32 0.032258064, %v5254_v52 }
0x128b   : > { %6636 = vrsqrt.f32 %v5270_v20  ;;  %vm5298_vm2 = vcmp.eq.f32.partialorder %v5270_v20, inf  ;;  %vm5300_vm3 = vcmp.eq.f32.partialorder %v5270_v20, 0.0  ;;  %v5301_v50 = vand.u32 2147483648, %v5270_v20 }
0x128d   : > { %v6631_v2 = vpop.eup %6630 }
0x128e   : > { %v5276_v18 = vmul.f32 %v6631_v2, %v5267_v34 }
0x1290   : > { %v5278_v37 = vsel %vm5277_vm11, %v5267_v34, %v5276_v18 }
0x1291   : > { %v6633_v42 = vpop.eup %6632  ;;  %v5281_v9 = vsel %vm5279_vm12, %v5280_v17, %v5278_v37  ;;  %vm5456_vm12 = vcmask 1041409  }
0x1292   : > { %v6635_v32 = vpop.eup %6634  ;;  %v5345_v47 = vadd.f32 1e-06, %v5281_v9  ;;  %v5283_v62 = vmul.f32 %v6633_v42, %v5268_v4 }
0x1293   : > { %v5290_v56 = vmul.f32 %v6635_v32, %v5269_v11 }
0x1294   : > { %v5285_v24 = vsel %vm5284_vm13, %v5268_v4, %v5283_v62  ;;  %vm5458_vm13 = vcmask 1042434  }
0x1295   : > { %v6637_v28 = vpop.eup %6636  ;;  %v5288_v41 = vsel %vm5286_vm14, %v5287_v5, %v5285_v24  ;;  %v5292_v43 = vsel %vm5291_vm15, %v5269_v11, %v5290_v56  ;;  %vm5460_vm14 = vcmask 1043459   ;;  %vm5462_vm15 = vcmask 1044484  }
0x1296   : > { %v5346_v27 = vadd.f32 1e-06, %v5288_v41  ;;  %v5295_v48 = vsel %vm5293_vm0, %v5294_v30, %v5292_v43  ;;  %v5297_v25 = vmul.f32 %v6637_v28, %v5270_v20  ;;  %vm5464_vm0 = vcmask 1045509  }
0x1297   : > { %v5347_v33 = vadd.f32 1e-06, %v5295_v48 }
0x1298   : > { %v5299_v45 = vsel %vm5298_vm2, %v5270_v20, %v5297_v25  ;;  %vm5466_vm2 = vcmask 1046534  }
0x1299   : > { %v5302_v53 = vsel %vm5300_vm3, %v5301_v50, %v5299_v45  ;;  %vm5468_vm3 = vcmask 1047559  }
0x129a   : > { %v5348_v55 = vadd.f32 1e-06, %v5302_v53 }
0x12ba   : > { %v5260_v38 = vpop.xlane.xlu1 %5259 }
0x12bb   : > { %v8025_v16 = vmul.f32 0.032258064, %v5260_v38  ;;  %v5338_v38 = vmul.f32 %v8036_v36, %v7992_v44 }
0x12bc   : > { %v5257_v61 = vpop.xlane.xlu0 %5256 }
0x12bd   : > { %v5271_v19 = vmul.f32 0.032258064, %v5257_v61  ;;  %vm5312_vm6 = vcmp.eq.f32.partialorder %v8025_v16, inf  ;;  %vm5314_vm7 = vcmp.eq.f32.partialorder %v8025_v16, 0.0  ;;  %v5315_v60 = vand.u32 2147483648, %v8025_v16 }
0x12be   : > { %v5266_v23 = vpop.xlane.xlu1 %5265 }
0x12bf   : > { %6638 = vrsqrt.f32 %v5271_v19  ;;  %v8031_v3 = vmul.f32 0.032258064, %v5266_v23  ;;  %vm5305_vm4 = vcmp.eq.f32.partialorder %v5271_v19, inf  ;;  %v5308_v1 = vand.u32 2147483648, %v5271_v19 }
0x12c0   : > { %v5263_v39 = vpop.xlane.xlu0 %5262  ;;  %6640 = vrsqrt.f32 %v8025_v16  ;;  %vm5307_vm5 = vcmp.eq.f32.partialorder %v5271_v19, 0.0 }
0x12c1   : > { %v8027_v13 = vmul.f32 0.032258064, %v5263_v39  ;;  %vm5326_vm10 = vcmp.eq.f32.partialorder %v8031_v3, inf  ;;  %v5329_v20 = vand.u32 2147483648, %v8031_v3  ;;  %vm5328_vm11 = vcmp.eq.f32.partialorder %v8031_v3, 0.0 }
0x12c3   : > { %6642 = vrsqrt.f32 %v8027_v13  ;;  %vm5319_vm8 = vcmp.eq.f32.partialorder %v8027_v13, inf  ;;  %v5322_v51 = vand.u32 2147483648, %v8027_v13  ;;  %vm5321_vm9 = vcmp.eq.f32.partialorder %v8027_v13, 0.0 }
0x12c4   : > { %6644 = vrsqrt.f32 %v8031_v3 }
0x12c5   : > { %6646 = vrcp.f32 %v5345_v47  ;;  %v5341_v47 = vmul.f32 %v8036_v36, %v8003_v26  ;;  %v5343_v26 = vmul.f32 %v8036_v36, %v8013_v22 }
0x12c6   : > { %6648 = vrcp.f32 %v5346_v27 }
0x12c7   : > { %6650 = vrcp.f32 %v5347_v33 }
0x12c8   : > { %6652 = vrcp.f32 %v5348_v55 }
0x12c9   : > { %v6639_v12 = vpop.eup %6638 }
0x12ca   : > { %v5304_v21 = vmul.f32 %v6639_v12, %v5271_v19  ;;  %v6641_v8 = vpop.eup %6640 }
0x12cb   : > { %v5311_v58 = vmul.f32 %v6641_v8, %v8025_v16 }
0x12cc   : > { %v5306_v6 = vsel %vm5305_vm4, %v5271_v19, %v5304_v21  ;;  %v5344_v21 = vmul.f32 %v8036_v36, %v8015_v57 }
0x12cd   : > { %v6643_v54 = vpop.eup %6642  ;;  %v5309_v15 = vsel %vm5307_vm5, %v5308_v1, %v5306_v6  ;;  %v5313_v63 = vsel %vm5312_vm6, %v8025_v16, %v5311_v58 }
0x12ce   : > { %v5349_v40 = vadd.f32 1e-06, %v5309_v15  ;;  %v5318_v29 = vmul.f32 %v6643_v54, %v8027_v13  ;;  %v6645_v7 = vpop.eup %6644  ;;  %v5316_v0 = vsel %vm5314_vm7, %v5315_v60, %v5313_v63 }
0x12cf   : > { %v6647_v34 = vpop.eup %6646  ;;  %v5350_v35 = vadd.f32 1e-06, %v5316_v0  ;;  %v5325_v11 = vmul.f32 %v6645_v7, %v8031_v3 }
0x12d0   : > { %6654 = vrcp.f32 %v5349_v40  ;;  %v5320_v14 = vsel %vm5319_vm8, %v8027_v13, %v5318_v29  ;;  %v5361_v52 = vmul.f32 %v6647_v34, %v5337_v31  ;;  %v6649_v16 = vpop.eup %6648  ;;  %v5339_v13 = vmul.f32 %v8036_v36, %v7985_v10 }
0x12d1   : > { %v5323_v4 = vsel %vm5321_vm9, %v5322_v51, %v5320_v14  ;;  %6656 = vrcp.f32 %v5350_v35  ;;  %v5327_v19 = vsel %vm5326_vm10, %v8031_v3, %v5325_v11  ;;  %v6651_v17 = vpop.eup %6650  ;;  %v5362_v23 = vmul.f32 %v6649_v16, %v5338_v38 }
0x12d2   : > { %v5351_v61 = vadd.f32 1e-06, %v5323_v4  ;;  %v5375_v39 = vadd.f32 %v8054_v59, %v5361_v52  ;;  %v5330_v2 = vsel %vm5328_vm11, %v5329_v20, %v5327_v19  ;;  %v5363_v9 = vmul.f32 %v6651_v17, %v5339_v13  ;;  %v6653_v32 = vpop.eup %6652 }
0x12d3   : > { %v5352_v18 = vadd.f32 1e-06, %v5330_v2  ;;  %v5340_v3 = vmul.f32 %v8036_v36, %v7995_v46  ;;  %v5376_v44 = vadd.f32 %v8054_v59, %v5362_v23  ;;  %v5342_v46 = vmul.f32 %v8036_v36, %v8005_v49 }
0x12d4   : > { %6658 = vrcp.f32 %v5351_v61  ;;  %v5383_v37 = vsel %vm708_vm1, %v5375_v39, 0.0  ;;  %v5377_v10 = vadd.f32 %v8054_v59, %v5363_v9 }
0x12d5   : > { %v5384_v42 = vrot.slane %v5383_v37, 4  ;;  %6660 = vrcp.f32 %v5352_v18  ;;  %v5390_v56 = vsel %vm708_vm1, %v5376_v44, 0.0  ;;  %v5364_v24 = vmul.f32 %v6653_v32, %v5340_v3 }
0x12d6   : > { %v5391_v28 = vrot.slane %v5390_v56, 4  ;;  %v5397_v31 = vsel %vm708_vm1, %v5377_v10, 0.0 }
0x12d7   : > { %v5385_v62 = vadd.f32 %v5384_v42, %v5383_v37  ;;  %v5398_v43 = vrot.slane %v5397_v31, 4  ;;  %v5378_v12 = vadd.f32 %v8054_v59, %v5364_v24 }
0x12d8   : > { %v5392_v25 = vadd.f32 %v5391_v28, %v5390_v56 }
0x12d9   : > { %v5386_v30 = vrot.slane %v5385_v62, 2  ;;  %v5399_v45 = vadd.f32 %v5398_v43, %v5397_v31  ;;  %v5404_v1 = vsel %vm708_vm1, %v5378_v12, 0.0 }
0x12da   : > { %v6655_v5 = vpop.eup %6654  ;;  %v5393_v53 = vrot.slane %v5392_v25, 2  ;;  %v5405_v6 = vrot.slane %v5404_v1, 4 }
0x12db   : > { %v5365_v41 = vmul.f32 %v6655_v5, %v5341_v47  ;;  %v6657_v27 = vpop.eup %6656  ;;  %v5387_v48 = vadd.f32 %v5386_v30, %v5385_v62  ;;  %v5400_v55 = vrot.slane %v5399_v45, 2 }
0x12dc   : > { %v5366_v8 = vmul.f32 %v6657_v27, %v5342_v46  ;;  %v5394_v29 = vadd.f32 %v5393_v53, %v5392_v25  ;;  %v5406_v63 = vadd.f32 %v5405_v6, %v5404_v1 }
0x12dd   : > { %v5379_v33 = vadd.f32 %v8054_v59, %v5365_v41  ;;  %v5388_v49 = vrot.slane %v5387_v48, 1  ;;  %v5401_v57 = vadd.f32 %v5400_v55, %v5399_v45 }
0x12de   : > { %v6659_v50 = vpop.eup %6658  ;;  %v5380_v22 = vadd.f32 %v8054_v59, %v5366_v8  ;;  %v5395_v0 = vrot.slane %v5394_v29, 1  ;;  %v5407_v14 = vrot.slane %v5406_v63, 2 }
0x12df   : > { %v5411_v54 = vsel %vm708_vm1, %v5379_v33, 0.0  ;;  %v5367_v58 = vmul.f32 %v6659_v50, %v5343_v26  ;;  %v6661_v40 = vpop.eup %6660  ;;  %v5389_v60 = vadd.f32 %v5388_v49, %v5387_v48  ;;  %v5402_v35 = vrot.slane %v5401_v57, 1 }
0x12e0   : > { %v5412_v15 = vrot.slane %v5411_v54, 4  ;;  %v5418_v51 = vsel %vm708_vm1, %v5380_v22, 0.0  ;;  %v5368_v52 = vmul.f32 %v6661_v40, %v5344_v21  ;;  %v5396_v61 = vadd.f32 %v5395_v0, %v5394_v29 }
0x12e1   : > { %v5381_v7 = vadd.f32 %v8054_v59, %v5367_v58  ;;  %v5419_v34 = vrot.slane %v5418_v51, 4  ;;  %v5408_v20 = vadd.f32 %v5407_v14, %v5406_v63  ;;  %v5440_v39 = vmul.f32 0.125, %v5389_v60 }
0x12e2   : > { %v5413_v36 = vadd.f32 %v5412_v15, %v5411_v54  ;;  %v5403_v2 = vadd.f32 %v5402_v35, %v5401_v57  ;;  %v5382_v13 = vadd.f32 %v8054_v59, %v5368_v52  ;;  %v5441_v18 = vmul.f32 0.125, %v5396_v61 }
0x12e3   : > { %v5425_v11 = vsel %vm708_vm1, %v5381_v7, 0.0  ;;  %v5420_v19 = vadd.f32 %v5419_v34, %v5418_v51  ;;  %v5409_v17 = vrot.slane %v5408_v20, 1 }
0x12e4   : > { %v5414_v4 = vrot.slane %v5413_v36, 2  ;;  %v5426_v38 = vrot.slane %v5425_v11, 4  ;;  %v5442_v42 = vmul.f32 0.125, %v5403_v2  ;;  %v5432_v3 = vsel %vm708_vm1, %v5382_v13, 0.0 }
0x12e5   : > { %v5421_v37 = vrot.slane %v5420_v19, 2  ;;  %v5457_v44 = vsel %vm5456_vm12, %v5441_v18, %v5440_v39  ;;  %v5410_v32 = vadd.f32 %v5409_v17, %v5408_v20  ;;  %v5433_v56 = vrot.slane %v5432_v3, 4 }
0x12e6   : > { %v5415_v16 = vadd.f32 %v5414_v4, %v5413_v36  ;;  %v5427_v23 = vadd.f32 %v5426_v38, %v5425_v11  ;;  %v5459_v10 = vsel %vm5458_vm13, %v5442_v42, %v5457_v44 }
0x12e7   : > { %v5422_v47 = vadd.f32 %v5421_v37, %v5420_v19  ;;  %v5443_v24 = vmul.f32 0.125, %v5410_v32  ;;  %v5434_v31 = vadd.f32 %v5433_v56, %v5432_v3 }
0x12e8   : > { %v5416_v9 = vrot.slane %v5415_v16, 1  ;;  %v5428_v62 = vrot.slane %v5427_v23, 2 }
0x12e9   : > { %v5423_v59 = vrot.slane %v5422_v47, 1  ;;  %v5461_v41 = vsel %vm5460_vm14, %v5443_v24, %v5459_v10  ;;  %v5435_v27 = vrot.slane %v5434_v31, 2 }
0x12ea   : > { %v5417_v5 = vadd.f32 %v5416_v9, %v5415_v16  ;;  %v5429_v30 = vadd.f32 %v5428_v62, %v5427_v23 }
0x12eb   : > { %v5424_v46 = vadd.f32 %v5423_v59, %v5422_v47  ;;  %v5436_v25 = vadd.f32 %v5435_v27, %v5434_v31 }
0x12ec   : > { %v5444_v28 = vmul.f32 0.125, %v5417_v5  ;;  %v5430_v43 = vrot.slane %v5429_v30, 1 }
0x12ed   : > { %v5445_v26 = vmul.f32 0.125, %v5424_v46  ;;  %v5437_v21 = vrot.slane %v5436_v25, 1 }
0x12ee   : > { %v5463_v12 = vsel %vm5462_vm15, %v5444_v28, %v5461_v41  ;;  %v5431_v48 = vadd.f32 %v5430_v43, %v5429_v30 }
0x12ef   : > { %v5465_v33 = vsel %vm5464_vm0, %v5445_v26, %v5463_v12  ;;  %v5438_v1 = vadd.f32 %v5437_v21, %v5436_v25 }
0x12f0   : > { %v5446_v50 = vmul.f32 0.125, %v5431_v48 }
0x12f1   : > { %v5447_v8 = vmul.f32 0.125, %v5438_v1 }
0x12f2   : > { %v5467_v45 = vsel %vm5466_vm2, %v5446_v50, %v5465_v33 }
0x12f3   : > { %v5469_v49 = vsel %vm5468_vm3, %v5447_v8, %v5467_v45 }
0x12f4   : > { %5471 = vst.msk [vmem:[%s6892_s17] sm:$0xff] %vm708_vm1, %v5469_v49 }
0x12f5 PF: > { %s8154_s15 = sld [smem:[#allocation7_spill]]  ;;  %s8155_s29 = sld [smem:[#allocation5_spill]] }
0x12f6   : > { %s8156_s30 = sld [smem:[#allocation6_spill]]  ;;  %s8158_s16 = sld [smem:[#allocation9_spill]] }
0x12fb   : > { %s24_s17 = sadd.s32 1, %s8154_s15   ;;  %s8157_s15 = sld [smem:[#allocation8_spill]] }
0x12fc   : > { %p21_p10 = scmp.ge.s32.totalorder %s24_s17, 6  }
0x12fe   :  { %23 = sbr.rel (!%p21_p10) target bundleno = 7 (0x7), region = 147 }

</bundles_post_ra>
